<compile_context>
chip_gen: v5e
topology: v5e:2x2
jax: 0.10.0
libtpu: 0.0.40
codegen_flags: <defaults>
</compile_context>

<pallas_src>
import functools
import math
from types import SimpleNamespace

import numpy as np
import jax
import jax.numpy as jnp
from jax import lax
from jax.experimental import pallas as pl
from jax.experimental.pallas import tpu as pltpu


# --------------------------------------------------------------------------
# Helpers
# --------------------------------------------------------------------------
def _full_spec(shape):
    """BlockSpec covering the full array in a single grid step."""
    zeros = (0,) * len(shape)
    return pl.BlockSpec(shape, lambda i: zeros)


def im2col_s2p1k3(x_nhwc):
    """3x3 stride-2 pad-1 patches.  Returns ((B*Ho*Wo, Cin*9), Ho, Wo).
    Flattened patch ordering is (cin, kh, kw) to match the PyTorch weight layout."""
    B, H, W, C = x_nhwc.shape
    Ho, Wo = H // 2, W // 2
    xp = jnp.pad(x_nhwc, ((0, 0), (1, 1), (1, 1), (0, 0)))
    cols = []
    for di in range(3):
        for dj in range(3):
            cols.append(xp[:, di:di + 2 * Ho - 1:2, dj:dj + 2 * Wo - 1:2, :])
    p = jnp.stack(cols, axis=3)                 # (B, Ho, Wo, 9, C)
    p = jnp.transpose(p, (0, 1, 2, 4, 3))       # (B, Ho, Wo, C, 9)
    return p.reshape(B * Ho * Wo, C * 9), Ho, Wo


def build_conv2_selection_np(h_in, w_in, n_pad):
    """0/1 matrix (9*n_pad, h_in*w_in).  Row t*n_pad + o selects the conv1-output
    pixel (2*oi-1+kh, 2*oj-1+kw) feeding conv2 tap t=kh*3+kw at output position
    o=oi*w_out+oj.  Out-of-range (zero-padding) taps and the o >= h_out*w_out
    sublane-alignment rows are all-zero, so their matmul contribution vanishes."""
    h_out, w_out = h_in // 2, w_in // 2
    S = np.zeros((9 * n_pad, h_in * w_in), np.float32)
    for kh in range(3):
        for kw in range(3):
            t = kh * 3 + kw
            for oi in range(h_out):
                for oj in range(w_out):
                    ii, jj = 2 * oi - 1 + kh, 2 * oj - 1 + kw
                    if 0 <= ii < h_in and 0 <= jj < w_in:
                        S[t * n_pad + oi * w_out + oj, ii * w_in + jj] = 1.0
    return S


def sine_position_encoding_np(h, w, hidden_dim=32, temperature=10000.0):
    # DETR-style PositionEmbeddingSine(num_pos_feats=hidden_dim//2, normalize=True).
    # TODO(synk): build_position_encoding source not in the prompt; this follows
    # the standard BotCL/DETR 'sine' implementation (normalize=True, scale=2*pi).
    num_pos_feats = hidden_dim // 2
    ones = np.ones((h, w), np.float32)
    y_embed = np.cumsum(ones, axis=0)
    x_embed = np.cumsum(ones, axis=1)
    eps = 1e-6
    scale = 2.0 * math.pi
    y_embed = y_embed / (y_embed[-1:, :] + eps) * scale
    x_embed = x_embed / (x_embed[:, -1:] + eps) * scale
    dim_t = np.arange(num_pos_feats, dtype=np.float32)
    dim_t = temperature ** (2.0 * np.floor(dim_t / 2.0) / num_pos_feats)
    pos_x = x_embed[:, :, None] / dim_t
    pos_y = y_embed[:, :, None] / dim_t
    pos_x = np.stack((np.sin(pos_x[:, :, 0::2]), np.cos(pos_x[:, :, 1::2])),
                     axis=3).reshape(h, w, num_pos_feats)
    pos_y = np.stack((np.sin(pos_y[:, :, 0::2]), np.cos(pos_y[:, :, 1::2])),
                     axis=3).reshape(h, w, num_pos_feats)
    return np.concatenate((pos_y, pos_x), axis=2)   # (h, w, hidden_dim)


# --------------------------------------------------------------------------
# The single fused kernel
# --------------------------------------------------------------------------
def _concept_autoencoder_kernel(
        p1_ref, s2_ref, pe_ref,
        w1_ref, b1_ref, w2_ref, b2_ref,
        slots_ref, wq_ref, bq_ref, wk_ref, bk_ref,
        aw1_ref, ab1_ref, aw2_ref, ab2_ref,
        dw1_ref, db1_ref, dw2_ref, db2_ref,
        cpt_ref, pred_ref, rec_ref, attn_ref, upd_ref,
        *, B, N, NP, C, attn_scale, model_scale, eps, layer, deactivate):
    f32 = jnp.float32
    w1 = w1_ref[...]                      # (9, 16)
    b1 = b1_ref[...]                      # (1, 16)
    s2 = s2_ref[...]                      # (9*NP, H1*W1)  conv2 tap-selection matrix
    b2 = b2_ref[...]                      # (1, 32)
    wk = wk_ref[...]                      # (32, 32)

    # q = to_q(initial_slots): input independent, but one tiny dot on the idle
    # MXU beats a separate XLA op + HBM round trip in the wrapper.
    q = jnp.dot(slots_ref[...], wq_ref[...],
                preferred_element_type=f32) + bq_ref[...]              # (C, D)

    # Position encoding folded into the key bias: k = v @ Wk + (pe @ Wk + bk),
    # computed once (hoisted out of the per-sample loop).
    k_bias = jnp.dot(pe_ref[...], wk, preferred_element_type=f32) + bk_ref[...]  # (N, D)

    # per-concept attention sums, collected concept-major: sums_cb[c, b]
    sums_cb = jnp.zeros((C, B), f32)

    for b in range(B):  # B tiny & static -> unrolled; all per-sample indexing on leading axes
        # ---- conv1 as an im2col matmul (+bias, relu); h1 stays in VMEM/vregs ----
        h1 = jnp.maximum(
            jnp.dot(p1_ref[b], w1, preferred_element_type=f32) + b1, 0.0)   # (196, 16)

        # ---- conv2, gather-free: one selection dot pulls all 3x3/stride-2 taps
        # (rows t*NP + o, zero rows for padding/alignment), then 9 per-tap
        # (NP,16)x(16,32) dots on sublane-aligned NP=56-row blocks. ----
        taps = jnp.dot(s2, h1, preferred_element_type=f32)                  # (9*NP, 16)
        acc = jnp.dot(taps[0:NP, :], w2_ref[0], preferred_element_type=f32)
        for t in range(1, 9):
            acc = acc + jnp.dot(taps[t * NP:(t + 1) * NP, :], w2_ref[t],
                                preferred_element_type=f32)                 # (NP, 32)
        v = jnp.maximum(acc[:N, :] + b2, 0.0)                               # (N, 32)

        # ---- scouter attention (single pass, sigmoid, sum-normalised updates) ----
        # TODO(synk): ScouterAttention source not in the prompt; this follows the
        # BotCL reference (sigmoid attention, sum-normalised updates); its iters
        # loop does not update the slots, so a single pass is identical.
        k = jnp.dot(v, wk, preferred_element_type=f32) + k_bias             # (N, 32)
        dots = lax.dot_general(q, k, (((1,), (1,)), ((), ())),
                               preferred_element_type=f32) * attn_scale     # (C, N)
        a = jax.nn.sigmoid(dots)                                            # (C, N)

        # per-concept sum computed ONCE, reused for both the update normalisation
        # and the concept activation (no duplicate reduction / reciprocal).
        s = jnp.sum(a, axis=-1, keepdims=True)                              # (C, 1)
        upd = jnp.dot(a / (s + eps), v, preferred_element_type=f32)         # (C, 32)

        attn_ref[b] = a                     # un-normalised attention, as in PyTorch
        upd_ref[b] = upd

        onehot_b = (lax.broadcasted_iota(jnp.int32, (1, B), 1) == b).astype(f32)
        sums_cb = sums_cb + s * onehot_b    # place column b, pure VPU broadcast

    # attn_cls[b, c] = sum_n attn[b, c, n].  The tiny (C,B)->(B,C) reorientation is
    # done as a dot with eye(B) so it uses the idle MXU instead of an XLU transpose.
    eye_b = (lax.broadcasted_iota(jnp.int32, (B, B), 0) ==
             lax.broadcasted_iota(jnp.int32, (B, B), 1)).astype(f32)
    attn_cls = lax.dot_general(eye_b, sums_cb, (((1,), (1,)), ((), ())),
                               preferred_element_type=f32)                  # (B, C)
    cpt = jnp.tanh(model_scale * attn_cls)

    # in-place deactivation of one concept of sample 0 (static config), mirroring
    # PyTorch's `x[0][deactivate - 1] = 0`, which also aliases the returned cpt.
    if deactivate != -1:
        row = lax.broadcasted_iota(jnp.int32, cpt.shape, 0)
        col = lax.broadcasted_iota(jnp.int32, cpt.shape, 1)
        cpt = jnp.where((row == 0) & (col == deactivate - 1), 0.0, cpt)

    cpt_ref[...] = (cpt - 0.5) * 2.0

    # ---- aggregate head -------------------------------------------------------
    h = cpt
    if layer != 1:
        h = jnp.maximum(jnp.dot(h, aw1_ref[...], preferred_element_type=f32)
                        + ab1_ref[...], 0.0)
    pred_ref[...] = (jnp.dot(h, aw2_ref[...], preferred_element_type=f32)
                     + ab2_ref[...])

    # ---- decoder: relu(fc1) -> tanh(fc2) --------------------------------------
    d = jnp.maximum(jnp.dot(cpt, dw1_ref[...], preferred_element_type=f32)
                    + db1_ref[...], 0.0)
    rec_ref[...] = jnp.tanh(jnp.dot(d, dw2_ref[...], preferred_element_type=f32)
                            + db2_ref[...])


def pallas_concept_autoencoder(p1, s2, pe, params, *, B, N, NP, C, D,
                               layer, deactivate):
    inputs = (
        p1, s2, pe,
        params["conv1_w"], params["conv1_b"],
        params["conv2_w"], params["conv2_b"],
        params["initial_slots"],
        params["to_q_w"], params["to_q_b"],
        params["to_k_w"], params["to_k_b"],
        params["agg_fc1_w"], params["agg_fc1_b"],
        params["agg_fc2_w"], params["agg_fc2_b"],
        params["fc1_w"], params["fc1_b"],
        params["fc2_w"], params["fc2_b"],
    )
    out_shapes = (
        jax.ShapeDtypeStruct((B, C), jnp.float32),        # (cpt - 0.5) * 2
        jax.ShapeDtypeStruct((B, 10), jnp.float32),       # pred
        jax.ShapeDtypeStruct((B, 28 * 28), jnp.float32),  # reconstruction
        jax.ShapeDtypeStruct((B, C, N), jnp.float32),     # attn
        jax.ShapeDtypeStruct((B, C, D), jnp.float32),     # updates
    )
    kern = functools.partial(
        _concept_autoencoder_kernel, B=B, N=N, NP=NP, C=C,
        attn_scale=float(D) ** -0.5, model_scale=1.0, eps=1e-8,
        layer=layer, deactivate=deactivate)
    return pl.pallas_call(
        kern,
        out_shape=out_shapes,
        grid=(1,),
        in_specs=[_full_spec(x.shape) for x in inputs],
        out_specs=tuple(_full_spec(s.shape) for s in out_shapes),
        compiler_params=pltpu.CompilerParams(
            dimension_semantics=("arbitrary",)),
    )(*inputs)


# --------------------------------------------------------------------------
# Parameters (deterministic synthetic init; shapes per ConceptAutoencoder.__init__)
# --------------------------------------------------------------------------
def init_params(key, num_concepts, hidden_dim=32):
    ks = jax.random.split(key, 18)

    def w(k, shape, fan_in):
        return jax.random.normal(k, shape, jnp.float32) / jnp.sqrt(float(fan_in))

    c1 = w(ks[0], (16, 1, 3, 3), 9)                    # PyTorch (Cout, Cin, kh, kw)
    c2 = w(ks[1], (hidden_dim, 16, 3, 3), 16 * 9)
    return {
        # conv1 weight as an im2col matmul operand: rows ordered t = kh*3+kw
        "conv1_w": jnp.transpose(c1.reshape(16, 9), (1, 0)),                 # (9, 16)
        "conv1_b": w(ks[2], (1, 16), 9),
        # conv2 weight regrouped per tap: (t = kh*3+kw, cin, cout)
        "conv2_w": jnp.transpose(c2.reshape(hidden_dim, 16, 9), (2, 1, 0)),  # (9, 16, 32)
        "conv2_b": w(ks[3], (1, hidden_dim), 16 * 9),
        "to_q_w": w(ks[4], (hidden_dim, hidden_dim), hidden_dim),
        "to_q_b": w(ks[5], (1, hidden_dim), hidden_dim),
        "to_k_w": w(ks[6], (hidden_dim, hidden_dim), hidden_dim),
        "to_k_b": w(ks[7], (1, hidden_dim), hidden_dim),
        "initial_slots": jax.random.normal(ks[8], (num_concepts, hidden_dim), jnp.float32),
        "agg_fc1_w": w(ks[9], (num_concepts, num_concepts), num_concepts),
        "agg_fc1_b": w(ks[10], (1, num_concepts), num_concepts),
        "agg_fc2_w": w(ks[11], (num_concepts, 10), num_concepts),
        "agg_fc2_b": w(ks[12], (1, 10), num_concepts),
        "fc1_w": w(ks[13], (num_concepts, 400), num_concepts),
        "fc1_b": w(ks[14], (1, 400), num_concepts),
        "fc2_w": w(ks[15], (400, 28 * 28), 400),
        "fc2_b": w(ks[16], (1, 28 * 28), 400),
    }


# --------------------------------------------------------------------------
# Forward pass
# --------------------------------------------------------------------------
def concept_autoencoder_forward(params, x_nchw, *, args, num_concepts, hidden_dim=32):
    B = x_nchw.shape[0]
    x = jnp.transpose(x_nchw, (0, 2, 3, 1))                  # NCHW -> NHWC

    # conv1 im2col on the RAW input only (tiny XLA prologue fusion, ~14 KB).  The
    # conv1 matmul and everything downstream run inside the single Pallas kernel,
    # so neither h1 nor the conv2 patches ever round-trip through HBM.
    p1, H1, W1 = im2col_s2p1k3(x)
    p1 = p1.reshape(B, H1 * W1, 9)

    H2, W2 = H1 // 2, W1 // 2
    N = H2 * W2
    NP = ((N + 7) // 8) * 8            # tokens padded to a sublane multiple (56)

    # Trace-time numpy constants (baked into the executable; no per-step recompute).
    s2 = jnp.asarray(build_conv2_selection_np(H1, W1, NP), jnp.float32)   # (9*NP, H1*W1)
    pe = jnp.asarray(
        sine_position_encoding_np(H2, W2, hidden_dim).reshape(N, hidden_dim),
        jnp.float32)                                                       # (N, D)

    return pallas_concept_autoencoder(
        p1, s2, pe, params, B=B, N=N, NP=NP, C=num_concepts, D=hidden_dim,
        layer=args.layer, deactivate=args.deactivate)


# --------------------------------------------------------------------------
# Pure-JAX reference (for a loose parity check of the fused kernel)
# --------------------------------------------------------------------------
def reference_forward(params, x_nchw, pe, *, layer, deactivate, hidden_dim=32):
    B = x_nchw.shape[0]
    dn = ("NCHW", "OIHW", "NCHW")
    w1 = jnp.transpose(params["conv1_w"], (1, 0)).reshape(16, 1, 3, 3)
    w2 = jnp.transpose(params["conv2_w"], (2, 1, 0)).reshape(hidden_dim, 16, 3, 3)
    h1 = jax.nn.relu(lax.conv_general_dilated(x_nchw, w1, (2, 2), ((1, 1), (1, 1)),
                                              dimension_numbers=dn)
                     + params["conv1_b"].reshape(1, 16, 1, 1))
    h2 = jax.nn.relu(lax.conv_general_dilated(h1, w2, (2, 2), ((1, 1), (1, 1)),
                                              dimension_numbers=dn)
                     + params["conv2_b"].reshape(1, hidden_dim, 1, 1))
    v = jnp.transpose(h2.reshape(B, hidden_dim, -1), (0, 2, 1))       # (B, N, D)
    vpe = v + pe[None]
    q = params["initial_slots"] @ params["to_q_w"] + params["to_q_b"]  # (C, D)
    k = vpe @ params["to_k_w"] + params["to_k_b"]                      # (B, N, D)
    dots = jnp.einsum("cd,bnd->bcn", q, k) * (float(hidden_dim) ** -0.5)
    attn = jax.nn.sigmoid(dots)
    s = attn.sum(-1, keepdims=True)
    updates = jnp.einsum("bcn,bnd->bcd", attn / (s + 1e-8), v)
    cpt = jnp.tanh(1.0 * s[..., 0])
    if deactivate != -1:
        cpt = cpt.at[0, deactivate - 1].set(0.0)
    h = cpt
    if layer != 1:
        h = jax.nn.relu(h @ params["agg_fc1_w"] + params["agg_fc1_b"])
    pred = h @ params["agg_fc2_w"] + params["agg_fc2_b"]
    d = jax.nn.relu(cpt @ params["fc1_w"] + params["fc1_b"])
    rec = jnp.tanh(d @ params["fc2_w"] + params["fc2_b"])
    return (cpt - 0.5) * 2.0, pred, rec, attn, updates


# --------------------------------------------------------------------------
if __name__ == "__main__":
    args = SimpleNamespace(layer=2, deactivate=-1)
    num_concepts = 10
    hidden_dim = 32

    key = jax.random.PRNGKey(0)
    kp, kx = jax.random.split(key)
    params = init_params(kp, num_concepts, hidden_dim)
    x = jax.random.normal(kx, (2, 1, 28, 28), jnp.float32)   # MNIST-shaped NCHW input

    fwd = jax.jit(functools.partial(concept_autoencoder_forward,
                                    args=args, num_concepts=num_concepts,
                                    hidden_dim=hidden_dim))
    outs = jax.block_until_ready(fwd(params, x))
    cpt2, pred, rec, attn, updates = outs

    assert cpt2.shape == (2, num_concepts)
    assert pred.shape == (2, 10)
    assert rec.shape == (2, 28 * 28)
    assert attn.shape == (2, num_concepts, 49)
    assert updates.shape == (2, num_concepts, hidden_dim)
    assert all(bool(jnp.all(jnp.isfinite(o))) for o in outs)

    # Loose parity check against a pure-JAX reference of the same forward pass
    # (tolerances cover TPU MXU default-precision matmuls, not structural error).
    pe = jnp.asarray(sine_position_encoding_np(7, 7, hidden_dim).reshape(49, hidden_dim),
                     jnp.float32)
    ref = reference_forward(params, x, pe, layer=args.layer,
                            deactivate=args.deactivate, hidden_dim=hidden_dim)
    for got, want in zip(outs, ref):
        np.testing.assert_allclose(np.asarray(got), np.asarray(want),
                                   rtol=2e-2, atol=2e-2)

    print("KERNEL_OK")
</pallas_src>

<mosaic_0001>
module attributes {stable_mosaic.version = 11 : i64} {
  func.func @_concept_autoencoder_kernel(%arg0: i32, %arg1: memref<2x196x9xf32, #tpu.memory_space<vmem>>, %arg2: memref<504x196xf32, #tpu.memory_space<vmem>>, %arg3: memref<49x32xf32, #tpu.memory_space<vmem>>, %arg4: memref<9x16xf32, #tpu.memory_space<vmem>>, %arg5: memref<1x16xf32, #tpu.memory_space<vmem>>, %arg6: memref<9x16x32xf32, #tpu.memory_space<vmem>>, %arg7: memref<1x32xf32, #tpu.memory_space<vmem>>, %arg8: memref<10x32xf32, #tpu.memory_space<vmem>>, %arg9: memref<32x32xf32, #tpu.memory_space<vmem>>, %arg10: memref<1x32xf32, #tpu.memory_space<vmem>>, %arg11: memref<32x32xf32, #tpu.memory_space<vmem>>, %arg12: memref<1x32xf32, #tpu.memory_space<vmem>>, %arg13: memref<10x10xf32, #tpu.memory_space<vmem>>, %arg14: memref<1x10xf32, #tpu.memory_space<vmem>>, %arg15: memref<10x10xf32, #tpu.memory_space<vmem>>, %arg16: memref<1x10xf32, #tpu.memory_space<vmem>>, %arg17: memref<10x400xf32, #tpu.memory_space<vmem>>, %arg18: memref<1x400xf32, #tpu.memory_space<vmem>>, %arg19: memref<400x784xf32, #tpu.memory_space<vmem>>, %arg20: memref<1x784xf32, #tpu.memory_space<vmem>>, %arg21: memref<2x10xf32, #tpu.memory_space<vmem>>, %arg22: memref<2x10xf32, #tpu.memory_space<vmem>>, %arg23: memref<2x784xf32, #tpu.memory_space<vmem>>, %arg24: memref<2x10x49xf32, #tpu.memory_space<vmem>>, %arg25: memref<2x10x32xf32, #tpu.memory_space<vmem>>) attributes {dimension_semantics = [#tpu.dimension_semantics<arbitrary>], iteration_bounds = array<i64: 1>, scalar_prefetch = 0 : i64, scratch_operands = 0 : i64, tpu.core_type = #tpu.core_type<tc>, window_params = [{pipeline_mode = #tpu.pipeline_mode<synchronous>, transform_indices = @transform_0, window_bounds = array<i64: 2, 196, 9>}, {pipeline_mode = #tpu.pipeline_mode<synchronous>, transform_indices = @transform_1, window_bounds = array<i64: 504, 196>}, {pipeline_mode = #tpu.pipeline_mode<synchronous>, transform_indices = @transform_2, window_bounds = array<i64: 49, 32>}, {pipeline_mode = #tpu.pipeline_mode<synchronous>, transform_indices = @transform_3, window_bounds = array<i64: 9, 16>}, {pipeline_mode = #tpu.pipeline_mode<synchronous>, transform_indices = @transform_4, window_bounds = array<i64: 1, 16>}, {pipeline_mode = #tpu.pipeline_mode<synchronous>, transform_indices = @transform_5, window_bounds = array<i64: 9, 16, 32>}, {pipeline_mode = #tpu.pipeline_mode<synchronous>, transform_indices = @transform_6, window_bounds = array<i64: 1, 32>}, {pipeline_mode = #tpu.pipeline_mode<synchronous>, transform_indices = @transform_7, window_bounds = array<i64: 10, 32>}, {pipeline_mode = #tpu.pipeline_mode<synchronous>, transform_indices = @transform_8, window_bounds = array<i64: 32, 32>}, {pipeline_mode = #tpu.pipeline_mode<synchronous>, transform_indices = @transform_9, window_bounds = array<i64: 1, 32>}, {pipeline_mode = #tpu.pipeline_mode<synchronous>, transform_indices = @transform_10, window_bounds = array<i64: 32, 32>}, {pipeline_mode = #tpu.pipeline_mode<synchronous>, transform_indices = @transform_11, window_bounds = array<i64: 1, 32>}, {pipeline_mode = #tpu.pipeline_mode<synchronous>, transform_indices = @transform_12, window_bounds = array<i64: 10, 10>}, {pipeline_mode = #tpu.pipeline_mode<synchronous>, transform_indices = @transform_13, window_bounds = array<i64: 1, 10>}, {pipeline_mode = #tpu.pipeline_mode<synchronous>, transform_indices = @transform_14, window_bounds = array<i64: 10, 10>}, {pipeline_mode = #tpu.pipeline_mode<synchronous>, transform_indices = @transform_15, window_bounds = array<i64: 1, 10>}, {pipeline_mode = #tpu.pipeline_mode<synchronous>, transform_indices = @transform_16, window_bounds = array<i64: 10, 400>}, {pipeline_mode = #tpu.pipeline_mode<synchronous>, transform_indices = @transform_17, window_bounds = array<i64: 1, 400>}, {pipeline_mode = #tpu.pipeline_mode<synchronous>, transform_indices = @transform_18, window_bounds = array<i64: 400, 784>}, {pipeline_mode = #tpu.pipeline_mode<synchronous>, transform_indices = @transform_19, window_bounds = array<i64: 1, 784>}, {pipeline_mode = #tpu.pipeline_mode<synchronous>, transform_indices = @transform_20, window_bounds = array<i64: 2, 10>}, {pipeline_mode = #tpu.pipeline_mode<synchronous>, transform_indices = @transform_21, window_bounds = array<i64: 2, 10>}, {pipeline_mode = #tpu.pipeline_mode<synchronous>, transform_indices = @transform_22, window_bounds = array<i64: 2, 784>}, {pipeline_mode = #tpu.pipeline_mode<synchronous>, transform_indices = @transform_23, window_bounds = array<i64: 2, 10, 49>}, {pipeline_mode = #tpu.pipeline_mode<synchronous>, transform_indices = @transform_24, window_bounds = array<i64: 2, 10, 32>}]} {
    %c0 = arith.constant 0 : index
    %c0_0 = arith.constant 0 : index
    %0 = vector.load %arg4[%c0, %c0_0] : memref<9x16xf32, #tpu.memory_space<vmem>>, vector<9x16xf32>
    %c0_1 = arith.constant 0 : index
    %c0_2 = arith.constant 0 : index
    %1 = vector.load %arg5[%c0_1, %c0_2] : memref<1x16xf32, #tpu.memory_space<vmem>>, vector<1x16xf32>
    %c0_3 = arith.constant 0 : index
    %c0_4 = arith.constant 0 : index
    %2 = vector.load %arg2[%c0_3, %c0_4] : memref<504x196xf32, #tpu.memory_space<vmem>>, vector<504x196xf32>
    %c0_5 = arith.constant 0 : index
    %c0_6 = arith.constant 0 : index
    %3 = vector.load %arg7[%c0_5, %c0_6] : memref<1x32xf32, #tpu.memory_space<vmem>>, vector<1x32xf32>
    %c0_7 = arith.constant 0 : index
    %c0_8 = arith.constant 0 : index
    %4 = vector.load %arg11[%c0_7, %c0_8] : memref<32x32xf32, #tpu.memory_space<vmem>>, vector<32x32xf32>
    %c0_9 = arith.constant 0 : index
    %c0_10 = arith.constant 0 : index
    %5 = vector.load %arg8[%c0_9, %c0_10] : memref<10x32xf32, #tpu.memory_space<vmem>>, vector<10x32xf32>
    %c0_11 = arith.constant 0 : index
    %c0_12 = arith.constant 0 : index
    %6 = vector.load %arg9[%c0_11, %c0_12] : memref<32x32xf32, #tpu.memory_space<vmem>>, vector<32x32xf32>
    %cst = arith.constant dense<0.000000e+00> : vector<10x32xf32>
    %7 = tpu.matmul %5, %6, %cst {dimension_numbers = #tpu.dot_dimension_numbers<[1], [0], [0], [1], [0, 0, 1, 1], [], []>} : vector<10x32xf32>, vector<32x32xf32>, vector<10x32xf32> -> vector<10x32xf32>
    %c0_13 = arith.constant 0 : index
    %c0_14 = arith.constant 0 : index
    %8 = vector.load %arg10[%c0_13, %c0_14] : memref<1x32xf32, #tpu.memory_space<vmem>>, vector<1x32xf32>
    %9 = vector.broadcast %8 : vector<1x32xf32> to vector<10x32xf32>
    %10 = arith.addf %7, %9 : vector<10x32xf32>
    %c0_15 = arith.constant 0 : index
    %c0_16 = arith.constant 0 : index
    %11 = vector.load %arg3[%c0_15, %c0_16] : memref<49x32xf32, #tpu.memory_space<vmem>>, vector<49x32xf32>
    %cst_17 = arith.constant dense<0.000000e+00> : vector<49x32xf32>
    %12 = tpu.matmul %11, %4, %cst_17 {dimension_numbers = #tpu.dot_dimension_numbers<[1], [0], [0], [1], [0, 0, 1, 1], [], []>} : vector<49x32xf32>, vector<32x32xf32>, vector<49x32xf32> -> vector<49x32xf32>
    %c0_18 = arith.constant 0 : index
    %c0_19 = arith.constant 0 : index
    %13 = vector.load %arg12[%c0_18, %c0_19] : memref<1x32xf32, #tpu.memory_space<vmem>>, vector<1x32xf32>
    %14 = vector.broadcast %13 : vector<1x32xf32> to vector<49x32xf32>
    %15 = arith.addf %12, %14 : vector<49x32xf32>
    %cst_20 = arith.constant 0.000000e+00 : f32
    %16 = vector.broadcast %cst_20 : f32 to vector<10x2xf32>
    %c0_21 = arith.constant 0 : index
    %c0_22 = arith.constant 0 : index
    %c0_23 = arith.constant 0 : index
    %17 = vector.load %arg1[%c0_21, %c0_22, %c0_23] : memref<2x196x9xf32, #tpu.memory_space<vmem>>, vector<1x196x9xf32>
    %18 = vector.shape_cast %17 : vector<1x196x9xf32> to vector<196x9xf32>
    %cst_24 = arith.constant dense<0.000000e+00> : vector<196x16xf32>
    %19 = tpu.matmul %18, %0, %cst_24 {dimension_numbers = #tpu.dot_dimension_numbers<[1], [0], [0], [1], [0, 0, 1, 1], [], []>} : vector<196x9xf32>, vector<9x16xf32>, vector<196x16xf32> -> vector<196x16xf32>
    %20 = vector.broadcast %1 : vector<1x16xf32> to vector<196x16xf32>
    %21 = arith.addf %19, %20 : vector<196x16xf32>
    %cst_25 = arith.constant 0.000000e+00 : f32
    %22 = vector.broadcast %cst_25 : f32 to vector<196x16xf32>
    %23 = arith.maximumf %21, %22 : vector<196x16xf32>
    %cst_26 = arith.constant dense<0.000000e+00> : vector<504x16xf32>
    %24 = tpu.matmul %2, %23, %cst_26 {dimension_numbers = #tpu.dot_dimension_numbers<[1], [0], [0], [1], [0, 0, 1, 1], [], []>} : vector<504x196xf32>, vector<196x16xf32>, vector<504x16xf32> -> vector<504x16xf32>
    %25 = vector.extract_strided_slice %24 {offsets = [0, 0], sizes = [56, 16], strides = [1, 1]} : vector<504x16xf32> to vector<56x16xf32>
    %c0_27 = arith.constant 0 : index
    %c0_28 = arith.constant 0 : index
    %c0_29 = arith.constant 0 : index
    %26 = vector.load %arg6[%c0_27, %c0_28, %c0_29] : memref<9x16x32xf32, #tpu.memory_space<vmem>>, vector<1x16x32xf32>
    %27 = vector.shape_cast %26 : vector<1x16x32xf32> to vector<16x32xf32>
    %cst_30 = arith.constant dense<0.000000e+00> : vector<56x32xf32>
    %28 = tpu.matmul %25, %27, %cst_30 {dimension_numbers = #tpu.dot_dimension_numbers<[1], [0], [0], [1], [0, 0, 1, 1], [], []>} : vector<56x16xf32>, vector<16x32xf32>, vector<56x32xf32> -> vector<56x32xf32>
    %29 = vector.extract_strided_slice %24 {offsets = [56, 0], sizes = [56, 16], strides = [1, 1]} : vector<504x16xf32> to vector<56x16xf32>
    %c1 = arith.constant 1 : index
    %c0_31 = arith.constant 0 : index
    %c0_32 = arith.constant 0 : index
    %30 = vector.load %arg6[%c1, %c0_31, %c0_32] : memref<9x16x32xf32, #tpu.memory_space<vmem>>, vector<1x16x32xf32>
    %31 = vector.shape_cast %30 : vector<1x16x32xf32> to vector<16x32xf32>
    %cst_33 = arith.constant dense<0.000000e+00> : vector<56x32xf32>
    %32 = tpu.matmul %29, %31, %cst_33 {dimension_numbers = #tpu.dot_dimension_numbers<[1], [0], [0], [1], [0, 0, 1, 1], [], []>} : vector<56x16xf32>, vector<16x32xf32>, vector<56x32xf32> -> vector<56x32xf32>
    %33 = arith.addf %28, %32 : vector<56x32xf32>
    %34 = vector.extract_strided_slice %24 {offsets = [112, 0], sizes = [56, 16], strides = [1, 1]} : vector<504x16xf32> to vector<56x16xf32>
    %c2 = arith.constant 2 : index
    %c0_34 = arith.constant 0 : index
    %c0_35 = arith.constant 0 : index
    %35 = vector.load %arg6[%c2, %c0_34, %c0_35] : memref<9x16x32xf32, #tpu.memory_space<vmem>>, vector<1x16x32xf32>
    %36 = vector.shape_cast %35 : vector<1x16x32xf32> to vector<16x32xf32>
    %cst_36 = arith.constant dense<0.000000e+00> : vector<56x32xf32>
    %37 = tpu.matmul %34, %36, %cst_36 {dimension_numbers = #tpu.dot_dimension_numbers<[1], [0], [0], [1], [0, 0, 1, 1], [], []>} : vector<56x16xf32>, vector<16x32xf32>, vector<56x32xf32> -> vector<56x32xf32>
    %38 = arith.addf %33, %37 : vector<56x32xf32>
    %39 = vector.extract_strided_slice %24 {offsets = [168, 0], sizes = [56, 16], strides = [1, 1]} : vector<504x16xf32> to vector<56x16xf32>
    %c3 = arith.constant 3 : index
    %c0_37 = arith.constant 0 : index
    %c0_38 = arith.constant 0 : index
    %40 = vector.load %arg6[%c3, %c0_37, %c0_38] : memref<9x16x32xf32, #tpu.memory_space<vmem>>, vector<1x16x32xf32>
    %41 = vector.shape_cast %40 : vector<1x16x32xf32> to vector<16x32xf32>
    %cst_39 = arith.constant dense<0.000000e+00> : vector<56x32xf32>
    %42 = tpu.matmul %39, %41, %cst_39 {dimension_numbers = #tpu.dot_dimension_numbers<[1], [0], [0], [1], [0, 0, 1, 1], [], []>} : vector<56x16xf32>, vector<16x32xf32>, vector<56x32xf32> -> vector<56x32xf32>
    %43 = arith.addf %38, %42 : vector<56x32xf32>
    %44 = vector.extract_strided_slice %24 {offsets = [224, 0], sizes = [56, 16], strides = [1, 1]} : vector<504x16xf32> to vector<56x16xf32>
    %c4 = arith.constant 4 : index
    %c0_40 = arith.constant 0 : index
    %c0_41 = arith.constant 0 : index
    %45 = vector.load %arg6[%c4, %c0_40, %c0_41] : memref<9x16x32xf32, #tpu.memory_space<vmem>>, vector<1x16x32xf32>
    %46 = vector.shape_cast %45 : vector<1x16x32xf32> to vector<16x32xf32>
    %cst_42 = arith.constant dense<0.000000e+00> : vector<56x32xf32>
    %47 = tpu.matmul %44, %46, %cst_42 {dimension_numbers = #tpu.dot_dimension_numbers<[1], [0], [0], [1], [0, 0, 1, 1], [], []>} : vector<56x16xf32>, vector<16x32xf32>, vector<56x32xf32> -> vector<56x32xf32>
    %48 = arith.addf %43, %47 : vector<56x32xf32>
    %49 = vector.extract_strided_slice %24 {offsets = [280, 0], sizes = [56, 16], strides = [1, 1]} : vector<504x16xf32> to vector<56x16xf32>
    %c5 = arith.constant 5 : index
    %c0_43 = arith.constant 0 : index
    %c0_44 = arith.constant 0 : index
    %50 = vector.load %arg6[%c5, %c0_43, %c0_44] : memref<9x16x32xf32, #tpu.memory_space<vmem>>, vector<1x16x32xf32>
    %51 = vector.shape_cast %50 : vector<1x16x32xf32> to vector<16x32xf32>
    %cst_45 = arith.constant dense<0.000000e+00> : vector<56x32xf32>
    %52 = tpu.matmul %49, %51, %cst_45 {dimension_numbers = #tpu.dot_dimension_numbers<[1], [0], [0], [1], [0, 0, 1, 1], [], []>} : vector<56x16xf32>, vector<16x32xf32>, vector<56x32xf32> -> vector<56x32xf32>
    %53 = arith.addf %48, %52 : vector<56x32xf32>
    %54 = vector.extract_strided_slice %24 {offsets = [336, 0], sizes = [56, 16], strides = [1, 1]} : vector<504x16xf32> to vector<56x16xf32>
    %c6 = arith.constant 6 : index
    %c0_46 = arith.constant 0 : index
    %c0_47 = arith.constant 0 : index
    %55 = vector.load %arg6[%c6, %c0_46, %c0_47] : memref<9x16x32xf32, #tpu.memory_space<vmem>>, vector<1x16x32xf32>
    %56 = vector.shape_cast %55 : vector<1x16x32xf32> to vector<16x32xf32>
    %cst_48 = arith.constant dense<0.000000e+00> : vector<56x32xf32>
    %57 = tpu.matmul %54, %56, %cst_48 {dimension_numbers = #tpu.dot_dimension_numbers<[1], [0], [0], [1], [0, 0, 1, 1], [], []>} : vector<56x16xf32>, vector<16x32xf32>, vector<56x32xf32> -> vector<56x32xf32>
    %58 = arith.addf %53, %57 : vector<56x32xf32>
    %59 = vector.extract_strided_slice %24 {offsets = [392, 0], sizes = [56, 16], strides = [1, 1]} : vector<504x16xf32> to vector<56x16xf32>
    %c7 = arith.constant 7 : index
    %c0_49 = arith.constant 0 : index
    %c0_50 = arith.constant 0 : index
    %60 = vector.load %arg6[%c7, %c0_49, %c0_50] : memref<9x16x32xf32, #tpu.memory_space<vmem>>, vector<1x16x32xf32>
    %61 = vector.shape_cast %60 : vector<1x16x32xf32> to vector<16x32xf32>
    %cst_51 = arith.constant dense<0.000000e+00> : vector<56x32xf32>
    %62 = tpu.matmul %59, %61, %cst_51 {dimension_numbers = #tpu.dot_dimension_numbers<[1], [0], [0], [1], [0, 0, 1, 1], [], []>} : vector<56x16xf32>, vector<16x32xf32>, vector<56x32xf32> -> vector<56x32xf32>
    %63 = arith.addf %58, %62 : vector<56x32xf32>
    %64 = vector.extract_strided_slice %24 {offsets = [448, 0], sizes = [56, 16], strides = [1, 1]} : vector<504x16xf32> to vector<56x16xf32>
    %c8 = arith.constant 8 : index
    %c0_52 = arith.constant 0 : index
    %c0_53 = arith.constant 0 : index
    %65 = vector.load %arg6[%c8, %c0_52, %c0_53] : memref<9x16x32xf32, #tpu.memory_space<vmem>>, vector<1x16x32xf32>
    %66 = vector.shape_cast %65 : vector<1x16x32xf32> to vector<16x32xf32>
    %cst_54 = arith.constant dense<0.000000e+00> : vector<56x32xf32>
    %67 = tpu.matmul %64, %66, %cst_54 {dimension_numbers = #tpu.dot_dimension_numbers<[1], [0], [0], [1], [0, 0, 1, 1], [], []>} : vector<56x16xf32>, vector<16x32xf32>, vector<56x32xf32> -> vector<56x32xf32>
    %68 = arith.addf %63, %67 : vector<56x32xf32>
    %69 = vector.extract_strided_slice %68 {offsets = [0, 0], sizes = [49, 32], strides = [1, 1]} : vector<56x32xf32> to vector<49x32xf32>
    %70 = vector.broadcast %3 : vector<1x32xf32> to vector<49x32xf32>
    %71 = arith.addf %69, %70 : vector<49x32xf32>
    %cst_55 = arith.constant 0.000000e+00 : f32
    %72 = vector.broadcast %cst_55 : f32 to vector<49x32xf32>
    %73 = arith.maximumf %71, %72 : vector<49x32xf32>
    %cst_56 = arith.constant dense<0.000000e+00> : vector<49x32xf32>
    %74 = tpu.matmul %73, %4, %cst_56 {dimension_numbers = #tpu.dot_dimension_numbers<[1], [0], [0], [1], [0, 0, 1, 1], [], []>} : vector<49x32xf32>, vector<32x32xf32>, vector<49x32xf32> -> vector<49x32xf32>
    %75 = arith.addf %74, %15 : vector<49x32xf32>
    %cst_57 = arith.constant dense<0.000000e+00> : vector<10x49xf32>
    %76 = tpu.matmul %10, %75, %cst_57 {dimension_numbers = #tpu.dot_dimension_numbers<[1], [1], [0], [0], [0, 0, 1, 0], [], []>} : vector<10x32xf32>, vector<49x32xf32>, vector<10x49xf32> -> vector<10x49xf32>
    %cst_58 = arith.constant 0.176776692 : f32
    %77 = vector.broadcast %cst_58 : f32 to vector<10x49xf32>
    %78 = arith.mulf %76, %77 : vector<10x49xf32>
    %79 = arith.negf %78 : vector<10x49xf32>
    %80 = math.exp %79 : vector<10x49xf32>
    %cst_59 = arith.constant 1.000000e+00 : f32
    %81 = vector.broadcast %cst_59 : f32 to vector<10x49xf32>
    %82 = arith.addf %81, %80 : vector<10x49xf32>
    %83 = arith.divf %81, %82 : vector<10x49xf32>
    %cst_60 = arith.constant dense<0.000000e+00> : vector<10xf32>
    %84 = vector.multi_reduction <add>, %83, %cst_60 [1] : vector<10x49xf32> to vector<10xf32>
    %85 = vector.shape_cast %84 : vector<10xf32> to vector<10x1xf32>
    %cst_61 = arith.constant 9.99999993E-9 : f32
    %86 = vector.broadcast %cst_61 : f32 to vector<10x1xf32>
    %87 = arith.addf %85, %86 : vector<10x1xf32>
    %88 = vector.broadcast %87 : vector<10x1xf32> to vector<10x49xf32>
    %89 = arith.divf %83, %88 : vector<10x49xf32>
    %cst_62 = arith.constant dense<0.000000e+00> : vector<10x32xf32>
    %90 = tpu.matmul %89, %73, %cst_62 {dimension_numbers = #tpu.dot_dimension_numbers<[1], [0], [0], [1], [0, 0, 1, 1], [], []>} : vector<10x49xf32>, vector<49x32xf32>, vector<10x32xf32> -> vector<10x32xf32>
    %c0_63 = arith.constant 0 : index
    %c0_64 = arith.constant 0 : index
    %c0_65 = arith.constant 0 : index
    %91 = vector.load %arg24[%c0_63, %c0_64, %c0_65] : memref<2x10x49xf32, #tpu.memory_space<vmem>>, vector<1x10x49xf32>
    %92 = vector.shape_cast %91 : vector<1x10x49xf32> to vector<10x49xf32>
    %93 = vector.shape_cast %83 : vector<10x49xf32> to vector<1x10x49xf32>
    tpu.vector_store %arg24[%c0_63, %c0_64, %c0_65], %93 {strides = array<i32>} : memref<2x10x49xf32, #tpu.memory_space<vmem>>, vector<1x10x49xf32>,
    %c0_66 = arith.constant 0 : index
    %c0_67 = arith.constant 0 : index
    %c0_68 = arith.constant 0 : index
    %94 = vector.load %arg25[%c0_66, %c0_67, %c0_68] : memref<2x10x32xf32, #tpu.memory_space<vmem>>, vector<1x10x32xf32>
    %95 = vector.shape_cast %94 : vector<1x10x32xf32> to vector<10x32xf32>
    %96 = vector.shape_cast %90 : vector<10x32xf32> to vector<1x10x32xf32>
    tpu.vector_store %arg25[%c0_66, %c0_67, %c0_68], %96 {strides = array<i32>} : memref<2x10x32xf32, #tpu.memory_space<vmem>>, vector<1x10x32xf32>,
    %97 = tpu.iota {dimensions = array<i32: 1>} : vector<1x2xi32>
    %c0_i32 = arith.constant 0 : i32
    %98 = vector.broadcast %c0_i32 : i32 to vector<1x2xi32>
    %99 = arith.cmpi eq, %97, %98 : vector<1x2xi32>
    %100 = arith.extui %99 : vector<1x2xi1> to vector<1x2xi32>
    %101 = arith.sitofp %100 : vector<1x2xi32> to vector<1x2xf32>
    %102 = vector.broadcast %85 : vector<10x1xf32> to vector<10x2xf32>
    %103 = vector.broadcast %101 : vector<1x2xf32> to vector<10x2xf32>
    %104 = arith.mulf %102, %103 : vector<10x2xf32>
    %105 = arith.addf %16, %104 : vector<10x2xf32>
    %c1_69 = arith.constant 1 : index
    %c0_70 = arith.constant 0 : index
    %c0_71 = arith.constant 0 : index
    %106 = vector.load %arg1[%c1_69, %c0_70, %c0_71] : memref<2x196x9xf32, #tpu.memory_space<vmem>>, vector<1x196x9xf32>
    %107 = vector.shape_cast %106 : vector<1x196x9xf32> to vector<196x9xf32>
    %cst_72 = arith.constant dense<0.000000e+00> : vector<196x16xf32>
    %108 = tpu.matmul %107, %0, %cst_72 {dimension_numbers = #tpu.dot_dimension_numbers<[1], [0], [0], [1], [0, 0, 1, 1], [], []>} : vector<196x9xf32>, vector<9x16xf32>, vector<196x16xf32> -> vector<196x16xf32>
    %109 = vector.broadcast %1 : vector<1x16xf32> to vector<196x16xf32>
    %110 = arith.addf %108, %109 : vector<196x16xf32>
    %cst_73 = arith.constant 0.000000e+00 : f32
    %111 = vector.broadcast %cst_73 : f32 to vector<196x16xf32>
    %112 = arith.maximumf %110, %111 : vector<196x16xf32>
    %cst_74 = arith.constant dense<0.000000e+00> : vector<504x16xf32>
    %113 = tpu.matmul %2, %112, %cst_74 {dimension_numbers = #tpu.dot_dimension_numbers<[1], [0], [0], [1], [0, 0, 1, 1], [], []>} : vector<504x196xf32>, vector<196x16xf32>, vector<504x16xf32> -> vector<504x16xf32>
    %114 = vector.extract_strided_slice %113 {offsets = [0, 0], sizes = [56, 16], strides = [1, 1]} : vector<504x16xf32> to vector<56x16xf32>
    %c0_75 = arith.constant 0 : index
    %c0_76 = arith.constant 0 : index
    %c0_77 = arith.constant 0 : index
    %115 = vector.load %arg6[%c0_75, %c0_76, %c0_77] : memref<9x16x32xf32, #tpu.memory_space<vmem>>, vector<1x16x32xf32>
    %116 = vector.shape_cast %115 : vector<1x16x32xf32> to vector<16x32xf32>
    %cst_78 = arith.constant dense<0.000000e+00> : vector<56x32xf32>
    %117 = tpu.matmul %114, %116, %cst_78 {dimension_numbers = #tpu.dot_dimension_numbers<[1], [0], [0], [1], [0, 0, 1, 1], [], []>} : vector<56x16xf32>, vector<16x32xf32>, vector<56x32xf32> -> vector<56x32xf32>
    %118 = vector.extract_strided_slice %113 {offsets = [56, 0], sizes = [56, 16], strides = [1, 1]} : vector<504x16xf32> to vector<56x16xf32>
    %c1_79 = arith.constant 1 : index
    %c0_80 = arith.constant 0 : index
    %c0_81 = arith.constant 0 : index
    %119 = vector.load %arg6[%c1_79, %c0_80, %c0_81] : memref<9x16x32xf32, #tpu.memory_space<vmem>>, vector<1x16x32xf32>
    %120 = vector.shape_cast %119 : vector<1x16x32xf32> to vector<16x32xf32>
    %cst_82 = arith.constant dense<0.000000e+00> : vector<56x32xf32>
    %121 = tpu.matmul %118, %120, %cst_82 {dimension_numbers = #tpu.dot_dimension_numbers<[1], [0], [0], [1], [0, 0, 1, 1], [], []>} : vector<56x16xf32>, vector<16x32xf32>, vector<56x32xf32> -> vector<56x32xf32>
    %122 = arith.addf %117, %121 : vector<56x32xf32>
    %123 = vector.extract_strided_slice %113 {offsets = [112, 0], sizes = [56, 16], strides = [1, 1]} : vector<504x16xf32> to vector<56x16xf32>
    %c2_83 = arith.constant 2 : index
    %c0_84 = arith.constant 0 : index
    %c0_85 = arith.constant 0 : index
    %124 = vector.load %arg6[%c2_83, %c0_84, %c0_85] : memref<9x16x32xf32, #tpu.memory_space<vmem>>, vector<1x16x32xf32>
    %125 = vector.shape_cast %124 : vector<1x16x32xf32> to vector<16x32xf32>
    %cst_86 = arith.constant dense<0.000000e+00> : vector<56x32xf32>
    %126 = tpu.matmul %123, %125, %cst_86 {dimension_numbers = #tpu.dot_dimension_numbers<[1], [0], [0], [1], [0, 0, 1, 1], [], []>} : vector<56x16xf32>, vector<16x32xf32>, vector<56x32xf32> -> vector<56x32xf32>
    %127 = arith.addf %122, %126 : vector<56x32xf32>
    %128 = vector.extract_strided_slice %113 {offsets = [168, 0], sizes = [56, 16], strides = [1, 1]} : vector<504x16xf32> to vector<56x16xf32>
    %c3_87 = arith.constant 3 : index
    %c0_88 = arith.constant 0 : index
    %c0_89 = arith.constant 0 : index
    %129 = vector.load %arg6[%c3_87, %c0_88, %c0_89] : memref<9x16x32xf32, #tpu.memory_space<vmem>>, vector<1x16x32xf32>
    %130 = vector.shape_cast %129 : vector<1x16x32xf32> to vector<16x32xf32>
    %cst_90 = arith.constant dense<0.000000e+00> : vector<56x32xf32>
    %131 = tpu.matmul %128, %130, %cst_90 {dimension_numbers = #tpu.dot_dimension_numbers<[1], [0], [0], [1], [0, 0, 1, 1], [], []>} : vector<56x16xf32>, vector<16x32xf32>, vector<56x32xf32> -> vector<56x32xf32>
    %132 = arith.addf %127, %131 : vector<56x32xf32>
    %133 = vector.extract_strided_slice %113 {offsets = [224, 0], sizes = [56, 16], strides = [1, 1]} : vector<504x16xf32> to vector<56x16xf32>
    %c4_91 = arith.constant 4 : index
    %c0_92 = arith.constant 0 : index
    %c0_93 = arith.constant 0 : index
    %134 = vector.load %arg6[%c4_91, %c0_92, %c0_93] : memref<9x16x32xf32, #tpu.memory_space<vmem>>, vector<1x16x32xf32>
    %135 = vector.shape_cast %134 : vector<1x16x32xf32> to vector<16x32xf32>
    %cst_94 = arith.constant dense<0.000000e+00> : vector<56x32xf32>
    %136 = tpu.matmul %133, %135, %cst_94 {dimension_numbers = #tpu.dot_dimension_numbers<[1], [0], [0], [1], [0, 0, 1, 1], [], []>} : vector<56x16xf32>, vector<16x32xf32>, vector<56x32xf32> -> vector<56x32xf32>
    %137 = arith.addf %132, %136 : vector<56x32xf32>
    %138 = vector.extract_strided_slice %113 {offsets = [280, 0], sizes = [56, 16], strides = [1, 1]} : vector<504x16xf32> to vector<56x16xf32>
    %c5_95 = arith.constant 5 : index
    %c0_96 = arith.constant 0 : index
    %c0_97 = arith.constant 0 : index
    %139 = vector.load %arg6[%c5_95, %c0_96, %c0_97] : memref<9x16x32xf32, #tpu.memory_space<vmem>>, vector<1x16x32xf32>
    %140 = vector.shape_cast %139 : vector<1x16x32xf32> to vector<16x32xf32>
    %cst_98 = arith.constant dense<0.000000e+00> : vector<56x32xf32>
    %141 = tpu.matmul %138, %140, %cst_98 {dimension_numbers = #tpu.dot_dimension_numbers<[1], [0], [0], [1], [0, 0, 1, 1], [], []>} : vector<56x16xf32>, vector<16x32xf32>, vector<56x32xf32> -> vector<56x32xf32>
    %142 = arith.addf %137, %141 : vector<56x32xf32>
    %143 = vector.extract_strided_slice %113 {offsets = [336, 0], sizes = [56, 16], strides = [1, 1]} : vector<504x16xf32> to vector<56x16xf32>
    %c6_99 = arith.constant 6 : index
    %c0_100 = arith.constant 0 : index
    %c0_101 = arith.constant 0 : index
    %144 = vector.load %arg6[%c6_99, %c0_100, %c0_101] : memref<9x16x32xf32, #tpu.memory_space<vmem>>, vector<1x16x32xf32>
    %145 = vector.shape_cast %144 : vector<1x16x32xf32> to vector<16x32xf32>
    %cst_102 = arith.constant dense<0.000000e+00> : vector<56x32xf32>
    %146 = tpu.matmul %143, %145, %cst_102 {dimension_numbers = #tpu.dot_dimension_numbers<[1], [0], [0], [1], [0, 0, 1, 1], [], []>} : vector<56x16xf32>, vector<16x32xf32>, vector<56x32xf32> -> vector<56x32xf32>
    %147 = arith.addf %142, %146 : vector<56x32xf32>
    %148 = vector.extract_strided_slice %113 {offsets = [392, 0], sizes = [56, 16], strides = [1, 1]} : vector<504x16xf32> to vector<56x16xf32>
    %c7_103 = arith.constant 7 : index
    %c0_104 = arith.constant 0 : index
    %c0_105 = arith.constant 0 : index
    %149 = vector.load %arg6[%c7_103, %c0_104, %c0_105] : memref<9x16x32xf32, #tpu.memory_space<vmem>>, vector<1x16x32xf32>
    %150 = vector.shape_cast %149 : vector<1x16x32xf32> to vector<16x32xf32>
    %cst_106 = arith.constant dense<0.000000e+00> : vector<56x32xf32>
    %151 = tpu.matmul %148, %150, %cst_106 {dimension_numbers = #tpu.dot_dimension_numbers<[1], [0], [0], [1], [0, 0, 1, 1], [], []>} : vector<56x16xf32>, vector<16x32xf32>, vector<56x32xf32> -> vector<56x32xf32>
    %152 = arith.addf %147, %151 : vector<56x32xf32>
    %153 = vector.extract_strided_slice %113 {offsets = [448, 0], sizes = [56, 16], strides = [1, 1]} : vector<504x16xf32> to vector<56x16xf32>
    %c8_107 = arith.constant 8 : index
    %c0_108 = arith.constant 0 : index
    %c0_109 = arith.constant 0 : index
    %154 = vector.load %arg6[%c8_107, %c0_108, %c0_109] : memref<9x16x32xf32, #tpu.memory_space<vmem>>, vector<1x16x32xf32>
    %155 = vector.shape_cast %154 : vector<1x16x32xf32> to vector<16x32xf32>
    %cst_110 = arith.constant dense<0.000000e+00> : vector<56x32xf32>
    %156 = tpu.matmul %153, %155, %cst_110 {dimension_numbers = #tpu.dot_dimension_numbers<[1], [0], [0], [1], [0, 0, 1, 1], [], []>} : vector<56x16xf32>, vector<16x32xf32>, vector<56x32xf32> -> vector<56x32xf32>
    %157 = arith.addf %152, %156 : vector<56x32xf32>
    %158 = vector.extract_strided_slice %157 {offsets = [0, 0], sizes = [49, 32], strides = [1, 1]} : vector<56x32xf32> to vector<49x32xf32>
    %159 = vector.broadcast %3 : vector<1x32xf32> to vector<49x32xf32>
    %160 = arith.addf %158, %159 : vector<49x32xf32>
    %cst_111 = arith.constant 0.000000e+00 : f32
    %161 = vector.broadcast %cst_111 : f32 to vector<49x32xf32>
    %162 = arith.maximumf %160, %161 : vector<49x32xf32>
    %cst_112 = arith.constant dense<0.000000e+00> : vector<49x32xf32>
    %163 = tpu.matmul %162, %4, %cst_112 {dimension_numbers = #tpu.dot_dimension_numbers<[1], [0], [0], [1], [0, 0, 1, 1], [], []>} : vector<49x32xf32>, vector<32x32xf32>, vector<49x32xf32> -> vector<49x32xf32>
    %164 = arith.addf %163, %15 : vector<49x32xf32>
    %cst_113 = arith.constant dense<0.000000e+00> : vector<10x49xf32>
    %165 = tpu.matmul %10, %164, %cst_113 {dimension_numbers = #tpu.dot_dimension_numbers<[1], [1], [0], [0], [0, 0, 1, 0], [], []>} : vector<10x32xf32>, vector<49x32xf32>, vector<10x49xf32> -> vector<10x49xf32>
    %cst_114 = arith.constant 0.176776692 : f32
    %166 = vector.broadcast %cst_114 : f32 to vector<10x49xf32>
    %167 = arith.mulf %165, %166 : vector<10x49xf32>
    %168 = arith.negf %167 : vector<10x49xf32>
    %169 = math.exp %168 : vector<10x49xf32>
    %cst_115 = arith.constant 1.000000e+00 : f32
    %170 = vector.broadcast %cst_115 : f32 to vector<10x49xf32>
    %171 = arith.addf %170, %169 : vector<10x49xf32>
    %172 = arith.divf %170, %171 : vector<10x49xf32>
    %cst_116 = arith.constant dense<0.000000e+00> : vector<10xf32>
    %173 = vector.multi_reduction <add>, %172, %cst_116 [1] : vector<10x49xf32> to vector<10xf32>
    %174 = vector.shape_cast %173 : vector<10xf32> to vector<10x1xf32>
    %cst_117 = arith.constant 9.99999993E-9 : f32
    %175 = vector.broadcast %cst_117 : f32 to vector<10x1xf32>
    %176 = arith.addf %174, %175 : vector<10x1xf32>
    %177 = vector.broadcast %176 : vector<10x1xf32> to vector<10x49xf32>
    %178 = arith.divf %172, %177 : vector<10x49xf32>
    %cst_118 = arith.constant dense<0.000000e+00> : vector<10x32xf32>
    %179 = tpu.matmul %178, %162, %cst_118 {dimension_numbers = #tpu.dot_dimension_numbers<[1], [0], [0], [1], [0, 0, 1, 1], [], []>} : vector<10x49xf32>, vector<49x32xf32>, vector<10x32xf32> -> vector<10x32xf32>
    %c1_119 = arith.constant 1 : index
    %c0_120 = arith.constant 0 : index
    %c0_121 = arith.constant 0 : index
    %180 = vector.load %arg24[%c1_119, %c0_120, %c0_121] : memref<2x10x49xf32, #tpu.memory_space<vmem>>, vector<1x10x49xf32>
    %181 = vector.shape_cast %180 : vector<1x10x49xf32> to vector<10x49xf32>
    %182 = vector.shape_cast %172 : vector<10x49xf32> to vector<1x10x49xf32>
    tpu.vector_store %arg24[%c1_119, %c0_120, %c0_121], %182 {strides = array<i32>} : memref<2x10x49xf32, #tpu.memory_space<vmem>>, vector<1x10x49xf32>,
    %c1_122 = arith.constant 1 : index
    %c0_123 = arith.constant 0 : index
    %c0_124 = arith.constant 0 : index
    %183 = vector.load %arg25[%c1_122, %c0_123, %c0_124] : memref<2x10x32xf32, #tpu.memory_space<vmem>>, vector<1x10x32xf32>
    %184 = vector.shape_cast %183 : vector<1x10x32xf32> to vector<10x32xf32>
    %185 = vector.shape_cast %179 : vector<10x32xf32> to vector<1x10x32xf32>
    tpu.vector_store %arg25[%c1_122, %c0_123, %c0_124], %185 {strides = array<i32>} : memref<2x10x32xf32, #tpu.memory_space<vmem>>, vector<1x10x32xf32>,
    %186 = tpu.iota {dimensions = array<i32: 1>} : vector<1x2xi32>
    %c1_i32 = arith.constant 1 : i32
    %187 = vector.broadcast %c1_i32 : i32 to vector<1x2xi32>
    %188 = arith.cmpi eq, %186, %187 : vector<1x2xi32>
    %189 = arith.extui %188 : vector<1x2xi1> to vector<1x2xi32>
    %190 = arith.sitofp %189 : vector<1x2xi32> to vector<1x2xf32>
    %191 = vector.broadcast %174 : vector<10x1xf32> to vector<10x2xf32>
    %192 = vector.broadcast %190 : vector<1x2xf32> to vector<10x2xf32>
    %193 = arith.mulf %191, %192 : vector<10x2xf32>
    %194 = arith.addf %105, %193 : vector<10x2xf32>
    %195 = tpu.iota {dimensions = array<i32: 0>} : vector<2x2xi32>
    %196 = tpu.iota {dimensions = array<i32: 1>} : vector<2x2xi32>
    %197 = arith.cmpi eq, %195, %196 : vector<2x2xi32>
    %198 = arith.extui %197 : vector<2x2xi1> to vector<2x2xi32>
    %199 = arith.sitofp %198 : vector<2x2xi32> to vector<2x2xf32>
    %cst_125 = arith.constant dense<0.000000e+00> : vector<2x10xf32>
    %200 = tpu.matmul %199, %194, %cst_125 {dimension_numbers = #tpu.dot_dimension_numbers<[1], [1], [0], [0], [0, 0, 1, 0], [], []>} : vector<2x2xf32>, vector<10x2xf32>, vector<2x10xf32> -> vector<2x10xf32>
    %cst_126 = arith.constant 1.000000e+00 : f32
    %201 = vector.broadcast %cst_126 : f32 to vector<2x10xf32>
    %202 = arith.mulf %201, %200 : vector<2x10xf32>
    %203 = math.tanh %202 : vector<2x10xf32>
    %cst_127 = arith.constant 5.000000e-01 : f32
    %204 = vector.broadcast %cst_127 : f32 to vector<2x10xf32>
    %205 = arith.subf %203, %204 : vector<2x10xf32>
    %cst_128 = arith.constant 2.000000e+00 : f32
    %206 = vector.broadcast %cst_128 : f32 to vector<2x10xf32>
    %207 = arith.mulf %205, %206 : vector<2x10xf32>
    %c0_129 = arith.constant 0 : index
    %c0_130 = arith.constant 0 : index
    %208 = vector.load %arg21[%c0_129, %c0_130] : memref<2x10xf32, #tpu.memory_space<vmem>>, vector<2x10xf32>
    tpu.vector_store %arg21[%c0_129, %c0_130], %207 {strides = array<i32>} : memref<2x10xf32, #tpu.memory_space<vmem>>, vector<2x10xf32>,
    %c0_131 = arith.constant 0 : index
    %c0_132 = arith.constant 0 : index
    %209 = vector.load %arg13[%c0_131, %c0_132] : memref<10x10xf32, #tpu.memory_space<vmem>>, vector<10x10xf32>
    %cst_133 = arith.constant dense<0.000000e+00> : vector<2x10xf32>
    %210 = tpu.matmul %203, %209, %cst_133 {dimension_numbers = #tpu.dot_dimension_numbers<[1], [0], [0], [1], [0, 0, 1, 1], [], []>} : vector<2x10xf32>, vector<10x10xf32>, vector<2x10xf32> -> vector<2x10xf32>
    %c0_134 = arith.constant 0 : index
    %c0_135 = arith.constant 0 : index
    %211 = vector.load %arg14[%c0_134, %c0_135] : memref<1x10xf32, #tpu.memory_space<vmem>>, vector<1x10xf32>
    %212 = vector.broadcast %211 : vector<1x10xf32> to vector<2x10xf32>
    %213 = arith.addf %210, %212 : vector<2x10xf32>
    %cst_136 = arith.constant 0.000000e+00 : f32
    %214 = vector.broadcast %cst_136 : f32 to vector<2x10xf32>
    %215 = arith.maximumf %213, %214 : vector<2x10xf32>
    %c0_137 = arith.constant 0 : index
    %c0_138 = arith.constant 0 : index
    %216 = vector.load %arg15[%c0_137, %c0_138] : memref<10x10xf32, #tpu.memory_space<vmem>>, vector<10x10xf32>
    %cst_139 = arith.constant dense<0.000000e+00> : vector<2x10xf32>
    %217 = tpu.matmul %215, %216, %cst_139 {dimension_numbers = #tpu.dot_dimension_numbers<[1], [0], [0], [1], [0, 0, 1, 1], [], []>} : vector<2x10xf32>, vector<10x10xf32>, vector<2x10xf32> -> vector<2x10xf32>
    %c0_140 = arith.constant 0 : index
    %c0_141 = arith.constant 0 : index
    %218 = vector.load %arg16[%c0_140, %c0_141] : memref<1x10xf32, #tpu.memory_space<vmem>>, vector<1x10xf32>
    %219 = vector.broadcast %218 : vector<1x10xf32> to vector<2x10xf32>
    %220 = arith.addf %217, %219 : vector<2x10xf32>
    %c0_142 = arith.constant 0 : index
    %c0_143 = arith.constant 0 : index
    %221 = vector.load %arg22[%c0_142, %c0_143] : memref<2x10xf32, #tpu.memory_space<vmem>>, vector<2x10xf32>
    tpu.vector_store %arg22[%c0_142, %c0_143], %220 {strides = array<i32>} : memref<2x10xf32, #tpu.memory_space<vmem>>, vector<2x10xf32>,
    %c0_144 = arith.constant 0 : index
    %c0_145 = arith.constant 0 : index
    %222 = vector.load %arg17[%c0_144, %c0_145] : memref<10x400xf32, #tpu.memory_space<vmem>>, vector<10x400xf32>
    %cst_146 = arith.constant dense<0.000000e+00> : vector<2x400xf32>
    %223 = tpu.matmul %203, %222, %cst_146 {dimension_numbers = #tpu.dot_dimension_numbers<[1], [0], [0], [1], [0, 0, 1, 1], [], []>} : vector<2x10xf32>, vector<10x400xf32>, vector<2x400xf32> -> vector<2x400xf32>
    %c0_147 = arith.constant 0 : index
    %c0_148 = arith.constant 0 : index
    %224 = vector.load %arg18[%c0_147, %c0_148] : memref<1x400xf32, #tpu.memory_space<vmem>>, vector<1x400xf32>
    %225 = vector.broadcast %224 : vector<1x400xf32> to vector<2x400xf32>
    %226 = arith.addf %223, %225 : vector<2x400xf32>
    %cst_149 = arith.constant 0.000000e+00 : f32
    %227 = vector.broadcast %cst_149 : f32 to vector<2x400xf32>
    %228 = arith.maximumf %226, %227 : vector<2x400xf32>
    %c0_150 = arith.constant 0 : index
    %c0_151 = arith.constant 0 : index
    %229 = vector.load %arg19[%c0_150, %c0_151] : memref<400x784xf32, #tpu.memory_space<vmem>>, vector<400x784xf32>
    %cst_152 = arith.constant dense<0.000000e+00> : vector<2x784xf32>
    %230 = tpu.matmul %228, %229, %cst_152 {dimension_numbers = #tpu.dot_dimension_numbers<[1], [0], [0], [1], [0, 0, 1, 1], [], []>} : vector<2x400xf32>, vector<400x784xf32>, vector<2x784xf32> -> vector<2x784xf32>
    %c0_153 = arith.constant 0 : index
    %c0_154 = arith.constant 0 : index
    %231 = vector.load %arg20[%c0_153, %c0_154] : memref<1x784xf32, #tpu.memory_space<vmem>>, vector<1x784xf32>
    %232 = vector.broadcast %231 : vector<1x784xf32> to vector<2x784xf32>
    %233 = arith.addf %230, %232 : vector<2x784xf32>
    %234 = math.tanh %233 : vector<2x784xf32>
    %c0_155 = arith.constant 0 : index
    %c0_156 = arith.constant 0 : index
    %235 = vector.load %arg23[%c0_155, %c0_156] : memref<2x784xf32, #tpu.memory_space<vmem>>, vector<2x784xf32>
    tpu.vector_store %arg23[%c0_155, %c0_156], %234 {strides = array<i32>} : memref<2x784xf32, #tpu.memory_space<vmem>>, vector<2x784xf32>,
    return
  }
  func.func @transform_0(%arg0: i32) -> (i32, i32, i32) {
    %c0_i32 = arith.constant 0 : i32
    %c0_i32_0 = arith.constant 0 : i32
    %c0_i32_1 = arith.constant 0 : i32
    %c0_i32_2 = arith.constant 0 : i32
    return %c0_i32, %c0_i32_0, %c0_i32_1 : i32, i32, i32
  }
  func.func @transform_1(%arg0: i32) -> (i32, i32) {
    %c0_i32 = arith.constant 0 : i32
    %c0_i32_0 = arith.constant 0 : i32
    %c0_i32_1 = arith.constant 0 : i32
    return %c0_i32, %c0_i32_0 : i32, i32
  }
  func.func @transform_2(%arg0: i32) -> (i32, i32) {
    %c0_i32 = arith.constant 0 : i32
    %c0_i32_0 = arith.constant 0 : i32
    %c0_i32_1 = arith.constant 0 : i32
    return %c0_i32, %c0_i32_0 : i32, i32
  }
  func.func @transform_3(%arg0: i32) -> (i32, i32) {
    %c0_i32 = arith.constant 0 : i32
    %c0_i32_0 = arith.constant 0 : i32
    %c0_i32_1 = arith.constant 0 : i32
    return %c0_i32, %c0_i32_0 : i32, i32
  }
  func.func @transform_4(%arg0: i32) -> (i32, i32) {
    %c0_i32 = arith.constant 0 : i32
    %c0_i32_0 = arith.constant 0 : i32
    %c0_i32_1 = arith.constant 0 : i32
    return %c0_i32, %c0_i32_0 : i32, i32
  }
  func.func @transform_5(%arg0: i32) -> (i32, i32, i32) {
    %c0_i32 = arith.constant 0 : i32
    %c0_i32_0 = arith.constant 0 : i32
    %c0_i32_1 = arith.constant 0 : i32
    %c0_i32_2 = arith.constant 0 : i32
    return %c0_i32, %c0_i32_0, %c0_i32_1 : i32, i32, i32
  }
  func.func @transform_6(%arg0: i32) -> (i32, i32) {
    %c0_i32 = arith.constant 0 : i32
    %c0_i32_0 = arith.constant 0 : i32
    %c0_i32_1 = arith.constant 0 : i32
    return %c0_i32, %c0_i32_0 : i32, i32
  }
  func.func @transform_7(%arg0: i32) -> (i32, i32) {
    %c0_i32 = arith.constant 0 : i32
    %c0_i32_0 = arith.constant 0 : i32
    %c0_i32_1 = arith.constant 0 : i32
    return %c0_i32, %c0_i32_0 : i32, i32
  }
  func.func @transform_8(%arg0: i32) -> (i32, i32) {
    %c0_i32 = arith.constant 0 : i32
    %c0_i32_0 = arith.constant 0 : i32
    %c0_i32_1 = arith.constant 0 : i32
    return %c0_i32, %c0_i32_0 : i32, i32
  }
  func.func @transform_9(%arg0: i32) -> (i32, i32) {
    %c0_i32 = arith.constant 0 : i32
    %c0_i32_0 = arith.constant 0 : i32
    %c0_i32_1 = arith.constant 0 : i32
    return %c0_i32, %c0_i32_0 : i32, i32
  }
  func.func @transform_10(%arg0: i32) -> (i32, i32) {
    %c0_i32 = arith.constant 0 : i32
    %c0_i32_0 = arith.constant 0 : i32
    %c0_i32_1 = arith.constant 0 : i32
    return %c0_i32, %c0_i32_0 : i32, i32
  }
  func.func @transform_11(%arg0: i32) -> (i32, i32) {
    %c0_i32 = arith.constant 0 : i32
    %c0_i32_0 = arith.constant 0 : i32
    %c0_i32_1 = arith.constant 0 : i32
    return %c0_i32, %c0_i32_0 : i32, i32
  }
  func.func @transform_12(%arg0: i32) -> (i32, i32) {
    %c0_i32 = arith.constant 0 : i32
    %c0_i32_0 = arith.constant 0 : i32
    %c0_i32_1 = arith.constant 0 : i32
    return %c0_i32, %c0_i32_0 : i32, i32
  }
  func.func @transform_13(%arg0: i32) -> (i32, i32) {
    %c0_i32 = arith.constant 0 : i32
    %c0_i32_0 = arith.constant 0 : i32
    %c0_i32_1 = arith.constant 0 : i32
    return %c0_i32, %c0_i32_0 : i32, i32
  }
  func.func @transform_14(%arg0: i32) -> (i32, i32) {
    %c0_i32 = arith.constant 0 : i32
    %c0_i32_0 = arith.constant 0 : i32
    %c0_i32_1 = arith.constant 0 : i32
    return %c0_i32, %c0_i32_0 : i32, i32
  }
  func.func @transform_15(%arg0: i32) -> (i32, i32) {
    %c0_i32 = arith.constant 0 : i32
    %c0_i32_0 = arith.constant 0 : i32
    %c0_i32_1 = arith.constant 0 : i32
    return %c0_i32, %c0_i32_0 : i32, i32
  }
  func.func @transform_16(%arg0: i32) -> (i32, i32) {
    %c0_i32 = arith.constant 0 : i32
    %c0_i32_0 = arith.constant 0 : i32
    %c0_i32_1 = arith.constant 0 : i32
    return %c0_i32, %c0_i32_0 : i32, i32
  }
  func.func @transform_17(%arg0: i32) -> (i32, i32) {
    %c0_i32 = arith.constant 0 : i32
    %c0_i32_0 = arith.constant 0 : i32
    %c0_i32_1 = arith.constant 0 : i32
    return %c0_i32, %c0_i32_0 : i32, i32
  }
  func.func @transform_18(%arg0: i32) -> (i32, i32) {
    %c0_i32 = arith.constant 0 : i32
    %c0_i32_0 = arith.constant 0 : i32
    %c0_i32_1 = arith.constant 0 : i32
    return %c0_i32, %c0_i32_0 : i32, i32
  }
  func.func @transform_19(%arg0: i32) -> (i32, i32) {
    %c0_i32 = arith.constant 0 : i32
    %c0_i32_0 = arith.constant 0 : i32
    %c0_i32_1 = arith.constant 0 : i32
    return %c0_i32, %c0_i32_0 : i32, i32
  }
  func.func @transform_20(%arg0: i32) -> (i32, i32) {
    %c0_i32 = arith.constant 0 : i32
    %c0_i32_0 = arith.constant 0 : i32
    %c0_i32_1 = arith.constant 0 : i32
    return %c0_i32, %c0_i32_0 : i32, i32
  }
  func.func @transform_21(%arg0: i32) -> (i32, i32) {
    %c0_i32 = arith.constant 0 : i32
    %c0_i32_0 = arith.constant 0 : i32
    %c0_i32_1 = arith.constant 0 : i32
    return %c0_i32, %c0_i32_0 : i32, i32
  }
  func.func @transform_22(%arg0: i32) -> (i32, i32) {
    %c0_i32 = arith.constant 0 : i32
    %c0_i32_0 = arith.constant 0 : i32
    %c0_i32_1 = arith.constant 0 : i32
    return %c0_i32, %c0_i32_0 : i32, i32
  }
  func.func @transform_23(%arg0: i32) -> (i32, i32, i32) {
    %c0_i32 = arith.constant 0 : i32
    %c0_i32_0 = arith.constant 0 : i32
    %c0_i32_1 = arith.constant 0 : i32
    %c0_i32_2 = arith.constant 0 : i32
    return %c0_i32, %c0_i32_0, %c0_i32_1 : i32, i32, i32
  }
  func.func @transform_24(%arg0: i32) -> (i32, i32, i32) {
    %c0_i32 = arith.constant 0 : i32
    %c0_i32_0 = arith.constant 0 : i32
    %c0_i32_1 = arith.constant 0 : i32
    %c0_i32_2 = arith.constant 0 : i32
    return %c0_i32, %c0_i32_0, %c0_i32_1 : i32, i32, i32
  }
}

</mosaic_0001>

<bundles_post_ra>
// kernel: concept_autoencoder_forward.1
= control target key start
LH: loop header
LB: loop body
LE: loop exit
PB: predicated region body
PF: predicated region fallthrough
CT: control target
= control target key end

     0   :  { %s7699_s0 = inlined_call_operand.vmem [shape: f32[2,196,9], index: 0, kind: input, shape index: {}]   ;;  %s7700_s1 = inlined_call_operand.hbm [shape: f32[504,196], index: 1, kind: input, shape index: {}]   ;;  %s7701_s2 = inlined_call_operand.hbm [shape: f32[49,32], index: 2, kind: input, shape index: {}]   ;;  %s7702_s3 = inlined_call_operand.hbm [shape: f32[9,16], index: 3, kind: input, shape index: {}]   ;;  %s7703_s4 = inlined_call_operand.hbm [shape: f32[1,16], index: 4, kind: input, shape index: {}]   ;;  %s7704_s5 = inlined_call_operand.hbm [shape: f32[9,16,32], index: 5, kind: input, shape index: {}]   ;;  %s7705_s6 = inlined_call_operand.hbm [shape: f32[1,32], index: 6, kind: input, shape index: {}]   ;;  %s7706_s7 = inlined_call_operand.hbm [shape: f32[10,32], index: 7, kind: input, shape index: {}]   ;;  %s7707_s8 = inlined_call_operand.hbm [shape: f32[32,32], index: 8, kind: input, shape index: {}]   ;;  %s7708_s9 = inlined_call_operand.hbm [shape: f32[1,32], index: 9, kind: input, shape index: {}]   ;;  %s7709_s10 = inlined_call_operand.hbm [shape: f32[32,32], index: 10, kind: input, shape index: {}]   ;;  %s7710_s11 = inlined_call_operand.hbm [shape: f32[1,32], index: 11, kind: input, shape index: {}]   ;;  %s7711_s12 = inlined_call_operand.hbm [shape: f32[10,10], index: 12, kind: input, shape index: {}]   ;;  %s7712_s13 = inlined_call_operand.hbm [shape: f32[1,10], index: 13, kind: input, shape index: {}]   ;;  %s7713_s14 = inlined_call_operand.hbm [shape: f32[10,10], index: 14, kind: input, shape index: {}]   ;;  %s7714_s15 = inlined_call_operand.hbm [shape: f32[1,10], index: 15, kind: input, shape index: {}]   ;;  %s7715_s16 = inlined_call_operand.hbm [shape: f32[10,400], index: 16, kind: input, shape index: {}]   ;;  %s7716_s17 = inlined_call_operand.hbm [shape: f32[1,400], index: 17, kind: input, shape index: {}]   ;;  %s7717_s18 = inlined_call_operand.hbm [shape: f32[400,784], index: 18, kind: input, shape index: {}]   ;;  %s7718_s19 = inlined_call_operand.hbm [shape: f32[1,784], index: 19, kind: input, shape index: {}]   ;;  %s7719_s20 = inlined_call_operand.hbm [shape: f32[2,10], index: 20, kind: output, shape index: {0}]   ;;  %s7720_s21 = inlined_call_operand.hbm [shape: f32[2,10], index: 21, kind: output, shape index: {1}]   ;;  %s7721_s22 = inlined_call_operand.hbm [shape: f32[2,784], index: 22, kind: output, shape index: {2}]   ;;  %s7722_s23 = inlined_call_operand.vmem [shape: f32[2,10,49], index: 23, kind: output, shape index: {3}]   ;;  %s7723_s24 = inlined_call_operand.vmem [shape: f32[2,10,32], index: 24, kind: output, shape index: {4}]  }
   0x1   :  { %7738 = sst [smem:[#allocation57_spill]] %s7699_s0 }
   0x2   :  { %7739 = sst [smem:[#allocation58_spill]] %s7700_s1 }
   0x3   :  { %7740 = sst [smem:[#allocation59_spill]] %s7701_s2 }
   0x4   :  { %7741 = sst [smem:[#allocation60_spill]] %s7702_s3 }
   0x5   :  { %7742 = sst [smem:[#allocation61_spill]] %s7703_s4 }
   0x6   :  { %7743 = sst [smem:[#allocation62_spill]] %s7704_s5 }
   0x7   :  { %7744 = sst [smem:[#allocation63_spill]] %s7705_s6 }
   0x8   :  { %7745 = sst [smem:[#allocation64_spill]] %s7706_s7 }
   0x9   :  { %7746 = sst [smem:[#allocation65_spill]] %s7707_s8 }
   0xa   :  { %7747 = sst [smem:[#allocation66_spill]] %s7719_s20 }
   0xb   :  { %7748 = sst [smem:[#allocation67_spill]] %s7721_s22 }
   0xc   :  { %30 = vsyncpa [#allocation3], 0 }
   0xd   :  { %31 = vsyncpa [#allocation6], 0 }
   0xe   :  { %32 = vsyncpa [#allocation9], 0 }
   0xf   :  { %33 = vsyncpa [#allocation12], 0 }
  0x10   :  { %34 = vsyncpa [#allocation15], 0 }
  0x11   :  { %35 = vsyncpa [#allocation18], 0 }
  0x12   :  { %36 = vsyncpa [#allocation21], 0 }
  0x13   :  { %37 = vsyncpa [#allocation24], 0 }
  0x14   :  { %38 = vsyncpa [#allocation27], 0 }
  0x15   :  { %39 = vsyncpa [#allocation30], 0 }
  0x16   :  { %40 = vsyncpa [#allocation4], 0  ;;  %s7749_s27 = sld [smem:[#allocation59_spill]] }
  0x1c   :  { %s61_s28 = sshll.u32 %s7749_s27, 4  ;;  %s62_s28 = int_to_ptr.hbm [resolvable:$true] %s61_s28 }
  0x1d   :  { %41 = vsyncpa [#allocation34], 0  ;;  %s6178_s6 = smov [#allocation5]   ;;  %s7750_s7 = sld [smem:[#allocation61_spill]] }
  0x1e   :  { %s63_s2 = sshll.u32 %s6178_s6, 4  ;;  %s7725_s3 = smov 128   ;;  %s64_s2 = int_to_ptr.vmem [resolvable:$true] %s63_s2 }
  0x1f   :  { %s7727_s25 = smov 8   ;;  %s6181_s8 = smov [#allocation8]  }
  0x20   :  { %69 = dma.hbm_to_vmem [thread:$0]  %s62_s28, 896, %s64_s2, [#allocation6], %s7725_s3, %s7725_s3, %s7727_s25  }
  0x21   :  { %s90_s4 = sshll.u32 %s6181_s8, 4  ;;  %s7751_s26 = sld [smem:[#allocation63_spill]]  ;;  %s91_s4 = int_to_ptr.vmem [resolvable:$true] %s90_s4 }
  0x22   :  { %s7752_s29 = sld [smem:[#allocation65_spill]]  ;;  %s6183_s28 = smov [#allocation14]  }
  0x23   :  { %s88_s30 = sshll.u32 %s7750_s7, 4  ;;  %s6182_s7 = smov [#allocation11]   ;;  %s89_s30 = int_to_ptr.hbm [resolvable:$true] %s88_s30 }
  0x24   :  { %93 = dma.hbm_to_vmem [thread:$0]  %s89_s30, 16, %s91_s4, [#allocation9]  }
  0x25   :  { %s114_s20 = sshll.u32 %s6182_s7, 4  ;;  %s137_s2 = sshll.u32 %s6183_s28, 4  ;;  %s115_s20 = int_to_ptr.vmem [resolvable:$true] %s114_s20  ;;  %s138_s2 = int_to_ptr.vmem [resolvable:$true] %s137_s2 }
  0x26   :  { %s159_s25 = sshll.u32 %s7709_s10, 4  ;;  %s7753_s1 = smov 8   ;;  %s160_s25 = int_to_ptr.hbm [resolvable:$true] %s159_s25 }
  0x27   :  { %s112_s27 = sshll.u32 %s7751_s26, 4  ;;  %s7754_s5 = smov 128   ;;  %s113_s27 = int_to_ptr.hbm [resolvable:$true] %s112_s27 }
  0x28   :  { %s135_s0 = sshll.u32 %s7752_s29, 4  ;;  %s183_s4 = sshll.u32 %s7711_s12, 4  ;;  %s136_s0 = int_to_ptr.hbm [resolvable:$true] %s135_s0  ;;  %s184_s4 = int_to_ptr.hbm [resolvable:$true] %s183_s4 }
  0x29   :  { %117 = dma.hbm_to_vmem [thread:$0]  %s113_s27, 16, %s115_s20, [#allocation12]  }
  0x2a   :  { %143 = dma.hbm_to_vmem [thread:$0]  %s136_s0, 512, %s138_s2, [#allocation15], %s7754_s5, %s7754_s5, %s7753_s1  }
  0x2b   :  { %s6184_s26 = smov [#allocation17]   ;;  %s6185_s20 = smov [#allocation20]  }
  0x2c   :  { %s161_s6 = sshll.u32 %s6184_s26, 4  ;;  %s185_s10 = sshll.u32 %s6185_s20, 4  ;;  %s162_s6 = int_to_ptr.vmem [resolvable:$true] %s161_s6  ;;  %s186_s10 = int_to_ptr.vmem [resolvable:$true] %s185_s10 }
  0x2d   :  { %167 = dma.hbm_to_vmem [thread:$0]  %s160_s25, 512, %s162_s6, [#allocation18], %s7754_s5, %s7754_s5, %s7753_s1  }
  0x2e   :  { %s207_s29 = sshll.u32 %s7713_s14, 4  ;;  %s231_s7 = sshll.u32 %s7715_s16, 4  ;;  %s208_s29 = int_to_ptr.hbm [resolvable:$true] %s207_s29  ;;  %s232_s7 = int_to_ptr.hbm [resolvable:$true] %s231_s7 }
  0x2f   :  { %191 = dma.hbm_to_vmem [thread:$0]  %s184_s4, 256, %s186_s10, [#allocation21], %s7754_s5, %s7754_s5, %s7753_s1  }
  0x30   :  { %s6186_s28 = smov [#allocation23]   ;;  %s6187_s25 = smov [#allocation26]  }
  0x31   :  { %s209_s2 = sshll.u32 %s6186_s28, 4  ;;  %s233_s14 = sshll.u32 %s6187_s25, 4  ;;  %s210_s2 = int_to_ptr.vmem [resolvable:$true] %s209_s2  ;;  %s234_s14 = int_to_ptr.vmem [resolvable:$true] %s233_s14 }
  0x32   :  { %215 = dma.hbm_to_vmem [thread:$0]  %s208_s29, 256, %s210_s2, [#allocation24], %s7754_s5, %s7754_s5, %s7753_s1  }
  0x33   :  { %s6188_s8 = smov 512   ;;  %s6189_s30 = smov 32  }
  0x34   :  { %239 = dma.hbm_to_vmem [thread:$0]  %s232_s7, 1024, %s234_s14, [#allocation27], %s6188_s8, %s6188_s8, %s6189_s30  }
  0x35   :  { %s255_s26 = sshll.u32 %s7717_s18, 4  ;;  %s6190_s16 = smov [#allocation29]   ;;  %s256_s26 = int_to_ptr.hbm [resolvable:$true] %s255_s26 }
  0x36   :  { %s257_s6 = sshll.u32 %s6190_s16, 4  ;;  %s7755_s3 = sld [smem:[#allocation58_spill]]  ;;  %s258_s6 = int_to_ptr.vmem [resolvable:$true] %s257_s6 }
  0x37   :  { %s6191_s12 = smov 896   ;;  %s6192_s29 = smov 56  }
  0x38   :  { %263 = dma.hbm_to_vmem [thread:$0]  %s256_s26, 44800, %s258_s6, [#allocation30], %s6191_s12, %s6191_s12, %s6192_s29  }
  0x39   :  { %s6193_s0 = smov [#allocation2]   ;;  %s6194_s7 = smov 256  }
  0x3a   :  { %s50_s28 = sshll.u32 %s6193_s0, 4  ;;  %s6195_s2 = smov 16   ;;  %s51_s28 = int_to_ptr.vmem [resolvable:$true] %s50_s28 }
  0x3b   :  { %s7756_s14 = sld [smem:[#allocation60_spill]]  ;;  %s6196_s30 = smov [#allocation7]  }
  0x3c   :  { %s48_s27 = sshll.u32 %s7755_s3, 4  ;;  %s76_s22 = sshll.u32 %s6196_s30, 4  ;;  %s49_s27 = int_to_ptr.hbm [resolvable:$true] %s48_s27  ;;  %s77_s22 = int_to_ptr.vmem [resolvable:$true] %s76_s22 }
  0x3d   :  { %56 = dma.hbm_to_vmem [thread:$0]  %s49_s27, 16128, %s51_s28, [#allocation3], %s6194_s7, %s6194_s7, %s6195_s2  }
  0x3e   :  { %s7757_s20 = sld [smem:[#allocation62_spill]]  ;;  %s6197_s26 = smov [#allocation10]  }
  0x3f   :  { %s100_s6 = sshll.u32 %s6197_s26, 4  ;;  %s7758_s12 = sld [smem:[#allocation64_spill]]  ;;  %s101_s6 = int_to_ptr.vmem [resolvable:$true] %s100_s6 }
  0x40   :  { %s149_s7 = sshll.u32 %s7708_s9, 4  ;;  %s6198_s2 = smov [#allocation13]   ;;  %s150_s7 = int_to_ptr.hbm [resolvable:$true] %s149_s7 }
  0x41   :  { %s74_s8 = sshll.u32 %s7756_s14, 4  ;;  %s124_s25 = sshll.u32 %s6198_s2, 4  ;;  %s75_s8 = int_to_ptr.hbm [resolvable:$true] %s74_s8  ;;  %s125_s25 = int_to_ptr.vmem [resolvable:$true] %s124_s25 }
  0x42   :  { %82 = dma.hbm_to_vmem [thread:$0]  %s75_s8, 256, %s77_s22, [#allocation6], %s7754_s5, %s7754_s5, %s7753_s1  }
  0x43   :  { %s6199_s18 = smov [#allocation16]   ;;  %s173_s22 = sshll.u32 %s7710_s11, 4  ;;  %s174_s22 = int_to_ptr.hbm [resolvable:$true] %s173_s22 }
  0x44   :  { %s98_s10 = sshll.u32 %s7757_s20, 4  ;;  %s151_s14 = sshll.u32 %s6199_s18, 4  ;;  %s99_s10 = int_to_ptr.hbm [resolvable:$true] %s98_s10  ;;  %s152_s14 = int_to_ptr.vmem [resolvable:$true] %s151_s14 }
  0x45   :  { %s122_s29 = sshll.u32 %s7758_s12, 4  ;;  %s197_s9 = sshll.u32 %s7712_s13, 4  ;;  %s123_s29 = int_to_ptr.hbm [resolvable:$true] %s122_s29  ;;  %s198_s9 = int_to_ptr.hbm [resolvable:$true] %s197_s9 }
  0x46   :  { %106 = dma.hbm_to_vmem [thread:$0]  %s99_s10, 2304, %s101_s6, [#allocation9], %s7754_s5, %s7754_s5, %s7753_s1  }
  0x47   :  { %130 = dma.hbm_to_vmem [thread:$0]  %s123_s29, 256, %s125_s25, [#allocation12], %s7754_s5, %s7754_s5, %s7753_s1  }
  0x48   :  { %154 = dma.hbm_to_vmem [thread:$0]  %s150_s7, 16, %s152_s14, [#allocation15]  }
  0x49   :  { %s6200_s20 = smov [#allocation19]   ;;  %s6201_s26 = smov [#allocation22]  }
  0x4a   :  { %s175_s10 = sshll.u32 %s6200_s20, 4  ;;  %s199_s1 = sshll.u32 %s6201_s26, 4  ;;  %s176_s10 = int_to_ptr.vmem [resolvable:$true] %s175_s10  ;;  %s200_s1 = int_to_ptr.vmem [resolvable:$true] %s199_s1 }
  0x4b   :  { %178 = dma.hbm_to_vmem [thread:$0]  %s174_s22, 16, %s176_s10, [#allocation18]  }
  0x4c   :  { %s221_s3 = sshll.u32 %s7714_s15, 4  ;;  %s245_s12 = sshll.u32 %s7716_s17, 4  ;;  %s222_s3 = int_to_ptr.hbm [resolvable:$true] %s221_s3  ;;  %s246_s12 = int_to_ptr.hbm [resolvable:$true] %s245_s12 }
  0x4d   :  { %202 = dma.hbm_to_vmem [thread:$0]  %s198_s9, 16, %s200_s1, [#allocation21]  }
  0x4e   :  { %s6202_s29 = smov [#allocation25]   ;;  %s6203_s0 = smov [#allocation28]  }
  0x4f   :  { %s223_s13 = sshll.u32 %s6202_s29, 4  ;;  %s247_s28 = sshll.u32 %s6203_s0, 4  ;;  %s224_s13 = int_to_ptr.vmem [resolvable:$true] %s223_s13  ;;  %s248_s28 = int_to_ptr.vmem [resolvable:$true] %s247_s28 }
  0x50   :  { %226 = dma.hbm_to_vmem [thread:$0]  %s222_s3, 16, %s224_s13, [#allocation24]  }
  0x51   :  { %s269_s25 = sshll.u32 %s7718_s19, 4  ;;  %s6204_s15 = smov [#allocation31]   ;;  %s270_s25 = int_to_ptr.hbm [resolvable:$true] %s269_s25 }
  0x52   :  { %250 = dma.hbm_to_vmem [thread:$0]  %s246_s12, 64, %s248_s28, [#allocation27]  }
  0x53   :  { %s271_s18 = sshll.u32 %s6204_s15, 4  ;;  %s272_s18 = int_to_ptr.vmem [resolvable:$true] %s271_s18 }
  0x54   :  { %274 = dma.hbm_to_vmem [thread:$0]  %s270_s25, 112, %s272_s18, [#allocation30]  }
  0x55   :  { %6154 = dma.done.wait [#allocation3], 16128  }
  0x56   :  { %6155 = vsyncadd [#allocation3], 4294951168 }
  0x57   :  { %6156 = dma.done.wait [#allocation6], 1152  }
  0x58   :  { %6157 = vsyncadd [#allocation6], 4294966144 }
  0x59   :  { %6158 = dma.done.wait [#allocation9], 2320  }
  0x5a   :  { %6159 = vsyncadd [#allocation9], 4294964976 }
  0x5b   :  { %6160 = dma.done.wait [#allocation12], 272  }
  0x5c   :  { %6161 = vsyncadd [#allocation12], 4294967024 }
  0x5d   :  { %6162 = dma.done.wait [#allocation15], 528  }
  0x5e   :  { %6163 = vsyncadd [#allocation15], 4294966768 }
  0x5f   :  { %6164 = dma.done.wait [#allocation18], 528  }
  0x60   :  { %6165 = vsyncadd [#allocation18], 4294966768 }
  0x61   :  { %6166 = dma.done.wait [#allocation21], 272  }
  0x62   :  { %6167 = vsyncadd [#allocation21], 4294967024 }
  0x63   :  { %6168 = dma.done.wait [#allocation24], 272  }
  0x64   :  { %6169 = vsyncadd [#allocation24], 4294967024 }
  0x65   :  { %6170 = dma.done.wait [#allocation27], 1088  }
  0x66   :  { %6171 = vsyncadd [#allocation27], 4294966208 }
  0x67   :  { %6172 = dma.done.wait [#allocation30], 44912  }
  0x68   :  { %6173 = vsyncadd [#allocation30], 4294922384  ;;  %vm699_vm0 = vcmask 1040384   ;;  %v352_v0 = vld [vmem:[#allocation7 + $0x8] sm:$0x1]  ;;  %v351_v1 = vld [vmem:[#allocation7] sm:$0xff] }
  0x69   :  { %5012 = vmatpush.msk.msra.mxu2 %vm699_vm0, %v352_v0  ;;  %s7759_s14 = sld [smem:[#allocation57_spill]]  ;;  %vm623_vm1 = vcmask 72704   ;;  %v6522_v42 = vld [vmem:[#allocation8] ss:$0 sm:$0xff]  ;;  %vm495_vm2 = vcmask 261120   ;;  %vm1010_vm3 = vcmask 1043456  }
  0x6a   :  { %vm820_vm4 = vcmask 556032   ;;  %vm1431_vm5 = vcmask 130048   ;;  %vm2199_vm9 = vcmask 400384   ;;  %vm2203_vm14 = vcmask 394240   ;;  %s4956_s9 = sshll.u32 %s7720_s21, 4  ;;  %s6206_s20 = smov [#allocation33]   ;;  %s4957_s9 = int_to_ptr.hbm [resolvable:$true] %s4956_s9 }
  0x6b   :  { %718 = vmatpush.msra.mxu2 %v351_v1  ;;  %s4954_s10 = sshll.u32 %s6206_s20, 4  ;;  %s6207_s26 = smov [#allocation32]   ;;  %s4955_s10 = int_to_ptr.vmem [resolvable:$true] %s4954_s10 }
  0x6c   :  { %s4943_s1 = sshll.u32 %s6207_s26, 4  ;;  %s7792_s3 = sld [smem:[#allocation66_spill]]  ;;  %s4944_s1 = int_to_ptr.vmem [resolvable:$true] %s4943_s1 }
  0x6d   :  { %s6208_s21 = smov [#allocation35]  }
  0x6e   :  { %s4965_s27 = sshll.u32 %s6208_s21, 4  ;;  %s4966_s27 = int_to_ptr.vmem [resolvable:$true] %s4965_s27 }
  0x6f   :  { %v595_v2 = vld [vmem:[%s7759_s14] sm:$0xff]  ;;  %v596_v3 = vld [vmem:[%s7759_s14 + $0x8] sm:$0xff]  ;;  %v597_v4 = vld [vmem:[%s7759_s14 + $0x10] sm:$0xff] }
  0x70   :  { %5013 = vmatmul.msk.f32.vlgmr.msra.gmra.mxu2 %vm623_vm1, %v595_v2  ;;  %v598_v5 = vld [vmem:[%s7759_s14 + $0x18] sm:$0xff]  ;;  %v599_v6 = vld [vmem:[%s7759_s14 + $0x20] sm:$0xff]  ;;  %v600_v7 = vld [vmem:[%s7759_s14 + $0x28] sm:$0xff] }
  0x71   :  { %v601_v8 = vld [vmem:[%s7759_s14 + $0x30] sm:$0xff]  ;;  %v602_v9 = vld [vmem:[%s7759_s14 + $0x38] sm:$0xff]  ;;  %v603_v10 = vld [vmem:[%s7759_s14 + $0x40] sm:$0xff] }
  0x72   :  { %v604_v11 = vld [vmem:[%s7759_s14 + $0x48] sm:$0xff]  ;;  %v605_v12 = vld [vmem:[%s7759_s14 + $0x50] sm:$0xff]  ;;  %v606_v13 = vld [vmem:[%s7759_s14 + $0x58] sm:$0xff]  ;;  %s4945_s11 = sshll.u32 %s7792_s3, 4  ;;  %s4946_s11 = int_to_ptr.hbm [resolvable:$true] %s4945_s11 }
  0x73   :  { %v607_v14 = vld [vmem:[%s7759_s14 + $0x60] sm:$0xff]  ;;  %v608_v15 = vld [vmem:[%s7759_s14 + $0x68] sm:$0xff]  ;;  %v609_v16 = vld [vmem:[%s7759_s14 + $0x70] sm:$0xff] }
  0x74   :  { %v610_v17 = vld [vmem:[%s7759_s14 + $0x78] sm:$0xff]  ;;  %v611_v18 = vld [vmem:[%s7759_s14 + $0x80] sm:$0xff]  ;;  %v612_v20 = vld [vmem:[%s7759_s14 + $0x88] sm:$0xff] }
  0x75   :  { %v613_v22 = vld [vmem:[%s7759_s14 + $0x90] sm:$0xff]  ;;  %v614_v24 = vld [vmem:[%s7759_s14 + $0x98] sm:$0xff]  ;;  %v615_v26 = vld [vmem:[%s7759_s14 + $0xa0] sm:$0xff] }
  0x76   :  { %v616_v28 = vld [vmem:[%s7759_s14 + $0xa8] sm:$0xff]  ;;  %v617_v30 = vld [vmem:[%s7759_s14 + $0xb0] sm:$0xff]  ;;  %v618_v32 = vld [vmem:[%s7759_s14 + $0xb8] sm:$0xff] }
  0x77   :  { %v619_v34 = vld [vmem:[%s7759_s14 + $0xc0] sm:$0xf] }
  0x78   :  { %5014 = vmatmul.msk.f32.gmra.mxu2 %vm623_vm1, %v596_v3 }
  0x80   :  { %5015 = vmatmul.msk.f32.gmra.mxu2 %vm623_vm1, %v597_v4 }
  0x88   :  { %5016 = vmatmul.msk.f32.gmra.mxu2 %vm623_vm1, %v598_v5 }
  0x90   :  { %5017 = vmatmul.msk.f32.gmra.mxu2 %vm623_vm1, %v599_v6 }
  0x98   :  { %5018 = vmatmul.msk.f32.gmra.mxu2 %vm623_vm1, %v600_v7 }
  0xa0   :  { %5019 = vmatmul.msk.f32.gmra.mxu2 %vm623_vm1, %v601_v8 }
  0xa8   :  { %5020 = vmatmul.msk.f32.gmra.mxu2 %vm623_vm1, %v602_v9 }
  0xb0   :  { %5021 = vmatmul.msk.f32.gmra.mxu2 %vm623_vm1, %v603_v10 }
  0xb8   :  { %5022 = vmatmul.msk.f32.gmra.mxu2 %vm623_vm1, %v604_v11 }
  0xc0   :  { %5023 = vmatmul.msk.f32.gmra.mxu2 %vm623_vm1, %v605_v12 }
  0xc8   :  { %5024 = vmatmul.msk.f32.gmra.mxu2 %vm623_vm1, %v606_v13 }
  0xd0   :  { %5025 = vmatmul.msk.f32.gmra.mxu2 %vm623_vm1, %v607_v14 }
  0xd8   :  { %5026 = vmatmul.msk.f32.gmra.mxu2 %vm623_vm1, %v608_v15 }
  0xe0   :  { %5027 = vmatmul.msk.f32.gmra.mxu2 %vm623_vm1, %v609_v16  ;;  %v490_v16 = vld [vmem:[#allocation14 + $0x18] sm:$0xff] }
  0xe1   :  { %514 = vmatpush.msra.mxu0 %v490_v16  ;;  %v525_v16 = vld [vmem:[#allocation5] sm:$0xff] }
  0xe8   :  { %5028 = vmatmul.msk.f32.gmra.mxu2 %vm623_vm1, %v610_v17  ;;  %v489_v17 = vld [vmem:[#allocation14 + $0x10] sm:$0xff] }
  0xe9   :  { %515 = vmatpush.msra.mxu0 %v489_v17  ;;  %v388_v17 = vld [vmem:[#allocation2 + $0x110] sm:$0xff] }
  0xf0   :  { %5029 = vmatmul.msk.f32.gmra.mxu2 %vm623_vm1, %v611_v18 }
  0xf3   :  { %v6484_v19 = vpop.f32.mrf.mxu2 }
  0xf4   :  { %v721_v11 = vadd.f32 %v6522_v42, %v6484_v19 }
  0xf6   :  { %v795_v15 = vmax.f32 %v721_v11, 0.0  ;;  %v6575_v11 = vld [vmem:[#allocation17 + $0x10] sm:$0xff] }
  0xf8   :  { %5030 = vmatmul.msk.f32.gmra.mxu2 %vm623_vm1, %v612_v20  ;;  %v488_v20 = vld [vmem:[#allocation14 + $0x8] sm:$0xff] }
  0xf9   :  { %516 = vmatpush.msra.mxu0 %v488_v20 }
  0xfb   :  { %v6490_v21 = vpop.f32.mrf.mxu2 }
  0xfc   :  { %v724_v9 = vadd.f32 %v6522_v42, %v6490_v21  ;;  %v487_v21 = vld [vmem:[#allocation14] sm:$0xff] }
  0xfd   :  { %517 = vmatpush.msra.mxu0 %v487_v21  ;;  %v526_v21 = vld [vmem:[#allocation5 + $0x8] sm:$0xff] }
  0xfe   :  { %v796_v13 = vmax.f32 %v724_v9, 0.0  ;;  %v6573_v9 = vld [vmem:[#allocation17 + $0x18] sm:$0xff] }
  0xff   :  { %569 = vmatpush.msra.mxu1 %v6573_v9 }
 0x100   :  { %5031 = vmatmul.msk.f32.gmra.mxu2 %vm623_vm1, %v613_v22  ;;  %v485_v22 = vld [vmem:[#allocation13] sm:$0xff] }
 0x101   :  { %5003 = vmatmul.msk.f32.vlgmr.msra.gmra.mxu0 %vm495_vm2, %v485_v22  ;;  %570 = vmatpush.msra.mxu1 %v6575_v11  ;;  %v390_v22 = vld [vmem:[#allocation2 + $0x120] sm:$0xff] }
 0x103   :  { %v6496_v23 = vpop.f32.mrf.mxu2 }
 0x104   :  { %v727_v7 = vadd.f32 %v6522_v42, %v6496_v23  ;;  %v486_v23 = vld [vmem:[#allocation13 + $0x8] sm:$0x3] }
 0x106   :  { %v797_v12 = vmax.f32 %v727_v7, 0.0  ;;  %v384_v7 = vld [vmem:[#allocation2 + $0xf0] sm:$0xff] }
 0x108   :  { %5032 = vmatmul.msk.f32.gmra.mxu2 %vm623_vm1, %v614_v24  ;;  %v354_v24 = vld [vmem:[#allocation2] sm:$0xff] }
 0x109   :  { %5004 = vmatmul.msk.f32.gmra.mxu0 %vm495_vm2, %v486_v23  ;;  %v383_v23 = vld [vmem:[#allocation2 + $0xe8] sm:$0xff] }
 0x10b   :  { %v729_v25 = vpop.f32.mrf.mxu2 }
 0x10c   :  { %v730_v4 = vadd.f32 %v6522_v42, %v729_v25 }
 0x10e   :  { %v798_v10 = vmax.f32 %v730_v4, 0.0  ;;  %v373_v4 = vld [vmem:[#allocation2 + $0x98] sm:$0xff] }
 0x110   :  { %5033 = vmatmul.msk.f32.gmra.mxu2 %vm623_vm1, %v615_v26  ;;  %v356_v26 = vld [vmem:[#allocation2 + $0x10] sm:$0xff] }
 0x113   :  { %v732_v27 = vpop.f32.mrf.mxu2 }
 0x114   :  { %v733_v2 = vadd.f32 %v6522_v42, %v732_v27 }
 0x116   :  { %v799_v8 = vmax.f32 %v733_v2, 0.0  ;;  %v371_v2 = vld [vmem:[#allocation2 + $0x88] sm:$0xff] }
 0x118   :  { %5034 = vmatmul.msk.f32.gmra.mxu2 %vm623_vm1, %v616_v28  ;;  %v358_v28 = vld [vmem:[#allocation2 + $0x20] sm:$0xff] }
 0x11b   :  { %v735_v29 = vpop.f32.mrf.mxu2 }
 0x11c   :  { %v736_v0 = vadd.f32 %v6522_v42, %v735_v29 }
 0x11e   :  { %v800_v5 = vmax.f32 %v736_v0, 0.0  ;;  %v369_v0 = vld [vmem:[#allocation2 + $0x78] sm:$0xff] }
 0x120   :  { %5035 = vmatmul.msk.f32.gmra.mxu2 %vm623_vm1, %v617_v30 }
 0x123   :  { %v738_v31 = vpop.f32.mrf.mxu2 }
 0x124   :  { %v739_v62 = vadd.f32 %v6522_v42, %v738_v31 }
 0x126   :  { %v801_v3 = vmax.f32 %v739_v62, 0.0  ;;  %v367_v62 = vld [vmem:[#allocation2 + $0x68] sm:$0xff] }
 0x128   :  { %5036 = vmatmul.msk.f32.gmra.mxu2 %vm623_vm1, %v618_v32 }
 0x12b   :  { %v741_v33 = vpop.f32.mrf.mxu2 }
 0x12c   :  { %v742_v59 = vadd.f32 %v6522_v42, %v741_v33 }
 0x12e   :  { %v802_v1 = vmax.f32 %v742_v59, 0.0  ;;  %v372_v59 = vld [vmem:[#allocation2 + $0x90] sm:$0xff] }
 0x130   :  { %5037 = vmatmul.msk.f32.gmra.mxu2 %vm623_vm1, %v619_v34 }
 0x133   :  { %v744_v35 = vpop.f32.mrf.mxu2 }
 0x134   :  { %v745_v57 = vadd.f32 %v6522_v42, %v744_v35 }
 0x136   :  { %v803_v63 = vmax.f32 %v745_v57, 0.0  ;;  %v370_v57 = vld [vmem:[#allocation2 + $0x80] sm:$0xff] }
 0x13b   :  { %v747_v36 = vpop.f32.mrf.mxu2 }
 0x13c   :  { %v748_v55 = vadd.f32 %v6522_v42, %v747_v36  ;;  %v360_v36 = vld [vmem:[#allocation2 + $0x30] sm:$0xff] }
 0x13e   :  { %v804_v60 = vmax.f32 %v748_v55, 0.0  ;;  %v366_v55 = vld [vmem:[#allocation2 + $0x60] sm:$0xff] }
 0x143   :  { %v750_v37 = vpop.f32.mrf.mxu2 }
 0x144   :  { %v751_v53 = vadd.f32 %v6522_v42, %v750_v37 }
 0x146   :  { %v805_v58 = vmax.f32 %v751_v53, 0.0  ;;  %v364_v53 = vld [vmem:[#allocation2 + $0x50] sm:$0xff] }
 0x14b   :  { %v753_v38 = vpop.f32.mrf.mxu2 }
 0x14c   :  { %v754_v50 = vadd.f32 %v6522_v42, %v753_v38 }
 0x14e   :  { %v806_v56 = vmax.f32 %v754_v50, 0.0 }
 0x153   :  { %v756_v39 = vpop.f32.mrf.mxu2 }
 0x154   :  { %v757_v48 = vadd.f32 %v6522_v42, %v756_v39 }
 0x156   :  { %v807_v54 = vmax.f32 %v757_v48, 0.0 }
 0x15b   :  { %v759_v40 = vpop.f32.mrf.mxu2 }
 0x15c   :  { %v760_v46 = vadd.f32 %v6522_v42, %v759_v40 }
 0x15e   :  { %v808_v51 = vmax.f32 %v760_v46, 0.0  ;;  %v362_v46 = vld [vmem:[#allocation2 + $0x40] sm:$0xff] }
 0x163   :  { %v762_v41 = vpop.f32.mrf.mxu2 }
 0x164   :  { %v763_v44 = vadd.f32 %v6522_v42, %v762_v41 }
 0x166   :  { %v809_v49 = vmax.f32 %v763_v44, 0.0 }
 0x16b   :  { %v765_v43 = vpop.f32.mrf.mxu2 }
 0x16c   :  { %v766_v45 = vadd.f32 %v6522_v42, %v765_v43 }
 0x16e   :  { %v810_v47 = vmax.f32 %v766_v45, 0.0 }
 0x170   :  { %1014 = vmatpush.msra.mxu3 %v810_v47 }
 0x172   :  { %1015 = vmatpush.msra.mxu3 %v809_v49 }
 0x173   :  { %v6529_v52 = vpop.f32.mrf.mxu2 }
 0x174   :  { %1016 = vmatpush.msra.mxu3 %v808_v51  ;;  %v769_v47 = vadd.f32 %v6522_v42, %v6529_v52  ;;  %v355_v51 = vld [vmem:[#allocation2 + $0x8] sm:$0xff]  ;;  %v368_v52 = vld [vmem:[#allocation2 + $0x70] sm:$0xff] }
 0x176   :  { %1017 = vmatpush.msra.mxu3 %v807_v54  ;;  %v811_v50 = vmax.f32 %v769_v47, 0.0  ;;  %v357_v54 = vld [vmem:[#allocation2 + $0x18] sm:$0xff]  ;;  %v400_v47 = vld [vmem:[#allocation2 + $0x170] sm:$0xff] }
 0x178   :  { %1018 = vmatpush.msra.mxu3 %v806_v56  ;;  %v361_v56 = vld [vmem:[#allocation2 + $0x38] sm:$0xff] }
 0x17a   :  { %1019 = vmatpush.msra.mxu3 %v805_v58  ;;  %v363_v58 = vld [vmem:[#allocation2 + $0x48] sm:$0xff] }
 0x17b   :  { %v6535_v61 = vpop.f32.mrf.mxu2 }
 0x17c   :  { %1020 = vmatpush.msra.mxu3 %v804_v60  ;;  %v772_v44 = vadd.f32 %v6522_v42, %v6535_v61  ;;  %v365_v60 = vld [vmem:[#allocation2 + $0x58] sm:$0xff]  ;;  %v374_v61 = vld [vmem:[#allocation2 + $0xa0] sm:$0xff] }
 0x17e   :  { %1021 = vmatpush.msra.mxu3 %v803_v63  ;;  %v812_v49 = vmax.f32 %v772_v44, 0.0  ;;  %v376_v63 = vld [vmem:[#allocation2 + $0xb0] sm:$0xff]  ;;  %v391_v44 = vld [vmem:[#allocation2 + $0x128] sm:$0xff] }
 0x180   :  { %1022 = vmatpush.msra.mxu3 %v802_v1  ;;  %v378_v1 = vld [vmem:[#allocation2 + $0xc0] sm:$0xff] }
 0x182   :  { %1023 = vmatpush.msra.mxu3 %v801_v3  ;;  %v380_v3 = vld [vmem:[#allocation2 + $0xd0] sm:$0xff] }
 0x183   :  { %v774_v6 = vpop.f32.mrf.mxu2 }
 0x184   :  { %1024 = vmatpush.msra.mxu3 %v800_v5  ;;  %v775_v41 = vadd.f32 %v6522_v42, %v774_v6  ;;  %v382_v5 = vld [vmem:[#allocation2 + $0xe0] sm:$0xff]  ;;  %v375_v6 = vld [vmem:[#allocation2 + $0xa8] sm:$0xff] }
 0x186   :  { %1025 = vmatpush.msra.mxu3 %v799_v8  ;;  %v813_v48 = vmax.f32 %v775_v41, 0.0  ;;  %v377_v8 = vld [vmem:[#allocation2 + $0xb8] sm:$0xff]  ;;  %v398_v41 = vld [vmem:[#allocation2 + $0x160] sm:$0xff] }
 0x188   :  { %1026 = vmatpush.msra.mxu3 %v798_v10  ;;  %v386_v10 = vld [vmem:[#allocation2 + $0x100] sm:$0xff] }
 0x18a   :  { %1027 = vmatpush.msra.mxu3 %v797_v12  ;;  %v6578_v12 = vld [vmem:[#allocation17 + $0x8] sm:$0xff] }
 0x18b   :  { %v777_v14 = vpop.f32.mrf.mxu2  ;;  %571 = vmatpush.msra.mxu1 %v6578_v12 }
 0x18c   :  { %1028 = vmatpush.msra.mxu3 %v796_v13  ;;  %v778_v39 = vadd.f32 %v6522_v42, %v777_v14  ;;  %v379_v13 = vld [vmem:[#allocation2 + $0xc8] sm:$0xff] }
 0x18e   :  { %1029 = vmatpush.msra.mxu3 %v795_v15  ;;  %v814_v45 = vmax.f32 %v778_v39, 0.0  ;;  %v6584_v15 = vld [vmem:[#allocation17] sm:$0xff] }
 0x18f   :  { %1030 = vmatmul.f32.vlgmr.msra.gmra.mxu3 %v354_v24  ;;  %572 = vmatpush.msra.mxu1 %v6584_v15 }
 0x190   :  { %5005 = vmatmul.msk.f32.vlgmr.msra.gmra.mxu1 %vm495_vm2, %v525_v16 }
 0x193   :  { %v780_v18 = vpop.f32.mrf.mxu2 }
 0x194   :  { %v781_v37 = vadd.f32 %v6522_v42, %v780_v18  ;;  %v381_v18 = vld [vmem:[#allocation2 + $0xd8] sm:$0xff] }
 0x196   :  { %v815_v43 = vmax.f32 %v781_v37, 0.0 }
 0x197   :  { %1033 = vmatmul.f32.gmra.mxu3 %v356_v26  ;;  %v392_v26 = vld [vmem:[#allocation2 + $0x130] sm:$0xff] }
 0x198   :  { %5006 = vmatmul.msk.f32.gmra.mxu1 %vm495_vm2, %v526_v21 }
 0x19b   :  { %v783_v19 = vpop.f32.mrf.mxu2 }
 0x19c   :  { %v784_v34 = vadd.f32 %v6522_v42, %v783_v19  ;;  %v6593_v19 = vpop.f32.mrf.mxu0 }
 0x19d   :  { %7760 = vst [vmem:[#allocation48_spill] sm:$0xff] %v6593_v19 }
 0x19e   :  { %v816_v40 = vmax.f32 %v784_v34, 0.0 }
 0x19f   :  { %1036 = vmatmul.f32.gmra.mxu3 %v358_v28  ;;  %v385_v28 = vld [vmem:[#allocation2 + $0xf8] sm:$0xff] }
 0x1a3   :  { %v786_v25 = vpop.f32.mrf.mxu2 }
 0x1a4   :  { %v787_v32 = vadd.f32 %v6522_v42, %v786_v25  ;;  %v527_v25 = vld [vmem:[#allocation5 + $0x10] sm:$0xff] }
 0x1a5   :  { %5007 = vmatmul.msk.f32.gmra.mxu1 %vm495_vm2, %v527_v25 }
 0x1a6   :  { %v817_v38 = vmax.f32 %v787_v32, 0.0 }
 0x1a7   :  { %1039 = vmatmul.f32.gmra.mxu3 %v360_v36  ;;  %v396_v36 = vld [vmem:[#allocation2 + $0x150] sm:$0xff] }
 0x1ab   :  { %v789_v27 = vpop.f32.mrf.mxu2 }
 0x1ac   :  { %v790_v30 = vadd.f32 %v6522_v42, %v789_v27  ;;  %v6599_v27 = vpop.f32.mrf.mxu0 }
 0x1ad   :  { %7761 = vst [vmem:[#allocation49_spill] sm:$0xff] %v6599_v27 }
 0x1ae   :  { %v818_v35 = vmax.f32 %v790_v30, 0.0  ;;  %v528_v30 = vld [vmem:[#allocation5 + $0x18] sm:$0xff] }
 0x1af   :  { %1042 = vmatmul.f32.gmra.mxu3 %v362_v46  ;;  %5008 = vmatmul.msk.f32.gmra.mxu1 %vm495_vm2, %v528_v30  ;;  %v531_v46 = vld [vmem:[#allocation5 + $0x30] sm:$0x1] }
 0x1b3   :  { %v792_v29 = vpop.f32.mrf.mxu2 }
 0x1b4   :  { %v793_v31 = vadd.f32 %v6522_v42, %v792_v29  ;;  %v359_v42 = vld [vmem:[#allocation2 + $0x28] sm:$0xff] }
 0x1b6   :  { %v819_v33 = vmax.f32 %v793_v31, 0.0  ;;  %v394_v31 = vld [vmem:[#allocation2 + $0x140] sm:$0xff] }
 0x1b7   :  { %1045 = vmatmul.f32.gmra.mxu3 %v364_v53  ;;  %v1429_v53 = vld [vmem:[#allocation10 + $0x10] sm:$0xff] }
 0x1b8   :  { %5038 = vmatpush.msk.msrb.mxu0 %vm1010_vm3, %v819_v33  ;;  %v387_v33 = vld [vmem:[#allocation2 + $0x108] sm:$0xff] }
 0x1ba   :  { %1228 = vmatpush.msrb.mxu0 %v818_v35  ;;  %v529_v35 = vld [vmem:[#allocation5 + $0x20] sm:$0xff] }
 0x1bb   :  { %5009 = vmatmul.msk.f32.gmra.mxu1 %vm495_vm2, %v529_v35 }
 0x1bc   :  { %1229 = vmatpush.msrb.mxu0 %v817_v38  ;;  %v389_v38 = vld [vmem:[#allocation2 + $0x118] sm:$0xff] }
 0x1be   :  { %1230 = vmatpush.msrb.mxu0 %v816_v40  ;;  %v530_v40 = vld [vmem:[#allocation5 + $0x28] sm:$0xff] }
 0x1bf   :  { %1048 = vmatmul.f32.gmra.mxu3 %v366_v55 }
 0x1c0   :  { %1231 = vmatpush.msrb.mxu0 %v815_v43 }
 0x1c2   :  { %1232 = vmatpush.msrb.mxu0 %v814_v45 }
 0x1c3   :  { %5010 = vmatmul.msk.f32.gmra.mxu1 %vm495_vm2, %v530_v40 }
 0x1c4   :  { %1233 = vmatpush.msrb.mxu0 %v813_v48  ;;  %v1430_v48 = vld [vmem:[#allocation10 + $0x18] sm:$0xff] }
 0x1c5   :  { %1467 = vmatpush.msrb.mxu1 %v1430_v48 }
 0x1c6   :  { %1234 = vmatpush.msrb.mxu0 %v812_v49 }
 0x1c7   :  { %1051 = vmatmul.f32.gmra.mxu3 %v368_v52  ;;  %1468 = vmatpush.msrb.mxu1 %v1429_v53  ;;  %v413_v53 = vld [vmem:[#allocation2 + $0x1d8] sm:$0xff] }
 0x1c8   :  { %1235 = vmatpush.msrb.mxu0 %v811_v50  ;;  %v393_v50 = vld [vmem:[#allocation2 + $0x138] sm:$0xff] }
 0x1c9   :  { %5039 = vmatmul.msk.f32.vlgmr.msrb.gmra.mxu0 %vm820_vm4, %v355_v51 }
 0x1cb   :  { %5011 = vmatmul.msk.f32.gmra.mxu1 %vm495_vm2, %v531_v46  ;;  %v411_v46 = vld [vmem:[#allocation2 + $0x1c8] sm:$0xff] }
 0x1cf   :  { %1054 = vmatmul.f32.gmra.mxu3 %v370_v57 }
 0x1d1   :  { %5040 = vmatmul.msk.f32.gmra.mxu0 %vm820_vm4, %v357_v54  ;;  %v402_v54 = vld [vmem:[#allocation2 + $0x180] sm:$0xff] }
 0x1d7   :  { %1057 = vmatmul.f32.gmra.mxu3 %v372_v59 }
 0x1d9   :  { %5041 = vmatmul.msk.f32.gmra.mxu0 %vm820_vm4, %v359_v42  ;;  %v395_v42 = vld [vmem:[#allocation2 + $0x148] sm:$0xff] }
 0x1df   :  { %1060 = vmatmul.f32.gmra.mxu3 %v374_v61 }
 0x1e1   :  { %5042 = vmatmul.msk.f32.gmra.mxu0 %vm820_vm4, %v361_v56  ;;  %v404_v56 = vld [vmem:[#allocation2 + $0x190] sm:$0xff] }
 0x1e7   :  { %1063 = vmatmul.f32.gmra.mxu3 %v376_v63 }
 0x1e9   :  { %5043 = vmatmul.msk.f32.gmra.mxu0 %vm820_vm4, %v363_v58  ;;  %v397_v58 = vld [vmem:[#allocation2 + $0x158] sm:$0xff] }
 0x1ef   :  { %1066 = vmatmul.f32.gmra.mxu3 %v378_v1 }
 0x1f1   :  { %5044 = vmatmul.msk.f32.gmra.mxu0 %vm820_vm4, %v365_v60  ;;  %v406_v60 = vld [vmem:[#allocation2 + $0x1a0] sm:$0xff] }
 0x1f7   :  { %1069 = vmatmul.f32.gmra.mxu3 %v380_v3 }
 0x1f9   :  { %5045 = vmatmul.msk.f32.gmra.mxu0 %vm820_vm4, %v367_v62  ;;  %v399_v62 = vld [vmem:[#allocation2 + $0x168] sm:$0xff] }
 0x1ff   :  { %1072 = vmatmul.f32.gmra.mxu3 %v382_v5  ;;  %v410_v5 = vld [vmem:[#allocation2 + $0x1c0] sm:$0xff] }
 0x201   :  { %5046 = vmatmul.msk.f32.gmra.mxu0 %vm820_vm4, %v369_v0  ;;  %v408_v0 = vld [vmem:[#allocation2 + $0x1b0] sm:$0xff] }
 0x207   :  { %1075 = vmatmul.f32.gmra.mxu3 %v384_v7  ;;  %v403_v7 = vld [vmem:[#allocation2 + $0x188] sm:$0xff] }
 0x209   :  { %5047 = vmatmul.msk.f32.gmra.mxu0 %vm820_vm4, %v371_v2  ;;  %v401_v2 = vld [vmem:[#allocation2 + $0x178] sm:$0xff] }
 0x20f   :  { %1078 = vmatmul.f32.gmra.mxu3 %v386_v10 }
 0x211   :  { %5048 = vmatmul.msk.f32.gmra.mxu0 %vm820_vm4, %v373_v4 }
 0x212   :  { %v6582_v14 = vpop.f32.mrf.mxu3 }
 0x217   :  { %1081 = vmatmul.f32.gmra.mxu3 %v388_v17  ;;  %v405_v17 = vld [vmem:[#allocation2 + $0x198] sm:$0xff] }
 0x219   :  { %5049 = vmatmul.msk.f32.gmra.mxu0 %vm820_vm4, %v375_v6 }
 0x21a   :  { %v6589_v20 = vpop.f32.mrf.mxu3 }
 0x21f   :  { %1084 = vmatmul.f32.gmra.mxu3 %v390_v22  ;;  %v414_v22 = vld [vmem:[#allocation2 + $0x1e0] sm:$0xff] }
 0x221   :  { %5050 = vmatmul.msk.f32.gmra.mxu0 %vm820_vm4, %v377_v8 }
 0x222   :  { %v6595_v24 = vpop.f32.mrf.mxu3 }
 0x227   :  { %1087 = vmatmul.f32.gmra.mxu3 %v392_v26  ;;  %v407_v26 = vld [vmem:[#allocation2 + $0x1a8] sm:$0xff] }
 0x229   :  { %5051 = vmatmul.msk.f32.gmra.mxu0 %vm820_vm4, %v379_v13  ;;  %v412_v13 = vld [vmem:[#allocation2 + $0x1d0] sm:$0xff] }
 0x22a   :  { %v6601_v29 = vpop.f32.mrf.mxu3 }
 0x22f   :  { %1090 = vmatmul.f32.gmra.mxu3 %v394_v31  ;;  %v1426_v31 = vld [vmem:[#allocation10] sm:$0xff] }
 0x231   :  { %5052 = vmatmul.msk.f32.gmra.mxu0 %vm820_vm4, %v381_v18 }
 0x232   :  { %v6607_v34 = vpop.f32.mrf.mxu3 }
 0x237   :  { %1093 = vmatmul.f32.gmra.mxu3 %v396_v36  ;;  %v409_v36 = vld [vmem:[#allocation2 + $0x1b8] sm:$0xff] }
 0x239   :  { %5053 = vmatmul.msk.f32.gmra.mxu0 %vm820_vm4, %v383_v23  ;;  %v1427_v23 = vld [vmem:[#allocation10 + $0x8] sm:$0xff] }
 0x23a   :  { %v6613_v39 = vpop.f32.mrf.mxu3  ;;  %1526 = vmatpush.msra.mxu1 %v1427_v23  ;;  %v425_v23 = vld [vmem:[#allocation2 + $0x238] sm:$0xff] }
 0x23c   :  { %1527 = vmatpush.msra.mxu1 %v1426_v31  ;;  %v427_v31 = vld [vmem:[#allocation2 + $0x248] sm:$0xff] }
 0x23f   :  { %1096 = vmatmul.f32.gmra.mxu3 %v398_v41  ;;  %v418_v41 = vld [vmem:[#allocation2 + $0x200] sm:$0xff] }
 0x241   :  { %5054 = vmatmul.msk.f32.gmra.mxu0 %vm820_vm4, %v385_v28 }
 0x242   :  { %v6619_v45 = vpop.f32.mrf.mxu3 }
 0x246   :  { %v6605_v32 = vpop.f32.mrf.mxu0 }
 0x247   :  { %1099 = vmatmul.f32.gmra.mxu3 %v400_v47 }
 0x249   :  { %5055 = vmatmul.msk.f32.gmra.mxu0 %vm820_vm4, %v387_v33  ;;  %v416_v33 = vld [vmem:[#allocation2 + $0x1f0] sm:$0xff] }
 0x24a   :  { %v1052_v51 = vpop.f32.mrf.mxu3 }
 0x24e   :  { %v6611_v37 = vpop.f32.mrf.mxu0 }
 0x24f   :  { %1102 = vmatmul.f32.gmra.mxu3 %v402_v54 }
 0x251   :  { %5056 = vmatmul.msk.f32.gmra.mxu0 %vm820_vm4, %v389_v38 }
 0x252   :  { %v1055_v52 = vpop.f32.mrf.mxu3 }
 0x256   :  { %v6617_v43 = vpop.f32.mrf.mxu0 }
 0x257   :  { %1105 = vmatmul.f32.gmra.mxu3 %v404_v56 }
 0x259   :  { %5057 = vmatmul.msk.f32.gmra.mxu0 %vm820_vm4, %v391_v44 }
 0x25a   :  { %v1058_v59 = vpop.f32.mrf.mxu3 }
 0x25e   :  { %v6623_v49 = vpop.f32.mrf.mxu0 }
 0x25f   :  { %1108 = vmatmul.f32.gmra.mxu3 %v406_v60 }
 0x261   :  { %5058 = vmatmul.msk.f32.gmra.mxu0 %vm820_vm4, %v393_v50  ;;  %v420_v50 = vld [vmem:[#allocation2 + $0x210] sm:$0xff] }
 0x262   :  { %v1061_v63 = vpop.f32.mrf.mxu3 }
 0x266   :  { %v6626_v55 = vpop.f32.mrf.mxu0 }
 0x267   :  { %1111 = vmatmul.f32.gmra.mxu3 %v408_v0  ;;  %v417_v0 = vld [vmem:[#allocation2 + $0x1f8] sm:$0xff] }
 0x269   :  { %5059 = vmatmul.msk.f32.gmra.mxu0 %vm820_vm4, %v395_v42 }
 0x26a   :  { %v1064_v3 = vpop.f32.mrf.mxu3 }
 0x26e   :  { %v6629_v57 = vpop.f32.mrf.mxu0 }
 0x26f   :  { %1114 = vmatmul.f32.gmra.mxu3 %v410_v5 }
 0x271   :  { %5060 = vmatmul.msk.f32.gmra.mxu0 %vm820_vm4, %v397_v58  ;;  %v415_v58 = vld [vmem:[#allocation2 + $0x1e8] sm:$0xff] }
 0x272   :  { %v1067_v8 = vpop.f32.mrf.mxu3 }
 0x276   :  { %v6632_v61 = vpop.f32.mrf.mxu0 }
 0x277   :  { %1117 = vmatmul.f32.gmra.mxu3 %v412_v13 }
 0x279   :  { %5061 = vmatmul.msk.f32.gmra.mxu0 %vm820_vm4, %v399_v62  ;;  %v424_v62 = vld [vmem:[#allocation2 + $0x230] sm:$0xff] }
 0x27a   :  { %v1070_v18 = vpop.f32.mrf.mxu3 }
 0x27e   :  { %v1258_v1 = vpop.f32.mrf.mxu0 }
 0x27f   :  { %v1259_v4 = vadd.f32 %v1258_v1, %v1052_v51  ;;  %1120 = vmatmul.f32.gmra.mxu3 %v414_v22  ;;  %v1241_v1 = vadd.f32 %v6611_v37, %v6589_v20  ;;  %v428_v20 = vld [vmem:[#allocation2 + $0x250] sm:$0xff]  ;;  %v1552_v37 = vld [vmem:[#allocation10 + $0x28] sm:$0xff] }
 0x281   :  { %5062 = vmatmul.msk.f32.gmra.mxu0 %vm820_vm4, %v401_v2  ;;  %5102 = vmatmul.msk.f32.vlgmr.msrb.gmra.mxu1 %vm1431_vm5, %v1259_v4  ;;  %v1244_v4 = vadd.f32 %v6617_v43, %v6595_v24  ;;  %v1551_v24 = vld [vmem:[#allocation10 + $0x20] sm:$0xff]  ;;  %v1620_v43 = vld [vmem:[#allocation10 + $0x30] sm:$0xff] }
 0x282   :  { %v6641_v28 = vpop.f32.mrf.mxu3  ;;  %1588 = vmatpush.msrb.mxu1 %v1552_v37 }
 0x284   :  { %1589 = vmatpush.msrb.mxu1 %v1551_v24 }
 0x286   :  { %v1261_v6 = vpop.f32.mrf.mxu0 }
 0x287   :  { %v1262_v10 = vadd.f32 %v1261_v6, %v1055_v52  ;;  %1123 = vmatmul.f32.gmra.mxu3 %v416_v33  ;;  %v422_v52 = vld [vmem:[#allocation2 + $0x220] sm:$0xff]  ;;  %v1621_v6 = vld [vmem:[#allocation10 + $0x38] sm:$0xff]  ;;  %v1256_v33 = vadd.f32 %v6632_v61, %v6619_v45 }
 0x288   :  { %1657 = vmatpush.msrb.mxu2 %v1621_v6  ;;  %v438_v45 = vld [vmem:[#allocation2 + $0x2a0] sm:$0xff] }
 0x289   :  { %5063 = vmatmul.msk.f32.gmra.mxu0 %vm820_vm4, %v403_v7  ;;  %5103 = vmatmul.msk.f32.gmra.mxu1 %vm1431_vm5, %v1262_v10  ;;  %v1247_v10 = vadd.f32 %v6623_v49, %v6601_v29  ;;  %v432_v29 = vld [vmem:[#allocation2 + $0x270] sm:$0xff] }
 0x28a   :  { %v6645_v38 = vpop.f32.mrf.mxu3  ;;  %1658 = vmatpush.msrb.mxu2 %v1620_v43  ;;  %v439_v43 = vld [vmem:[#allocation2 + $0x2a8] sm:$0xff] }
 0x28e   :  { %v1264_v16 = vpop.f32.mrf.mxu0 }
 0x28f   :  { %v1265_v21 = vadd.f32 %v1264_v16, %v1058_v59  ;;  %1126 = vmatmul.f32.gmra.mxu3 %v418_v41  ;;  %v1238_v59 = vadd.f32 %v6605_v32, %v6582_v14  ;;  %v426_v14 = vld [vmem:[#allocation2 + $0x240] sm:$0xff] }
 0x290   :  { %v430_v16 = vld [vmem:[#allocation2 + $0x260] sm:$0xff] }
 0x291   :  { %5064 = vmatmul.msk.f32.gmra.mxu0 %vm820_vm4, %v405_v17  ;;  %5104 = vmatmul.msk.f32.gmra.mxu1 %vm1431_vm5, %v1265_v21  ;;  %v1250_v21 = vadd.f32 %v6626_v55, %v6607_v34  ;;  %v6699_v34 = vpop.f32.mrf.mxu1 }
 0x292   :  { %v6649_v48 = vpop.f32.mrf.mxu3  ;;  %7762 = vst [vmem:[#allocation50_spill] sm:$0xff] %v6699_v34 }
 0x296   :  { %v1267_v25 = vpop.f32.mrf.mxu0 }
 0x297   :  { %v1268_v30 = vadd.f32 %v1267_v25, %v1061_v63  ;;  %1129 = vmatmul.f32.gmra.mxu3 %v420_v50  ;;  %v1253_v25 = vadd.f32 %v6629_v57, %v6613_v39  ;;  %v436_v39 = vld [vmem:[#allocation2 + $0x290] sm:$0xff] }
 0x299   :  { %5065 = vmatmul.msk.f32.gmra.mxu0 %vm820_vm4, %v407_v26  ;;  %5105 = vmatmul.msk.f32.gmra.mxu1 %vm1431_vm5, %v1268_v30  ;;  %v434_v30 = vld [vmem:[#allocation2 + $0x280] sm:$0xff] }
 0x29a   :  { %v6653_v42 = vpop.f32.mrf.mxu3 }
 0x29e   :  { %v1270_v35 = vpop.f32.mrf.mxu0 }
 0x29f   :  { %v1271_v40 = vadd.f32 %v1270_v35, %v1064_v3  ;;  %1132 = vmatmul.f32.gmra.mxu3 %v422_v52  ;;  %v419_v3 = vld [vmem:[#allocation2 + $0x208] sm:$0xff] }
 0x2a1   :  { %5066 = vmatmul.msk.f32.gmra.mxu0 %vm820_vm4, %v409_v36  ;;  %5106 = vmatmul.msk.f32.gmra.mxu1 %vm1431_vm5, %v1271_v40  ;;  %v429_v36 = vld [vmem:[#allocation2 + $0x258] sm:$0xff] }
 0x2a2   :  { %v6661_v60 = vpop.f32.mrf.mxu3 }
 0x2a6   :  { %v1273_v44 = vpop.f32.mrf.mxu0 }
 0x2a7   :  { %v1274_v47 = vadd.f32 %v1273_v44, %v1067_v8  ;;  %1135 = vmatmul.f32.gmra.mxu3 %v424_v62  ;;  %v421_v8 = vld [vmem:[#allocation2 + $0x218] sm:$0xff] }
 0x2a9   :  { %5067 = vmatmul.msk.f32.gmra.mxu0 %vm820_vm4, %v411_v46  ;;  %5107 = vmatmul.msk.f32.gmra.mxu1 %vm1431_vm5, %v1274_v47  ;;  %v6709_v46 = vpop.f32.mrf.mxu1  ;;  %v431_v47 = vld [vmem:[#allocation2 + $0x268] sm:$0xff] }
 0x2aa   :  { %v6669_v2 = vpop.f32.mrf.mxu3  ;;  %7763 = vst [vmem:[#allocation51_spill] sm:$0xff] %v6709_v46 }
 0x2ae   :  { %v1276_v51 = vpop.f32.mrf.mxu0 }
 0x2af   :  { %v1277_v54 = vadd.f32 %v1276_v51, %v1070_v18  ;;  %1138 = vmatmul.f32.gmra.mxu3 %v426_v14  ;;  %v423_v18 = vld [vmem:[#allocation2 + $0x228] sm:$0xff] }
 0x2b0   :  { %v1690_v14 = vld [vmem:[#allocation10 + $0x48] sm:$0xff] }
 0x2b1   :  { %5068 = vmatmul.msk.f32.gmra.mxu0 %vm820_vm4, %v413_v53  ;;  %5108 = vmatmul.msk.f32.gmra.mxu1 %vm1431_vm5, %v1277_v54  ;;  %v440_v54 = vld [vmem:[#allocation2 + $0x2b0] sm:$0xff] }
 0x2b2   :  { %v6677_v5 = vpop.f32.mrf.mxu3 }
 0x2b6   :  { %v6657_v56 = vpop.f32.mrf.mxu0 }
 0x2b7   :  { %1141 = vmatmul.f32.gmra.mxu3 %v428_v20  ;;  %v1280_v40 = vadd.f32 %v6657_v56, %v6641_v28  ;;  %v6718_v28 = vpop.f32.mrf.mxu1  ;;  %v433_v56 = vld [vmem:[#allocation2 + $0x278] sm:$0xff]  ;;  %v444_v20 = vld [vmem:[#allocation2 + $0x2d0] sm:$0xff] }
 0x2b8   :  { %7764 = vst [vmem:[#allocation52_spill] sm:$0xff] %v6718_v28 }
 0x2b9   :  { %5069 = vmatmul.msk.f32.gmra.mxu0 %vm820_vm4, %v415_v58  ;;  %5109 = vmatmul.msk.f32.vlgmr.msra.gmra.mxu1 %vm1431_vm5, %v1238_v59 }
 0x2ba   :  { %v1094_v13 = vpop.f32.mrf.mxu3  ;;  %1726 = vmatpush.msra.mxu1 %v1690_v14 }
 0x2be   :  { %v6665_v63 = vpop.f32.mrf.mxu0 }
 0x2bf   :  { %1144 = vmatmul.f32.gmra.mxu3 %v430_v16  ;;  %v1283_v50 = vadd.f32 %v6665_v63, %v6645_v38  ;;  %v442_v38 = vld [vmem:[#allocation2 + $0x2c0] sm:$0xff]  ;;  %v6726_v63 = vpop.f32.mrf.mxu1 }
 0x2c0   :  { %7765 = vst [vmem:[#allocation53_spill] sm:$0xff] %v6726_v63 }
 0x2c1   :  { %5070 = vmatmul.msk.f32.gmra.mxu0 %vm820_vm4, %v417_v0  ;;  %5110 = vmatmul.msk.f32.gmra.mxu1 %vm1431_vm5, %v1241_v1  ;;  %v435_v1 = vld [vmem:[#allocation2 + $0x288] sm:$0xff] }
 0x2c2   :  { %v1097_v22 = vpop.f32.mrf.mxu3 }
 0x2c6   :  { %v6673_v32 = vpop.f32.mrf.mxu0 }
 0x2c7   :  { %1147 = vmatmul.f32.gmra.mxu3 %v432_v29  ;;  %v1286_v58 = vadd.f32 %v6673_v32, %v6649_v48  ;;  %v1689_v32 = vld [vmem:[#allocation10 + $0x40] sm:$0xff]  ;;  %v6733_v37 = vpop.f32.mrf.mxu1 }
 0x2c8   :  { %1727 = vmatpush.msra.mxu1 %v1689_v32  ;;  %7766 = vst [vmem:[#allocation54_spill] sm:$0xff] %v6733_v37  ;;  %v441_v29 = vld [vmem:[#allocation2 + $0x2b8] sm:$0xff]  ;;  %v6899_v37 = vld [vmem:[#allocation11] ss:$0 sm:$0xff] }
 0x2c9   :  { %5071 = vmatmul.msk.f32.gmra.mxu0 %vm820_vm4, %v419_v3  ;;  %5111 = vmatmul.msk.f32.gmra.mxu1 %vm1431_vm5, %v1244_v4 }
 0x2ca   :  { %v1100_v26 = vpop.f32.mrf.mxu3 }
 0x2ce   :  { %v6681_v7 = vpop.f32.mrf.mxu0 }
 0x2cf   :  { %1150 = vmatmul.f32.gmra.mxu3 %v434_v30  ;;  %v1289_v3 = vadd.f32 %v6681_v7, %v6653_v42 }
 0x2d1   :  { %5072 = vmatmul.msk.f32.gmra.mxu0 %vm820_vm4, %v421_v8  ;;  %5112 = vmatmul.msk.f32.gmra.mxu1 %vm1431_vm5, %v1247_v10  ;;  %v437_v8 = vld [vmem:[#allocation2 + $0x298] sm:$0xff] }
 0x2d2   :  { %v1103_v35 = vpop.f32.mrf.mxu3 }
 0x2d6   :  { %v6687_v17 = vpop.f32.mrf.mxu0 }
 0x2d7   :  { %1153 = vmatmul.f32.gmra.mxu3 %v436_v39  ;;  %v1292_v42 = vadd.f32 %v6687_v17, %v6661_v60  ;;  %v448_v60 = vld [vmem:[#allocation2 + $0x2f0] sm:$0xff] }
 0x2d9   :  { %5073 = vmatmul.msk.f32.gmra.mxu0 %vm820_vm4, %v423_v18  ;;  %5113 = vmatmul.msk.f32.gmra.mxu1 %vm1431_vm5, %v1250_v21 }
 0x2da   :  { %v1106_v44 = vpop.f32.mrf.mxu3 }
 0x2de   :  { %v6693_v49 = vpop.f32.mrf.mxu0 }
 0x2df   :  { %1156 = vmatmul.f32.gmra.mxu3 %v438_v45  ;;  %v1295_v16 = vadd.f32 %v6693_v49, %v6669_v2  ;;  %v450_v2 = vld [vmem:[#allocation2 + $0x300] sm:$0xff] }
 0x2e1   :  { %5074 = vmatmul.msk.f32.gmra.mxu0 %vm820_vm4, %v425_v23  ;;  %5114 = vmatmul.msk.f32.gmra.mxu1 %vm1431_vm5, %v1253_v25 }
 0x2e2   :  { %v1109_v53 = vpop.f32.mrf.mxu3 }
 0x2e6   :  { %v6701_v55 = vpop.f32.mrf.mxu0 }
 0x2e7   :  { %1159 = vmatmul.f32.gmra.mxu3 %v440_v54  ;;  %v1298_v23 = vadd.f32 %v6701_v55, %v6677_v5  ;;  %v452_v5 = vld [vmem:[#allocation2 + $0x310] sm:$0xff]  ;;  %v449_v54 = vld [vmem:[#allocation2 + $0x2f8] sm:$0xff] }
 0x2e9   :  { %5075 = vmatmul.msk.f32.gmra.mxu0 %vm820_vm4, %v427_v31  ;;  %5115 = vmatmul.msk.f32.gmra.mxu1 %vm1431_vm5, %v1256_v33  ;;  %v443_v31 = vld [vmem:[#allocation2 + $0x2c8] sm:$0xff] }
 0x2ea   :  { %v1112_v62 = vpop.f32.mrf.mxu3 }
 0x2ee   :  { %v1300_v57 = vpop.f32.mrf.mxu0 }
 0x2ef   :  { %v1301_v41 = vadd.f32 %v1300_v57, %v1094_v13  ;;  %1162 = vmatmul.f32.gmra.mxu3 %v442_v38  ;;  %v446_v13 = vld [vmem:[#allocation2 + $0x2e0] sm:$0xff]  ;;  %v445_v57 = vld [vmem:[#allocation2 + $0x2d8] sm:$0xff] }
 0x2f0   :  { %v458_v38 = vld [vmem:[#allocation2 + $0x340] sm:$0xff] }
 0x2f1   :  { %5076 = vmatmul.msk.f32.gmra.mxu0 %vm820_vm4, %v429_v36  ;;  %5116 = vmatmul.msk.f32.vlgmr.msrb.gmra.mxu1 %vm1431_vm5, %v1280_v40 }
 0x2f2   :  { %5123 = vmatmul.msk.f32.vlgmr.msrb.gmra.mxu2 %vm1431_vm5, %v1301_v41  ;;  %v1115_v48 = vpop.f32.mrf.mxu3  ;;  %v454_v41 = vld [vmem:[#allocation2 + $0x320] sm:$0xff] }
 0x2f6   :  { %v1303_v61 = vpop.f32.mrf.mxu0 }
 0x2f7   :  { %v1304_v51 = vadd.f32 %v1303_v61, %v1097_v22  ;;  %1165 = vmatmul.f32.gmra.mxu3 %v444_v20  ;;  %v6742_v22 = vpop.f32.mrf.mxu1  ;;  %v447_v61 = vld [vmem:[#allocation2 + $0x2e8] sm:$0xff]  ;;  %v453_v20 = vld [vmem:[#allocation2 + $0x318] sm:$0xff] }
 0x2f9   :  { %5077 = vmatmul.msk.f32.gmra.mxu0 %vm820_vm4, %v431_v47  ;;  %5117 = vmatmul.msk.f32.gmra.mxu1 %vm1431_vm5, %v1283_v50 }
 0x2fa   :  { %5124 = vmatmul.msk.f32.gmra.mxu2 %vm1431_vm5, %v1304_v51  ;;  %v1118_v10 = vpop.f32.mrf.mxu3  ;;  %v456_v51 = vld [vmem:[#allocation2 + $0x330] sm:$0xff] }
 0x2fe   :  { %v1306_v52 = vpop.f32.mrf.mxu0 }
 0x2ff   :  { %v1307_v59 = vadd.f32 %v1306_v52, %v1100_v26  ;;  %1168 = vmatmul.f32.gmra.mxu3 %v446_v13  ;;  %v6751_v49 = vpop.f32.mrf.mxu1  ;;  %v1759_v52 = vld [vmem:[#allocation10 + $0x58] sm:$0xff]  ;;  %v455_v13 = vld [vmem:[#allocation2 + $0x328] sm:$0xff] }
 0x300   :  { %1795 = vmatpush.msra.mxu2 %v1759_v52 }
 0x301   :  { %5078 = vmatmul.msk.f32.gmra.mxu0 %vm820_vm4, %v433_v56  ;;  %5118 = vmatmul.msk.f32.gmra.mxu1 %vm1431_vm5, %v1286_v58 }
 0x302   :  { %5125 = vmatmul.msk.f32.gmra.mxu2 %vm1431_vm5, %v1307_v59  ;;  %v1121_v21 = vpop.f32.mrf.mxu3  ;;  %v1758_v59 = vld [vmem:[#allocation10 + $0x50] sm:$0xff] }
 0x303   :  { %1796 = vmatpush.msra.mxu2 %v1758_v59 }
 0x306   :  { %v1309_v0 = vpop.f32.mrf.mxu0 }
 0x307   :  { %v1310_v4 = vadd.f32 %v1309_v0, %v1103_v35  ;;  %1171 = vmatmul.f32.gmra.mxu3 %v448_v60  ;;  %v6756_v55 = vpop.f32.mrf.mxu1  ;;  %v457_v60 = vld [vmem:[#allocation2 + $0x338] sm:$0xff] }
 0x309   :  { %5079 = vmatmul.msk.f32.gmra.mxu0 %vm820_vm4, %v435_v1  ;;  %5119 = vmatmul.msk.f32.gmra.mxu1 %vm1431_vm5, %v1289_v3  ;;  %v451_v1 = vld [vmem:[#allocation2 + $0x308] sm:$0xff] }
 0x30a   :  { %5126 = vmatmul.msk.f32.gmra.mxu2 %vm1431_vm5, %v1310_v4  ;;  %v1124_v26 = vpop.f32.mrf.mxu3  ;;  %v460_v4 = vld [vmem:[#allocation2 + $0x350] sm:$0xff] }
 0x30e   :  { %v1312_v6 = vpop.f32.mrf.mxu0 }
 0x30f   :  { %v1313_v7 = vadd.f32 %v1312_v6, %v1106_v44  ;;  %1174 = vmatmul.f32.gmra.mxu3 %v450_v2  ;;  %v6760_v44 = vpop.f32.mrf.mxu1 }
 0x311   :  { %5080 = vmatmul.msk.f32.gmra.mxu0 %vm820_vm4, %v437_v8  ;;  %5120 = vmatmul.msk.f32.gmra.mxu1 %vm1431_vm5, %v1292_v42  ;;  %v462_v42 = vld [vmem:[#allocation2 + $0x360] sm:$0xff] }
 0x312   :  { %5127 = vmatmul.msk.f32.gmra.mxu2 %vm1431_vm5, %v1313_v7  ;;  %v1127_v35 = vpop.f32.mrf.mxu3 }
 0x316   :  { %v1315_v24 = vpop.f32.mrf.mxu0 }
 0x317   :  { %v1316_v18 = vadd.f32 %v1315_v24, %v1109_v53  ;;  %1177 = vmatmul.f32.gmra.mxu3 %v452_v5  ;;  %v461_v5 = vld [vmem:[#allocation2 + $0x358] sm:$0xff] }
 0x319   :  { %5081 = vmatmul.msk.f32.gmra.mxu0 %vm820_vm4, %v439_v43  ;;  %5121 = vmatmul.msk.f32.gmra.mxu1 %vm1431_vm5, %v1295_v16  ;;  %v464_v16 = vld [vmem:[#allocation2 + $0x370] sm:$0xff] }
 0x31a   :  { %5128 = vmatmul.msk.f32.gmra.mxu2 %vm1431_vm5, %v1316_v18  ;;  %v1130_v40 = vpop.f32.mrf.mxu3 }
 0x31e   :  { %v1318_v17 = vpop.f32.mrf.mxu0 }
 0x31f   :  { %v1319_v25 = vadd.f32 %v1318_v17, %v1112_v62  ;;  %1180 = vmatmul.f32.gmra.mxu3 %v454_v41  ;;  %v6764_v62 = vpop.f32.mrf.mxu1 }
 0x321   :  { %5082 = vmatmul.msk.f32.gmra.mxu0 %vm820_vm4, %v441_v29  ;;  %5122 = vmatmul.msk.f32.gmra.mxu1 %vm1431_vm5, %v1298_v23  ;;  %v466_v23 = vld [vmem:[#allocation2 + $0x380] sm:$0xff] }
 0x322   :  { %5129 = vmatmul.msk.f32.gmra.mxu2 %vm1431_vm5, %v1319_v25  ;;  %v1133_v50 = vpop.f32.mrf.mxu3 }
 0x326   :  { %v1321_v30 = vpop.f32.mrf.mxu0 }
 0x327   :  { %v1322_v33 = vadd.f32 %v1321_v30, %v1115_v48  ;;  %1183 = vmatmul.f32.gmra.mxu3 %v456_v51  ;;  %v6770_v48 = vpop.f32.mrf.mxu1  ;;  %v1827_v51 = vld [vmem:[#allocation10 + $0x60] sm:$0xff] }
 0x329   :  { %5083 = vmatmul.msk.f32.gmra.mxu0 %vm820_vm4, %v443_v31  ;;  %5130 = vmatmul.msk.f32.vlgmr.msra.gmra.mxu1 %vm1431_vm5, %v1322_v33  ;;  %v468_v33 = vld [vmem:[#allocation2 + $0x390] sm:$0xff] }
 0x32a   :  { %v1136_v58 = vpop.f32.mrf.mxu3 }
 0x32e   :  { %v1324_v39 = vpop.f32.mrf.mxu0 }
 0x32f   :  { %v1325_v36 = vadd.f32 %v1324_v39, %v1118_v10  ;;  %1186 = vmatmul.f32.gmra.mxu3 %v458_v38  ;;  %v6774_v7 = vpop.f32.mrf.mxu1  ;;  %v474_v38 = vld [vmem:[#allocation2 + $0x3c0] sm:$0xff] }
 0x331   :  { %5084 = vmatmul.msk.f32.gmra.mxu0 %vm820_vm4, %v445_v57  ;;  %5131 = vmatmul.msk.f32.gmra.mxu1 %vm1431_vm5, %v1325_v36  ;;  %v470_v36 = vld [vmem:[#allocation2 + $0x3a0] sm:$0xff] }
 0x332   :  { %v1139_v3 = vpop.f32.mrf.mxu3 }
 0x336   :  { %v1327_v45 = vpop.f32.mrf.mxu0 }
 0x337   :  { %v1328_v47 = vadd.f32 %v1327_v45, %v1121_v21  ;;  %1189 = vmatmul.f32.gmra.mxu3 %v460_v4  ;;  %v6778_v18 = vpop.f32.mrf.mxu1  ;;  %v463_v45 = vld [vmem:[#allocation2 + $0x368] sm:$0xff] }
 0x339   :  { %5085 = vmatmul.msk.f32.gmra.mxu0 %vm820_vm4, %v447_v61  ;;  %5132 = vmatmul.msk.f32.gmra.mxu1 %vm1431_vm5, %v1328_v47  ;;  %v1828_v61 = vld [vmem:[#allocation10 + $0x68] sm:$0xff] }
 0x33a   :  { %v1142_v8 = vpop.f32.mrf.mxu3  ;;  %1864 = vmatpush.msrb.mxu1 %v1828_v61 }
 0x33c   :  { %1865 = vmatpush.msrb.mxu1 %v1827_v51 }
 0x33e   :  { %v1330_v53 = vpop.f32.mrf.mxu0 }
 0x33f   :  { %v1331_v56 = vadd.f32 %v1330_v53, %v1124_v26  ;;  %1192 = vmatmul.f32.gmra.mxu3 %v462_v42  ;;  %v459_v26 = vld [vmem:[#allocation2 + $0x348] sm:$0xff]  ;;  %v6782_v31 = vpop.f32.mrf.mxu1  ;;  %v472_v53 = vld [vmem:[#allocation2 + $0x3b0] sm:$0xff] }
 0x341   :  { %5086 = vmatmul.msk.f32.gmra.mxu0 %vm820_vm4, %v449_v54  ;;  %5133 = vmatmul.msk.f32.gmra.mxu1 %vm1431_vm5, %v1331_v56  ;;  %v465_v56 = vld [vmem:[#allocation2 + $0x378] sm:$0xff] }
 0x342   :  { %v1145_v43 = vpop.f32.mrf.mxu3 }
 0x346   :  { %v1333_v0 = vpop.f32.mrf.mxu0 }
 0x347   :  { %v1334_v14 = vadd.f32 %v1333_v0, %v1127_v35  ;;  %1195 = vmatmul.f32.gmra.mxu3 %v464_v16 }
 0x349   :  { %5087 = vmatmul.msk.f32.gmra.mxu0 %vm820_vm4, %v451_v1  ;;  %5134 = vmatmul.msk.f32.gmra.mxu1 %vm1431_vm5, %v1334_v14  ;;  %v467_v14 = vld [vmem:[#allocation2 + $0x388] sm:$0xff] }
 0x34a   :  { %v1148_v29 = vpop.f32.mrf.mxu3 }
 0x34e   :  { %v1336_v32 = vpop.f32.mrf.mxu0 }
 0x34f   :  { %v1337_v6 = vadd.f32 %v1336_v32, %v1130_v40  ;;  %1198 = vmatmul.f32.gmra.mxu3 %v466_v23  ;;  %v6788_v40 = vpop.f32.mrf.mxu1  ;;  %v476_v32 = vld [vmem:[#allocation2 + $0x3d0] sm:$0xff] }
 0x351   :  { %5088 = vmatmul.msk.f32.gmra.mxu0 %vm820_vm4, %v453_v20  ;;  %5135 = vmatmul.msk.f32.gmra.mxu1 %vm1431_vm5, %v1337_v6  ;;  %v469_v6 = vld [vmem:[#allocation2 + $0x398] sm:$0xff] }
 0x352   :  { %v1151_v30 = vpop.f32.mrf.mxu3 }
 0x356   :  { %v1339_v10 = vpop.f32.mrf.mxu0 }
 0x357   :  { %v1340_v24 = vadd.f32 %v1339_v10, %v1133_v50  ;;  %1201 = vmatmul.f32.gmra.mxu3 %v468_v33  ;;  %v6792_v54 = vpop.f32.mrf.mxu1 }
 0x358   :  { %v1533_v27 = vadd.f32 %v6792_v54, %v6760_v44 }
 0x359   :  { %5089 = vmatmul.msk.f32.gmra.mxu0 %vm820_vm4, %v455_v13  ;;  %5136 = vmatmul.msk.f32.gmra.mxu1 %vm1431_vm5, %v1340_v24  ;;  %v478_v13 = vld [vmem:[#allocation2 + $0x3e0] sm:$0xff] }
 0x35a   :  { %v1154_v57 = vpop.f32.mrf.mxu3 }
 0x35e   :  { %v1342_v21 = vpop.f32.mrf.mxu0 }
 0x35f   :  { %v1343_v17 = vadd.f32 %v1342_v21, %v1136_v58  ;;  %1204 = vmatmul.f32.gmra.mxu3 %v470_v36  ;;  %v6796_v0 = vpop.f32.mrf.mxu1  ;;  %v1897_v36 = vld [vmem:[#allocation10 + $0x78] sm:$0xff] }
 0x360   :  { %1933 = vmatpush.msrb.mxu2 %v1897_v36 }
 0x361   :  { %5090 = vmatmul.msk.f32.gmra.mxu0 %vm820_vm4, %v457_v60  ;;  %5137 = vmatmul.msk.f32.vlgmr.msra.gmra.mxu2 %vm1431_vm5, %v1343_v17 }
 0x362   :  { %v1157_v50 = vpop.f32.mrf.mxu3 }
 0x366   :  { %v1345_v25 = vpop.f32.mrf.mxu0 }
 0x367   :  { %v1346_v2 = vadd.f32 %v1345_v25, %v1139_v3  ;;  %1207 = vmatmul.f32.gmra.mxu3 %v472_v53  ;;  %v6800_v10 = vpop.f32.mrf.mxu1 }
 0x369   :  { %5091 = vmatmul.msk.f32.gmra.mxu0 %vm820_vm4, %v459_v26  ;;  %5138 = vmatmul.msk.f32.gmra.mxu2 %vm1431_vm5, %v1346_v2 }
 0x36a   :  { %v1160_v59 = vpop.f32.mrf.mxu3 }
 0x36e   :  { %v1348_v35 = vpop.f32.mrf.mxu0 }
 0x36f   :  { %v1349_v39 = vadd.f32 %v1348_v35, %v1142_v8  ;;  %1210 = vmatmul.f32.gmra.mxu3 %v474_v38  ;;  %v6806_v60 = vpop.f32.mrf.mxu1 }
 0x371   :  { %5092 = vmatmul.msk.f32.gmra.mxu0 %vm820_vm4, %v461_v5  ;;  %5139 = vmatmul.msk.f32.gmra.mxu2 %vm1431_vm5, %v1349_v39 }
 0x372   :  { %v1163_v4 = vpop.f32.mrf.mxu3 }
 0x376   :  { %v1351_v41 = vpop.f32.mrf.mxu0 }
 0x377   :  { %v1352_v47 = vadd.f32 %v1351_v41, %v1145_v43  ;;  %1213 = vmatmul.f32.gmra.mxu3 %v476_v32  ;;  %v471_v43 = vld [vmem:[#allocation2 + $0x3a8] sm:$0xff]  ;;  %v6810_v26 = vpop.f32.mrf.mxu1 }
 0x379   :  { %5093 = vmatmul.msk.f32.gmra.mxu0 %vm820_vm4, %v463_v45  ;;  %5140 = vmatmul.msk.f32.gmra.mxu2 %vm1431_vm5, %v1352_v47  ;;  %v1896_v45 = vld [vmem:[#allocation10 + $0x70] sm:$0xff] }
 0x37a   :  { %v1166_v42 = vpop.f32.mrf.mxu3  ;;  %1934 = vmatpush.msrb.mxu2 %v1896_v45 }
 0x37c   :  { %2083 = vmatpush.msra.mxu2 %v6573_v9 }
 0x37e   :  { %v1354_v52 = vpop.f32.mrf.mxu0  ;;  %2084 = vmatpush.msra.mxu2 %v6575_v11 }
 0x37f   :  { %v1355_v58 = vadd.f32 %v1354_v52, %v1148_v29  ;;  %1216 = vmatmul.f32.gmra.mxu3 %v478_v13  ;;  %v473_v29 = vld [vmem:[#allocation2 + $0x3b8] sm:$0xff]  ;;  %v6814_v5 = vpop.f32.mrf.mxu1 }
 0x380   :  { %2085 = vmatpush.msra.mxu2 %v6578_v12 }
 0x381   :  { %5094 = vmatmul.msk.f32.gmra.mxu0 %vm820_vm4, %v465_v56  ;;  %5141 = vmatmul.msk.f32.gmra.mxu2 %vm1431_vm5, %v1355_v58 }
 0x382   :  { %v1169_v21 = vpop.f32.mrf.mxu3  ;;  %2086 = vmatpush.msra.mxu2 %v6584_v15  ;;  %v5492_v15 = vld [vmem:[#allocation7 + $0x8] sm:$0x1] }
 0x386   :  { %v1357_v1 = vpop.f32.mrf.mxu0 }
 0x387   :  { %v1358_v3 = vadd.f32 %v1357_v1, %v1151_v30  ;;  %v475_v30 = vld [vmem:[#allocation2 + $0x3c8] sm:$0xff]  ;;  %v6821_v53 = vpop.f32.mrf.mxu1 }
 0x389   :  { %5095 = vmatmul.msk.f32.gmra.mxu0 %vm820_vm4, %v467_v14  ;;  %5142 = vmatmul.msk.f32.gmra.mxu2 %vm1431_vm5, %v1358_v3 }
 0x38a   :  { %v1172_v25 = vpop.f32.mrf.mxu3 }
 0x38e   :  { %v1360_v20 = vpop.f32.mrf.mxu0 }
 0x38f   :  { %v1361_v8 = vadd.f32 %v1360_v20, %v1154_v57  ;;  %v477_v57 = vld [vmem:[#allocation2 + $0x3d8] sm:$0xff]  ;;  %v6827_v9 = vpop.f32.mrf.mxu1 }
 0x390   :  { %v1613_v34 = vadd.f32 %v6827_v9, %v1533_v27 }
 0x391   :  { %5096 = vmatmul.msk.f32.gmra.mxu0 %vm820_vm4, %v469_v6  ;;  %5143 = vmatmul.msk.f32.gmra.mxu2 %vm1431_vm5, %v1361_v8 }
 0x392   :  { %v1175_v35 = vpop.f32.mrf.mxu3 }
 0x396   :  { %v1363_v24 = vpop.f32.mrf.mxu0 }
 0x397   :  { %v1364_v16 = vadd.f32 %v1363_v24, %v1157_v50  ;;  %v479_v50 = vld [vmem:[#allocation2 + $0x3e8] sm:$0xff]  ;;  %v6830_v12 = vpop.f32.mrf.mxu1 }
 0x399   :  { %5097 = vmatmul.msk.f32.gmra.mxu0 %vm820_vm4, %v471_v43  ;;  %5144 = vmatmul.msk.f32.vlgmr.msrb.gmra.mxu1 %vm1431_vm5, %v1364_v16 }
 0x39a   :  { %v1178_v61 = vpop.f32.mrf.mxu3 }
 0x39e   :  { %v1366_v17 = vpop.f32.mrf.mxu0 }
 0x39f   :  { %v1367_v23 = vadd.f32 %v1366_v17, %v1160_v59  ;;  %v6834_v32 = vpop.f32.mrf.mxu1 }
 0x3a1   :  { %5098 = vmatmul.msk.f32.gmra.mxu0 %vm820_vm4, %v473_v29  ;;  %5145 = vmatmul.msk.f32.gmra.mxu1 %vm1431_vm5, %v1367_v23  ;;  %v1965_v29 = vld [vmem:[#allocation10 + $0x80] sm:$0xff] }
 0x3a2   :  { %v1181_v52 = vpop.f32.mrf.mxu3 }
 0x3a6   :  { %v1369_v2 = vpop.f32.mrf.mxu0 }
 0x3a7   :  { %v1370_v33 = vadd.f32 %v1369_v2, %v1163_v4  ;;  %v5493_v4 = vld [vmem:[#allocation7] sm:$0xff]  ;;  %v6837_v24 = vpop.f32.mrf.mxu1 }
 0x3a9   :  { %5099 = vmatmul.msk.f32.gmra.mxu0 %vm820_vm4, %v475_v30  ;;  %5146 = vmatmul.msk.f32.gmra.mxu1 %vm1431_vm5, %v1370_v33 }
 0x3aa   :  { %v1184_v59 = vpop.f32.mrf.mxu3 }
 0x3ae   :  { %v1372_v39 = vpop.f32.mrf.mxu0 }
 0x3af   :  { %v1373_v41 = vadd.f32 %v1372_v39, %v1166_v42  ;;  %v6841_v23 = vpop.f32.mrf.mxu1 }
 0x3b1   :  { %5100 = vmatmul.msk.f32.gmra.mxu0 %vm820_vm4, %v477_v57  ;;  %5147 = vmatmul.msk.f32.gmra.mxu1 %vm1431_vm5, %v1373_v41 }
 0x3b2   :  { %v1187_v3 = vpop.f32.mrf.mxu3 }
 0x3b6   :  { %v1375_v47 = vpop.f32.mrf.mxu0 }
 0x3b7   :  { %v1376_v51 = vadd.f32 %v1375_v47, %v1169_v21  ;;  %v1966_v21 = vld [vmem:[#allocation10 + $0x88] sm:$0xff] }
 0x3b8   :  { %2002 = vmatpush.msra.mxu1 %v1966_v21 }
 0x3b9   :  { %5101 = vmatmul.msk.f32.gmra.mxu0 %vm820_vm4, %v479_v50  ;;  %5148 = vmatmul.msk.f32.gmra.mxu1 %vm1431_vm5, %v1376_v51 }
 0x3ba   :  { %v1190_v8 = vpop.f32.mrf.mxu3  ;;  %2003 = vmatpush.msra.mxu1 %v1965_v29 }
 0x3be   :  { %v1378_v56 = vpop.f32.mrf.mxu0 }
 0x3bf   :  { %v1379_v58 = vadd.f32 %v1378_v56, %v1172_v25  ;;  %v6843_v25 = vpop.f32.mrf.mxu2 }
 0x3c1   :  { %5149 = vmatmul.msk.f32.gmra.mxu1 %vm1431_vm5, %v1379_v58 }
 0x3c2   :  { %v1193_v43 = vpop.f32.mrf.mxu3 }
 0x3c6   :  { %v1381_v11 = vpop.f32.mrf.mxu0 }
 0x3c7   :  { %v1382_v38 = vadd.f32 %v1381_v11, %v1175_v35  ;;  %v6846_v35 = vpop.f32.mrf.mxu1  ;;  %v6848_v57 = vpop.f32.mrf.mxu2 }
 0x3c8   :  { %v1682_v28 = vadd.f32 %v6848_v57, %v1613_v34 }
 0x3c9   :  { %5150 = vmatmul.msk.f32.gmra.mxu1 %vm1431_vm5, %v1382_v38 }
 0x3ca   :  { %v1196_v30 = vpop.f32.mrf.mxu3 }
 0x3ce   :  { %v1384_v1 = vpop.f32.mrf.mxu0 }
 0x3cf   :  { %v1385_v14 = vadd.f32 %v1384_v1, %v1178_v61  ;;  %v1729_v45 = vpop.f32.mrf.mxu1  ;;  %v6851_v50 = vpop.f32.mrf.mxu2 }
 0x3d1   :  { %5151 = vmatmul.msk.f32.vlgmr.msrb.gmra.mxu2 %vm1431_vm5, %v1385_v14 }
 0x3d2   :  { %5212 = vmatpush.msk.msrb.mxu2 %vm699_vm0, %v5492_v15  ;;  %v1199_v41 = vpop.f32.mrf.mxu3 }
 0x3d4   :  { %2400 = vmatpush.msrb.mxu2 %v5493_v4 }
 0x3d6   :  { %v1387_v20 = vpop.f32.mrf.mxu0 }
 0x3d7   :  { %v1388_v6 = vadd.f32 %v1387_v20, %v1181_v52  ;;  %v1732_v58 = vpop.f32.mrf.mxu1  ;;  %v6855_v11 = vpop.f32.mrf.mxu2 }
 0x3d9   :  { %5152 = vmatmul.msk.f32.gmra.mxu2 %vm1431_vm5, %v1388_v6 }
 0x3da   :  { %v1202_v51 = vpop.f32.mrf.mxu3 }
 0x3de   :  { %v1390_v42 = vpop.f32.mrf.mxu0 }
 0x3df   :  { %v1391_v13 = vadd.f32 %v1390_v42, %v1184_v59  ;;  %v6858_v14 = vpop.f32.mrf.mxu1 }
 0x3e1   :  { %5153 = vmatmul.msk.f32.gmra.mxu2 %vm1431_vm5, %v1391_v13 }
 0x3e2   :  { %v1205_v59 = vpop.f32.mrf.mxu3 }
 0x3e6   :  { %v1393_v16 = vpop.f32.mrf.mxu0 }
 0x3e7   :  { %v1394_v17 = vadd.f32 %v1393_v16, %v1187_v3  ;;  %v6860_v3 = vpop.f32.mrf.mxu2  ;;  %v6863_v6 = vpop.f32.mrf.mxu1 }
 0x3e9   :  { %5154 = vmatmul.msk.f32.gmra.mxu2 %vm1431_vm5, %v1394_v17 }
 0x3ea   :  { %v1208_v4 = vpop.f32.mrf.mxu3 }
 0x3ee   :  { %v1396_v2 = vpop.f32.mrf.mxu0 }
 0x3ef   :  { %v1397_v33 = vadd.f32 %v1396_v2, %v1190_v8  ;;  %v6865_v13 = vpop.f32.mrf.mxu2  ;;  %v6868_v16 = vpop.f32.mrf.mxu1 }
 0x3f1   :  { %5155 = vmatmul.msk.f32.gmra.mxu2 %vm1431_vm5, %v1397_v33 }
 0x3f6   :  { %v1399_v39 = vpop.f32.mrf.mxu0 }
 0x3f7   :  { %v1400_v36 = vadd.f32 %v1399_v39, %v1193_v43  ;;  %v1211_v43 = vpop.f32.mrf.mxu3  ;;  %v6871_v29 = vpop.f32.mrf.mxu2 }
 0x3f8   :  { %v6873_v39 = vpop.f32.mrf.mxu1 }
 0x3f9   :  { %5156 = vmatmul.msk.f32.gmra.mxu2 %vm1431_vm5, %v1400_v36 }
 0x3fe   :  { %v1402_v61 = vpop.f32.mrf.mxu0 }
 0x3ff   :  { %v1403_v47 = vadd.f32 %v1402_v61, %v1196_v30  ;;  %v1214_v2 = vpop.f32.mrf.mxu3  ;;  %v1798_v36 = vpop.f32.mrf.mxu2 }
 0x401   :  { %5157 = vmatmul.msk.f32.gmra.mxu2 %vm1431_vm5, %v1403_v47 }
 0x406   :  { %v1405_v52 = vpop.f32.mrf.mxu0 }
 0x407   :  { %v1406_v56 = vadd.f32 %v1405_v52, %v1199_v41  ;;  %v1217_v41 = vpop.f32.mrf.mxu3  ;;  %v1801_v52 = vpop.f32.mrf.mxu2 }
 0x409   :  { %5158 = vmatmul.msk.f32.vlgmr.msra.gmra.mxu1 %vm1431_vm5, %v1406_v56 }
 0x40e   :  { %v1408_v38 = vpop.f32.mrf.mxu0 }
 0x40f   :  { %v1409_v1 = vadd.f32 %v1408_v38, %v1202_v51  ;;  %v6877_v51 = vpop.f32.mrf.mxu1 }
 0x411   :  { %5159 = vmatmul.msk.f32.gmra.mxu1 %vm1431_vm5, %v1409_v1 }
 0x416   :  { %v1411_v15 = vpop.f32.mrf.mxu0 }
 0x417   :  { %v1412_v20 = vadd.f32 %v1411_v15, %v1205_v59  ;;  %v1867_v56 = vpop.f32.mrf.mxu1  ;;  %v1804_v59 = vpop.f32.mrf.mxu2 }
 0x419   :  { %5160 = vmatmul.msk.f32.gmra.mxu1 %vm1431_vm5, %v1412_v20 }
 0x41e   :  { %v1414_v8 = vpop.f32.mrf.mxu0 }
 0x41f   :  { %v1415_v42 = vadd.f32 %v1414_v8, %v1208_v4  ;;  %v1870_v38 = vpop.f32.mrf.mxu1  ;;  %v1807_v1 = vpop.f32.mrf.mxu2 }
 0x421   :  { %5161 = vmatmul.msk.f32.gmra.mxu1 %vm1431_vm5, %v1415_v42 }
 0x426   :  { %v1417_v21 = vpop.f32.mrf.mxu0 }
 0x427   :  { %v1418_v17 = vadd.f32 %v1417_v21, %v1211_v43  ;;  %v1873_v15 = vpop.f32.mrf.mxu1  ;;  %v6879_v4 = vpop.f32.mrf.mxu2 }
 0x429   :  { %5162 = vmatmul.msk.f32.gmra.mxu1 %vm1431_vm5, %v1418_v17 }
 0x42e   :  { %v1420_v30 = vpop.f32.mrf.mxu0 }
 0x42f   :  { %v1421_v33 = vadd.f32 %v1420_v30, %v1214_v2  ;;  %v1876_v20 = vpop.f32.mrf.mxu1  ;;  %v6881_v8 = vpop.f32.mrf.mxu2  ;;  %v1530_v2 = vadd.f32 %v6788_v40, %v6756_v55  ;;  %v1751_v40 = vadd.f32 %v1732_v58, %v1682_v28 }
 0x431   :  { %5163 = vmatmul.msk.f32.gmra.mxu1 %vm1431_vm5, %v1421_v33  ;;  %v1612_v30 = vadd.f32 %v6821_v53, %v1530_v2 }
 0x433   :  { %v1681_v33 = vadd.f32 %v6843_v25, %v1612_v30  ;;  %v1536_v25 = vadd.f32 %v6796_v0, %v6764_v62  ;;  %v1539_v0 = vadd.f32 %v6800_v10, %v6770_v48 }
 0x435   :  { %v1614_v54 = vadd.f32 %v6830_v12, %v1536_v25  ;;  %v1615_v57 = vadd.f32 %v6834_v32, %v1539_v0  ;;  %v1548_v25 = vadd.f32 %v6814_v5, %v6782_v31  ;;  %v5190_v0 = vld [vmem:[%s7759_s14 + $0xe0] sm:$0xff] }
 0x436   :  { %v1423_v61 = vpop.f32.mrf.mxu0 }
 0x437   :  { %v1424_v47 = vadd.f32 %v1423_v61, %v1217_v41  ;;  %v6883_v42 = vpop.f32.mrf.mxu1  ;;  %v6885_v43 = vpop.f32.mrf.mxu2  ;;  %v1750_v61 = vadd.f32 %v1729_v45, %v1681_v33  ;;  %v1820_v45 = vadd.f32 %v1801_v52, %v1751_v40  ;;  %v1683_v34 = vadd.f32 %v6851_v50, %v1614_v54 }
 0x438   :  { %v1684_v52 = vadd.f32 %v6855_v11, %v1615_v57  ;;  %v5192_v57 = vld [vmem:[%s7759_s14 + $0xf0] sm:$0xff] }
 0x439   :  { %5164 = vmatmul.msk.f32.gmra.mxu1 %vm1431_vm5, %v1424_v47  ;;  %v1819_v19 = vadd.f32 %v1798_v36, %v1750_v61  ;;  %v1889_v27 = vadd.f32 %v1870_v38, %v1820_v45 }
 0x43a   :  { %v1753_v48 = vadd.f32 %v6863_v6, %v1684_v52  ;;  %v5195_v52 = vld [vmem:[%s7759_s14 + $0x108] sm:$0xff] }
 0x43b   :  { %v1888_v46 = vadd.f32 %v1867_v56, %v1819_v19 }
 0x43c   :  { %v1822_v38 = vadd.f32 %v1807_v1, %v1753_v48  ;;  %v1545_v1 = vadd.f32 %v6810_v26, %v6778_v18  ;;  %v5197_v48 = vld [vmem:[%s7759_s14 + $0x118] sm:$0xff] }
 0x43f   :  { %v6887_v21 = vpop.f32.mrf.mxu1 }
 0x447   :  { %v6893_v41 = vpop.f32.mrf.mxu1 }
 0x454   :  { %v1936_v17 = vpop.f32.mrf.mxu2 }
 0x455   :  { %v1957_v63 = vadd.f32 %v1936_v17, %v1888_v46  ;;  %v1891_v17 = vadd.f32 %v1876_v20, %v1822_v38 }
 0x45c   :  { %v1939_v47 = vpop.f32.mrf.mxu2 }
 0x45d   :  { %v1958_v46 = vadd.f32 %v1939_v47, %v1889_v27 }
 0x464   :  { %v1942_v44 = vpop.f32.mrf.mxu2 }
 0x46c   :  { %v1945_v36 = vpop.f32.mrf.mxu2 }
 0x46d   :  { %v1960_v33 = vadd.f32 %v1945_v36, %v1891_v17  ;;  %v5194_v36 = vld [vmem:[%s7759_s14 + $0x100] sm:$0xff] }
 0x474   :  { %v1948_v6 = vpop.f32.mrf.mxu2 }
 0x486   :  { %v2005_v55 = vpop.f32.mrf.mxu1 }
 0x487   :  { %v2026_v53 = vadd.f32 %v2005_v55, %v1957_v63  ;;  %v1752_v63 = vadd.f32 %v6858_v14, %v1683_v34 }
 0x489   :  { %v6904_v2 = vadd.f32 %v6899_v37, %v2026_v53  ;;  %v1821_v9 = vadd.f32 %v1804_v59, %v1752_v63  ;;  %v1542_v59 = vadd.f32 %v6806_v60, %v6774_v7 }
 0x48b   :  { %v2043_v19 = vmax.f32 %v6904_v2, 0.0  ;;  %v1890_v58 = vadd.f32 %v1873_v15, %v1821_v9  ;;  %v1616_v15 = vadd.f32 %v6837_v24, %v1542_v59  ;;  %v5191_v9 = vld [vmem:[%s7759_s14 + $0xe8] sm:$0xff]  ;;  %v5198_v59 = vld [vmem:[%s7759_s14 + $0x120] sm:$0xff] }
 0x48d   :  { %5165 = vmatmul.msk.f32.vlgmr.msra.gmra.mxu2 %vm495_vm2, %v2043_v19  ;;  %v1959_v56 = vadd.f32 %v1942_v44, %v1890_v58  ;;  %v1685_v30 = vadd.f32 %v6860_v3, %v1616_v15  ;;  %v1617_v3 = vadd.f32 %v6841_v23, %v1545_v1  ;;  %v5193_v58 = vld [vmem:[%s7759_s14 + $0xf8] sm:$0xff]  ;;  %v5199_v15 = vld [vmem:[%s7759_s14 + $0x128] sm:$0xff] }
 0x48e   :  { %v2008_v28 = vpop.f32.mrf.mxu1 }
 0x48f   :  { %v2027_v62 = vadd.f32 %v2008_v28, %v1958_v46  ;;  %v1754_v7 = vadd.f32 %v6868_v16, %v1685_v30  ;;  %v1686_v40 = vadd.f32 %v6865_v13, %v1617_v3  ;;  %v1618_v13 = vadd.f32 %v6846_v35, %v1548_v25  ;;  %v5200_v30 = vld [vmem:[%s7759_s14 + $0x130] sm:$0xff] }
 0x491   :  { %v6916_v12 = vadd.f32 %v6899_v37, %v2027_v62  ;;  %v1823_v24 = vadd.f32 %v6879_v4, %v1754_v7  ;;  %v1755_v18 = vadd.f32 %v6873_v39, %v1686_v40  ;;  %v1951_v4 = vpop.f32.mrf.mxu2  ;;  %v1687_v54 = vadd.f32 %v6871_v29, %v1618_v13  ;;  %v5188_v62 = vld [vmem:[%s7759_s14 + $0xd0] sm:$0xff]  ;;  %v5202_v7 = vld [vmem:[%s7759_s14 + $0x140] sm:$0xff] }
 0x492   :  { %v7771_v13 = vld [vmem:[#allocation52_spill] sm:$0xff] }
 0x493   :  { %v2044_v50 = vmax.f32 %v6916_v12, 0.0  ;;  %v1892_v47 = vadd.f32 %v6883_v42, %v1823_v24  ;;  %v1824_v23 = vadd.f32 %v6881_v8, %v1755_v18  ;;  %v1756_v31 = vadd.f32 %v6877_v51, %v1687_v54  ;;  %v5210_v12 = vld [vmem:[%s7759_s14 + $0x180] sm:$0xff] }
 0x495   :  { %5166 = vmatmul.msk.f32.gmra.mxu2 %vm495_vm2, %v2044_v50  ;;  %v1961_v53 = vadd.f32 %v1948_v6, %v1892_v47  ;;  %v1893_v45 = vadd.f32 %v6887_v21, %v1824_v23  ;;  %v1825_v8 = vadd.f32 %v6885_v43, %v1756_v31  ;;  %v5201_v6 = vld [vmem:[%s7759_s14 + $0x138] sm:$0xff]  ;;  %v5203_v47 = vld [vmem:[%s7759_s14 + $0x148] sm:$0xff] }
 0x496   :  { %v2011_v14 = vpop.f32.mrf.mxu1  ;;  %v7773_v31 = vld [vmem:[#allocation51_spill] sm:$0xff] }
 0x497   :  { %v2028_v10 = vadd.f32 %v2011_v14, %v1959_v56  ;;  %v1962_v27 = vadd.f32 %v1951_v4, %v1893_v45  ;;  %v1894_v21 = vadd.f32 %v6893_v41, %v1825_v8  ;;  %v5187_v41 = vld [vmem:[%s7759_s14 + $0xc8] sm:$0xff]  ;;  %v5196_v56 = vld [vmem:[%s7759_s14 + $0x110] sm:$0xff]  ;;  %v7769_v4 = vld [vmem:[#allocation53_spill] sm:$0xff] }
 0x499   :  { %v6928_v32 = vadd.f32 %v6899_v37, %v2028_v10  ;;  %v1954_v35 = vpop.f32.mrf.mxu2 }
 0x49a   :  { %v1963_v29 = vadd.f32 %v1954_v35, %v1894_v21  ;;  %v7775_v35 = vld [vmem:[#allocation50_spill] sm:$0xff] }
 0x49b   :  { %v2045_v11 = vmax.f32 %v6928_v32, 0.0 }
 0x49d   :  { %5167 = vmatmul.msk.f32.gmra.mxu2 %vm495_vm2, %v2045_v11 }
 0x49e   :  { %v2014_v61 = vpop.f32.mrf.mxu1 }
 0x49f   :  { %v2029_v60 = vadd.f32 %v2014_v61, %v1960_v33 }
 0x4a1   :  { %v6941_v20 = vadd.f32 %v6899_v37, %v2029_v60  ;;  %v5448_v60 = vld [vmem:[#allocation19] ss:$0 sm:$0xff] }
 0x4a2   :  { %v7046_v1 = vadd.f32 %v5448_v60, %v6751_v49  ;;  %v7053_v40 = vadd.f32 %v5448_v60, %v6742_v22  ;;  %v5204_v22 = vld [vmem:[%s7759_s14 + $0x150] sm:$0xff]  ;;  %v7069_v25 = vadd.f32 %v5448_v60, %v7769_v4  ;;  %v7075_v45 = vadd.f32 %v5448_v60, %v7771_v13 }
 0x4a3   :  { %v2046_v55 = vmax.f32 %v6941_v20, 0.0  ;;  %v7091_v21 = vadd.f32 %v5448_v60, %v7775_v35  ;;  %v5208_v20 = vld [vmem:[%s7759_s14 + $0x170] sm:$0xff] }
 0x4a4   :  { %7770 = vst [vmem:[#allocation53_spill] sm:$0xff] %v7069_v25 }
 0x4a5   :  { %5168 = vmatmul.msk.f32.gmra.mxu2 %vm495_vm2, %v2046_v55  ;;  %7772 = vst [vmem:[#allocation52_spill] sm:$0xff] %v7075_v45 }
 0x4a6   :  { %v2017_v16 = vpop.f32.mrf.mxu1  ;;  %7776 = vst [vmem:[#allocation50_spill] sm:$0xff] %v7091_v21 }
 0x4a7   :  { %v2030_v26 = vadd.f32 %v2017_v16, %v1961_v53  ;;  %v7767_v16 = vld [vmem:[#allocation54_spill] sm:$0xff] }
 0x4a8   :  { %v7059_v18 = vadd.f32 %v5448_v60, %v7767_v16 }
 0x4a9   :  { %v6955_v42 = vadd.f32 %v6899_v37, %v2030_v26 }
 0x4aa   :  { %7768 = vst [vmem:[#allocation54_spill] sm:$0xff] %v7059_v18 }
 0x4ab   :  { %v2047_v44 = vmax.f32 %v6955_v42, 0.0 }
 0x4ad   :  { %5169 = vmatmul.msk.f32.gmra.mxu2 %vm495_vm2, %v2047_v44 }
 0x4ae   :  { %v2020_v39 = vpop.f32.mrf.mxu1 }
 0x4af   :  { %v2031_v5 = vadd.f32 %v2020_v39, %v1962_v27  ;;  %v5205_v39 = vld [vmem:[%s7759_s14 + $0x158] sm:$0xff] }
 0x4b1   :  { %v6967_v34 = vadd.f32 %v6899_v37, %v2031_v5  ;;  %v7085_v5 = vadd.f32 %v5448_v60, %v7773_v31 }
 0x4b3   :  { %v2048_v46 = vmax.f32 %v6967_v34, 0.0  ;;  %7774 = vst [vmem:[#allocation51_spill] sm:$0xff] %v7085_v5 }
 0x4b5   :  { %5170 = vmatmul.msk.f32.gmra.mxu2 %vm495_vm2, %v2048_v46 }
 0x4b6   :  { %v2023_v28 = vpop.f32.mrf.mxu1 }
 0x4b7   :  { %v2032_v63 = vadd.f32 %v2023_v28, %v1963_v29  ;;  %v5447_v29 = vld [vmem:[#allocation16] ss:$0 sm:$0xff] }
 0x4b9   :  { %v6975_v51 = vadd.f32 %v6899_v37, %v2032_v63  ;;  %v5189_v37 = vld [vmem:[%s7759_s14 + $0xd8] sm:$0xff] }
 0x4bb   :  { %v2049_v43 = vmax.f32 %v6975_v51, 0.0  ;;  %v7779_v51 = vld [vmem:[#allocation49_spill] sm:$0xff] }
 0x4bd   :  { %5171 = vmatmul.msk.f32.gmra.mxu2 %vm495_vm2, %v2049_v43 }
 0x4c5   :  { %5213 = vmatmul.msk.f32.vlgmr.msrb.gmra.mxu2 %vm623_vm1, %v5187_v41  ;;  %v5206_v41 = vld [vmem:[%s7759_s14 + $0x160] sm:$0xff] }
 0x4cd   :  { %5214 = vmatmul.msk.f32.gmra.mxu2 %vm623_vm1, %v5188_v62  ;;  %v7777_v62 = vld [vmem:[#allocation48_spill] sm:$0xff] }
 0x4d5   :  { %5215 = vmatmul.msk.f32.gmra.mxu2 %vm623_vm1, %v5189_v37  ;;  %v7102_v37 = vadd.f32 %v5447_v29, %v7777_v62 }
 0x4d7   :  { %7778 = vst [vmem:[#allocation48_spill] sm:$0xff] %v7102_v37 }
 0x4dd   :  { %5216 = vmatmul.msk.f32.gmra.mxu2 %vm623_vm1, %v5190_v0 }
 0x4e5   :  { %5217 = vmatmul.msk.f32.gmra.mxu2 %vm623_vm1, %v5191_v9  ;;  %v5207_v9 = vld [vmem:[%s7759_s14 + $0x168] sm:$0xff] }
 0x4ed   :  { %5218 = vmatmul.msk.f32.gmra.mxu2 %vm623_vm1, %v5192_v57 }
 0x4f5   :  { %5219 = vmatmul.msk.f32.gmra.mxu2 %vm623_vm1, %v5193_v58 }
 0x4fd   :  { %5220 = vmatmul.msk.f32.gmra.mxu2 %vm623_vm1, %v5194_v36 }
 0x505   :  { %5221 = vmatmul.msk.f32.gmra.mxu2 %vm623_vm1, %v5195_v52  ;;  %v7149_v52 = vld [vmem:[#allocation8] ss:$0 sm:$0xff] }
 0x50d   :  { %5222 = vmatmul.msk.f32.gmra.mxu2 %vm623_vm1, %v5196_v56 }
 0x510   :  { %v2088_v14 = vpop.f32.mrf.mxu2 }
 0x511   :  { %v2089_v63 = vadd.f32 %v2088_v14, %v7091_v21 }
 0x515   :  { %5223 = vmatmul.msk.f32.gmra.mxu2 %vm623_vm1, %v5197_v48 }
 0x518   :  { %v2091_v10 = vpop.f32.mrf.mxu2 }
 0x519   :  { %v2092_v8 = vadd.f32 %v2091_v10, %v7085_v5 }
 0x51d   :  { %5224 = vmatmul.msk.f32.gmra.mxu2 %vm623_vm1, %v5198_v59 }
 0x520   :  { %v2094_v38 = vpop.f32.mrf.mxu2 }
 0x521   :  { %v2095_v27 = vadd.f32 %v2094_v38, %v7075_v45 }
 0x525   :  { %5225 = vmatmul.msk.f32.gmra.mxu2 %vm623_vm1, %v5199_v15 }
 0x528   :  { %v2097_v17 = vpop.f32.mrf.mxu2 }
 0x529   :  { %v2098_v23 = vadd.f32 %v2097_v17, %v7069_v25 }
 0x52d   :  { %5226 = vmatmul.msk.f32.gmra.mxu2 %vm623_vm1, %v5200_v30 }
 0x530   :  { %v2100_v33 = vpop.f32.mrf.mxu2 }
 0x531   :  { %v2101_v26 = vadd.f32 %v2100_v33, %v7059_v18 }
 0x535   :  { %5227 = vmatmul.msk.f32.gmra.mxu2 %vm623_vm1, %v5201_v6 }
 0x538   :  { %v2103_v61 = vpop.f32.mrf.mxu2 }
 0x539   :  { %v2104_v53 = vadd.f32 %v2103_v61, %v7053_v40 }
 0x53d   :  { %5228 = vmatmul.msk.f32.gmra.mxu2 %vm623_vm1, %v5202_v7 }
 0x540   :  { %v2106_v24 = vpop.f32.mrf.mxu2 }
 0x541   :  { %v2107_v3 = vadd.f32 %v2106_v24, %v7046_v1 }
 0x543   :  { %5172 = vmatpush.xpose.msk.msrb.mxu1 %vm495_vm2, %v2107_v3 }
 0x545   :  { %5229 = vmatmul.msk.f32.gmra.mxu2 %vm623_vm1, %v5203_v47 }
 0x547   :  { %5173 = vmatpush.xpose.msk.msrb.mxu1 %vm495_vm2, %v2104_v53 }
 0x548   :  { %v7062_v49 = vpop.f32.mrf.mxu2 }
 0x54b   :  { %5174 = vmatpush.xpose.msk.msrb.mxu1 %vm495_vm2, %v2101_v26 }
 0x54d   :  { %5230 = vmatmul.msk.f32.gmra.mxu2 %vm623_vm1, %v5204_v22 }
 0x54f   :  { %5175 = vmatpush.xpose.msk.msrb.mxu1 %vm495_vm2, %v2098_v23 }
 0x550   :  { %v7078_v54 = vpop.f32.mrf.mxu2 }
 0x553   :  { %5176 = vmatpush.xpose.msk.msrb.mxu1 %vm495_vm2, %v2095_v27 }
 0x555   :  { %5231 = vmatmul.msk.f32.gmra.mxu2 %vm623_vm1, %v5205_v39 }
 0x557   :  { %5177 = vmatpush.xpose.msk.msrb.mxu1 %vm495_vm2, %v2092_v8 }
 0x558   :  { %v7094_v28 = vpop.f32.mrf.mxu2 }
 0x55b   :  { %5178 = vmatpush.xpose.msk.msrb.mxu1 %vm495_vm2, %v2089_v63  ;;  %v2406_v63 = vadd.f32 %v7149_v52, %v7078_v54 }
 0x55d   :  { %5232 = vmatmul.msk.f32.gmra.mxu2 %vm623_vm1, %v5206_v41 }
 0x55e   :  { %5179 = vmatmul.msk.f32.vlgmr.msrb.gmra.mxu1 %vm495_vm2, %v7102_v37 }
 0x55f   :  { %5183 = vmatpush.msk.msra.mxu1 %vm699_vm0, %v2049_v43  ;;  %v7122_v43 = vadd.f32 %v5447_v29, %v7779_v51  ;;  %v2409_v29 = vadd.f32 %v7149_v52, %v7094_v28  ;;  %v2403_v51 = vadd.f32 %v7149_v52, %v7062_v49 }
 0x560   :  { %v7112_v0 = vpop.f32.mrf.mxu2 }
 0x561   :  { %2257 = vmatpush.msra.mxu1 %v2048_v46  ;;  %7780 = vst [vmem:[#allocation49_spill] sm:$0xff] %v7122_v43  ;;  %v2412_v31 = vadd.f32 %v7149_v52, %v7112_v0  ;;  %v2477_v28 = vmax.f32 %v2403_v51, 0.0 }
 0x563   :  { %2258 = vmatpush.msra.mxu1 %v2047_v44  ;;  %v2480_v41 = vmax.f32 %v2412_v31, 0.0 }
 0x565   :  { %2259 = vmatpush.msra.mxu1 %v2046_v55  ;;  %5233 = vmatmul.msk.f32.gmra.mxu2 %vm623_vm1, %v5207_v9 }
 0x566   :  { %5180 = vmatmul.msk.f32.gmra.mxu1 %vm495_vm2, %v7122_v43 }
 0x567   :  { %2260 = vmatpush.msra.mxu1 %v2045_v11  ;;  %v5209_v11 = vld [vmem:[%s7759_s14 + $0x178] sm:$0xff] }
 0x568   :  { %v2414_v42 = vpop.f32.mrf.mxu2 }
 0x569   :  { %2261 = vmatpush.msra.mxu1 %v2044_v50  ;;  %v2415_v13 = vadd.f32 %v7149_v52, %v2414_v42  ;;  %v2479_v42 = vmax.f32 %v2409_v29, 0.0 }
 0x56b   :  { %2262 = vmatpush.msra.mxu1 %v2043_v19  ;;  %v5211_v19 = vld [vmem:[%s7759_s14 + $0x188] sm:$0xf]  ;;  %v2481_v8 = vmax.f32 %v2415_v13, 0.0  ;;  %s7793_s14 = sld [smem:[#allocation67_spill]] }
 0x56d   :  { %5234 = vmatmul.msk.f32.gmra.mxu2 %vm623_vm1, %v5208_v20  ;;  %v2478_v20 = vmax.f32 %v2406_v63, 0.0 }
 0x570   :  { %v2417_v32 = vpop.f32.mrf.mxu2 }
 0x571   :  { %v2418_v4 = vadd.f32 %v7149_v52, %v2417_v32  ;;  %s4967_s13 = sshll.u32 %s7793_s14, 4  ;;  %s4968_s13 = int_to_ptr.hbm [resolvable:$true] %s4967_s13 }
 0x573   :  { %v2482_v39 = vmax.f32 %v2418_v4, 0.0 }
 0x575   :  { %5235 = vmatmul.msk.f32.gmra.mxu2 %vm623_vm1, %v5209_v11 }
 0x578   :  { %v2420_v55 = vpop.f32.mrf.mxu2 }
 0x579   :  { %v2421_v16 = vadd.f32 %v7149_v52, %v2420_v55 }
 0x57b   :  { %v2483_v27 = vmax.f32 %v2421_v16, 0.0 }
 0x57d   :  { %5236 = vmatmul.msk.f32.gmra.mxu2 %vm623_vm1, %v5210_v12 }
 0x580   :  { %v2423_v2 = vpop.f32.mrf.mxu2 }
 0x581   :  { %v2424_v47 = vadd.f32 %v7149_v52, %v2423_v2 }
 0x583   :  { %v2484_v23 = vmax.f32 %v2424_v47, 0.0 }
 0x585   :  { %5237 = vmatmul.msk.f32.gmra.mxu2 %vm623_vm1, %v5211_v19 }
 0x588   :  { %v2426_v50 = vpop.f32.mrf.mxu2 }
 0x589   :  { %v2427_v24 = vadd.f32 %v7149_v52, %v2426_v50 }
 0x58b   :  { %v2485_v26 = vmax.f32 %v2427_v24, 0.0 }
 0x590   :  { %v2429_v44 = vpop.f32.mrf.mxu2 }
 0x591   :  { %v2430_v7 = vadd.f32 %v7149_v52, %v2429_v44 }
 0x593   :  { %v2486_v53 = vmax.f32 %v2430_v7, 0.0 }
 0x598   :  { %v2432_v34 = vpop.f32.mrf.mxu2 }
 0x599   :  { %v2433_v33 = vadd.f32 %v7149_v52, %v2432_v34 }
 0x59b   :  { %v2487_v3 = vmax.f32 %v2433_v33, 0.0 }
 0x5a0   :  { %v2435_v46 = vpop.f32.mrf.mxu2 }
 0x5a1   :  { %v2436_v17 = vadd.f32 %v7149_v52, %v2435_v46 }
 0x5a3   :  { %v2488_v60 = vmax.f32 %v2436_v17, 0.0 }
 0x5a8   :  { %v2438_v57 = vpop.f32.mrf.mxu2 }
 0x5a9   :  { %v2439_v59 = vadd.f32 %v7149_v52, %v2438_v57 }
 0x5ab   :  { %v2489_v6 = vmax.f32 %v2439_v59, 0.0 }
 0x5b0   :  { %v2441_v58 = vpop.f32.mrf.mxu2 }
 0x5b1   :  { %v2442_v48 = vadd.f32 %v7149_v52, %v2441_v58 }
 0x5b3   :  { %v2490_v30 = vmax.f32 %v2442_v48, 0.0 }
 0x5b8   :  { %v2444_v36 = vpop.f32.mrf.mxu2 }
 0x5b9   :  { %v2445_v56 = vadd.f32 %v7149_v52, %v2444_v36 }
 0x5bb   :  { %v2491_v38 = vmax.f32 %v2445_v56, 0.0 }
 0x5c0   :  { %v2447_v14 = vpop.f32.mrf.mxu2 }
 0x5c1   :  { %v2448_v10 = vadd.f32 %v7149_v52, %v2447_v14 }
 0x5c3   :  { %v2492_v15 = vmax.f32 %v2448_v10, 0.0 }
 0x5c5   :  { %2505 = vmatpush.msrb.mxu1 %v2492_v15 }
 0x5c7   :  { %2506 = vmatpush.msrb.mxu1 %v2491_v38 }
 0x5c8   :  { %v7157_v61 = vpop.f32.mrf.mxu2 }
 0x5c9   :  { %2507 = vmatpush.msrb.mxu1 %v2490_v30 }
 0x5cb   :  { %2508 = vmatpush.msrb.mxu1 %v2489_v6 }
 0x5cd   :  { %2509 = vmatpush.msrb.mxu1 %v2488_v60 }
 0x5cf   :  { %2510 = vmatpush.msrb.mxu1 %v2487_v3 }
 0x5d0   :  { %v7163_v22 = vpop.f32.mrf.mxu2 }
 0x5d1   :  { %2511 = vmatpush.msrb.mxu1 %v2486_v53 }
 0x5d3   :  { %2512 = vmatpush.msrb.mxu1 %v2485_v26 }
 0x5d5   :  { %2513 = vmatpush.msrb.mxu1 %v2484_v23 }
 0x5d7   :  { %2514 = vmatpush.msrb.mxu1 %v2483_v27 }
 0x5d8   :  { %v7169_v35 = vpop.f32.mrf.mxu2 }
 0x5d9   :  { %2515 = vmatpush.msrb.mxu1 %v2482_v39 }
 0x5db   :  { %v2153_v62 = vpop.f32.mrf.mxu1  ;;  %2516 = vmatpush.msrb.mxu1 %v2481_v8 }
 0x5dc   :  { %v5181_v9 = vmul.f32 -0.17677669, %v2153_v62 }
 0x5dd   :  { %2517 = vmatpush.msrb.mxu1 %v2480_v41 }
 0x5de   :  { %v2163_v0 = vmul.f32 1.442695, %v5181_v9  ;;  %v2457_v9 = vadd.f32 %v7149_v52, %v7169_v35  ;;  %v5496_v35 = vld [vmem:[#allocation2 + $0x18] sm:$0xff] }
 0x5df   :  { %2518 = vmatpush.msrb.mxu1 %v2479_v42  ;;  %v2454_v42 = vadd.f32 %v7149_v52, %v7163_v22  ;;  %v5497_v22 = vld [vmem:[#allocation2 + $0x28] sm:$0xff] }
 0x5e0   :  { %5452 = vpow2.f32 %v2163_v0  ;;  %v7177_v32 = vpop.f32.mrf.mxu2 }
 0x5e1   :  { %2519 = vmatpush.msrb.mxu1 %v2478_v20  ;;  %v2460_v41 = vadd.f32 %v7149_v52, %v7177_v32  ;;  %v2451_v20 = vadd.f32 %v7149_v52, %v7157_v61  ;;  %v5500_v61 = vld [vmem:[#allocation2 + $0x58] sm:$0xff] }
 0x5e3   :  { %v2156_v11 = vpop.f32.mrf.mxu1  ;;  %2520 = vmatpush.msrb.mxu1 %v2477_v28  ;;  %v2496_v0 = vmax.f32 %v2460_v41, 0.0  ;;  %v2495_v28 = vmax.f32 %v2457_v9, 0.0  ;;  %v2493_v32 = vmax.f32 %v2451_v20, 0.0  ;;  %v5513_v41 = vld [vmem:[#allocation2 + $0x108] sm:$0xff]  ;;  %v5515_v9 = vld [vmem:[#allocation2 + $0x118] sm:$0xff]  ;;  %v5520_v20 = vld [vmem:[#allocation2 + $0x50] sm:$0xff] }
 0x5e4   :  { %v5182_v54 = vmul.f32 -0.17677669, %v2156_v11  ;;  %v2494_v11 = vmax.f32 %v2454_v42, 0.0  ;;  %v5518_v42 = vld [vmem:[#allocation2 + $0x40] sm:$0xff] }
 0x5e6   :  { %v5453_v55 = vpop.eup %5452  ;;  %v2165_v12 = vmul.f32 1.442695, %v5182_v54  ;;  %v5495_v54 = vld [vmem:[#allocation2 + $0x8] sm:$0xff] }
 0x5e7   :  { %v2167_v2 = vadd.f32 1.0, %v5453_v55  ;;  %v5498_v55 = vld [vmem:[#allocation2 + $0x38] sm:$0xff] }
 0x5e8   :  { %5454 = vpow2.f32 %v2165_v12  ;;  %v2462_v19 = vpop.f32.mrf.mxu2  ;;  %v5501_v12 = vld [vmem:[#allocation2 + $0x68] sm:$0xff] }
 0x5e9   :  { %5456 = vrcp.f32 %v2167_v2  ;;  %v2180_v58 = vand.u32 2147483648, %v2167_v2  ;;  %v2178_v56 = vand.u32 2147483647, %v2167_v2  ;;  %vm2174_vm7 = vweird.f32 %v2167_v2 }
 0x5ea   :  { %v2463_v29 = vadd.f32 %v7149_v52, %v2462_v19  ;;  %v5503_v19 = vld [vmem:[#allocation2 + $0x88] sm:$0xff] }
 0x5eb   :  { %v2181_v10 = vor.u32 1.1754944e-38, %v2180_v58  ;;  %vm2179_vm10 = vcmp.eq.f32.partialorder %v2178_v56, 8.507059e+37 }
 0x5ec   :  { %v2497_v51 = vmax.f32 %v2463_v29, 0.0  ;;  %v5511_v29 = vld [vmem:[#allocation2 + $0xf8] sm:$0xff] }
 0x5ee   :  { %v5455_v49 = vpop.eup %5454 }
 0x5ef   :  { %v5457_v50 = vpop.eup %5456  ;;  %v2168_v44 = vadd.f32 1.0, %v5455_v49  ;;  %v5504_v49 = vld [vmem:[#allocation2 + $0x98] sm:$0xff] }
 0x5f0   :  { %v2465_v34 = vpop.f32.mrf.mxu2  ;;  %v2170_v46 = vmul.f32 %v5457_v50, %v2167_v2  ;;  %vm2175_vm6 = vweird.f32 %v5457_v50  ;;  %v5502_v2 = vld [vmem:[#allocation2 + $0x78] sm:$0xff] }
 0x5f1   :  { %5458 = vrcp.f32 %v2168_v44  ;;  %vm2176_vm8 = vmor %vm2174_vm7, %vm2175_vm6  ;;  %v2195_v6 = vand.u32 2147483648, %v2168_v44  ;;  %v2193_v60 = vand.u32 2147483647, %v2168_v44  ;;  %vm2189_vm12 = vweird.f32 %v2168_v44 }
 0x5f2   :  { %v2171_v57 = vsub.f32 1.0, %v2170_v46  ;;  %v2466_v39 = vadd.f32 %v7149_v52, %v2465_v34 }
 0x5f3   :  { %v2196_v3 = vor.u32 1.1754944e-38, %v2195_v6  ;;  %vm2194_vm15 = vcmp.eq.f32.partialorder %v2193_v60, 8.507059e+37 }
 0x5f4   :  { %v2172_v36 = vmul.f32 %v5457_v50, %v2171_v57  ;;  %v2498_v62 = vmax.f32 %v2466_v39, 0.0  ;;  %v5506_v57 = vld [vmem:[#allocation2 + $0xb8] sm:$0xff] }
 0x5f6   :  { %v2173_v14 = vadd.f32 %v5457_v50, %v2172_v36 }
 0x5f7   :  { %v5459_v48 = vpop.eup %5458 }
 0x5f8   :  { %v2468_v59 = vpop.f32.mrf.mxu2  ;;  %v2177_v38 = vsel %vm2176_vm8, %v5457_v50, %v2173_v14  ;;  %v2185_v15 = vmul.f32 %v5459_v48, %v2168_v44  ;;  %vm2190_vm11 = vweird.f32 %v5459_v48  ;;  %v5505_v44 = vld [vmem:[#allocation2 + $0xa8] sm:$0xff] }
 0x5f9   :  { %v7179_v17 = vsel %vm2179_vm10, %v2181_v10, %v2177_v38  ;;  %vm2191_vm13 = vmor %vm2189_vm12, %vm2190_vm11  ;;  %v2469_v13 = vadd.f32 %v7149_v52, %v2468_v59 }
 0x5fa   :  { %v2200_v30 = vsel %vm2199_vm9, %v7179_v17, 0.0  ;;  %2270 = vst.msk [vmem:[%s7722_s23] sm:$0xff] %vm2199_vm9, %v7179_v17  ;;  %v2186_v33 = vsub.f32 1.0, %v2185_v15  ;;  %v5507_v15 = vld [vmem:[#allocation2 + $0xc8] sm:$0xff] }
 0x5fb   :  { %2201 = vadd.xlane.f32.xlu0 %v2200_v30  ;;  %v2499_v63 = vmax.f32 %v2469_v13, 0.0 }
 0x5fc   :  { %v2187_v7 = vmul.f32 %v5459_v48, %v2186_v33 }
 0x5fe   :  { %v2188_v24 = vadd.f32 %v5459_v48, %v2187_v7 }
 0x600   :  { %v2471_v47 = vpop.f32.mrf.mxu2  ;;  %v2192_v53 = vsel %vm2191_vm13, %v5459_v48, %v2188_v24 }
 0x601   :  { %v7188_v16 = vsel %vm2194_vm15, %v2196_v3, %v2192_v53  ;;  %v2472_v4 = vadd.f32 %v7149_v52, %v2471_v47  ;;  %vm2273_vm15 = vcmask 254976  }
 0x602   :  { %v2204_v26 = vsel %vm2203_vm14, %v7188_v16, 0.0  ;;  %2271 = vst.msk [vmem:[%s7722_s23 + $0x8] sm:$0x3] %vm2203_vm14, %v7188_v16 }
 0x603   :  { %2205 = vadd.xlane.f32.xlu0 %v2204_v26  ;;  %v2500_v31 = vmax.f32 %v2472_v4, 0.0 }
 0x608   :  { %v2474_v23 = vpop.f32.mrf.mxu2 }
 0x609   :  { %v2475_v27 = vadd.f32 %v7149_v52, %v2474_v23  ;;  %v5499_v52 = vld [vmem:[#allocation2 + $0x48] sm:$0xff]  ;;  %v5508_v23 = vld [vmem:[#allocation2 + $0xd8] sm:$0xff] }
 0x60b   :  { %v2501_v8 = vmax.f32 %v2475_v27, 0.0 }
 0x60d   :  { %5238 = vmatpush.msk.msra.mxu0 %vm1010_vm3, %v2501_v8  ;;  %v5510_v8 = vld [vmem:[#allocation2] sm:$0xff] }
 0x60f   :  { %2719 = vmatpush.msra.mxu0 %v2500_v31 }
 0x611   :  { %2720 = vmatpush.msra.mxu0 %v2499_v63  ;;  %v5512_v63 = vld [vmem:[#allocation2 + $0x10] sm:$0xff] }
 0x613   :  { %2721 = vmatpush.msra.mxu0 %v2498_v62  ;;  %v5514_v62 = vld [vmem:[#allocation2 + $0x20] sm:$0xff] }
 0x615   :  { %2722 = vmatpush.msra.mxu0 %v2497_v51  ;;  %v5517_v51 = vld [vmem:[#allocation2 + $0x128] sm:$0xff] }
 0x617   :  { %2723 = vmatpush.msra.mxu0 %v2496_v0  ;;  %v5519_v0 = vld [vmem:[#allocation2 + $0x138] sm:$0xff] }
 0x619   :  { %2724 = vmatpush.msra.mxu0 %v2495_v28  ;;  %v5521_v28 = vld [vmem:[#allocation2 + $0x148] sm:$0xff] }
 0x61b   :  { %2725 = vmatpush.msra.mxu0 %v2494_v11  ;;  %v5522_v11 = vld [vmem:[#allocation2 + $0x60] sm:$0xff] }
 0x61d   :  { %2726 = vmatpush.msra.mxu0 %v2493_v32  ;;  %v5523_v32 = vld [vmem:[#allocation2 + $0x158] sm:$0xff] }
 0x61e   :  { %5239 = vmatmul.msk.f32.vlgmr.msra.gmra.mxu0 %vm820_vm4, %v5495_v54  ;;  %v5524_v54 = vld [vmem:[#allocation2 + $0x70] sm:$0xff] }
 0x626   :  { %5240 = vmatmul.msk.f32.gmra.mxu0 %vm820_vm4, %v5496_v35  ;;  %v5525_v35 = vld [vmem:[#allocation2 + $0x168] sm:$0xff] }
 0x62e   :  { %5241 = vmatmul.msk.f32.gmra.mxu0 %vm820_vm4, %v5497_v22  ;;  %v5526_v22 = vld [vmem:[#allocation2 + $0x80] sm:$0xff] }
 0x636   :  { %5242 = vmatmul.msk.f32.gmra.mxu0 %vm820_vm4, %v5498_v55  ;;  %v5527_v55 = vld [vmem:[#allocation2 + $0x178] sm:$0xff] }
 0x63e   :  { %5243 = vmatmul.msk.f32.gmra.mxu0 %vm820_vm4, %v5499_v52  ;;  %v5528_v52 = vld [vmem:[#allocation2 + $0x90] sm:$0xff] }
 0x646   :  { %5244 = vmatmul.msk.f32.gmra.mxu0 %vm820_vm4, %v5500_v61  ;;  %v5529_v61 = vld [vmem:[#allocation2 + $0xa0] sm:$0xff] }
 0x64e   :  { %5245 = vmatmul.msk.f32.gmra.mxu0 %vm820_vm4, %v5501_v12  ;;  %v5530_v12 = vld [vmem:[#allocation2 + $0xb0] sm:$0xff] }
 0x656   :  { %5246 = vmatmul.msk.f32.gmra.mxu0 %vm820_vm4, %v5502_v2 }
 0x65e   :  { %5247 = vmatmul.msk.f32.gmra.mxu0 %vm820_vm4, %v5503_v19  ;;  %v5531_v19 = vld [vmem:[#allocation2 + $0x188] sm:$0xff] }
 0x666   :  { %5248 = vmatmul.msk.f32.gmra.mxu0 %vm820_vm4, %v5504_v49  ;;  %v5532_v49 = vld [vmem:[#allocation2 + $0xc0] sm:$0xff] }
 0x66e   :  { %v7221_v50 = vpop.xlane.xlu0 %2201  ;;  %5249 = vmatmul.msk.f32.gmra.mxu0 %vm820_vm4, %v5505_v44 }
 0x66f   :  { %7781 = vst [vmem:[#allocation55_spill] sm:$0xff] %v7221_v50  ;;  %v2207_v34 = vadd.f32 1e-08, %v7221_v50 }
 0x671   :  { %5460 = vrcp.f32 %v2207_v34  ;;  %v2220_v48 = vand.u32 2147483648, %v2207_v34  ;;  %v2218_v59 = vand.u32 2147483647, %v2207_v34  ;;  %vm2214_vm6 = vweird.f32 %v2207_v34 }
 0x673   :  { %v2221_v33 = vor.u32 1.1754944e-38, %v2220_v48  ;;  %vm2219_vm8 = vcmp.eq.f32.partialorder %v2218_v59, 8.507059e+37  ;;  %v5537_v59 = vld [vmem:[#allocation2 + $0x1b8] sm:$0xff] }
 0x676   :  { %v7225_v46 = vpop.xlane.xlu0 %2205  ;;  %5250 = vmatmul.msk.f32.gmra.mxu0 %vm820_vm4, %v5506_v57  ;;  %v5534_v57 = vld [vmem:[#allocation2 + $0xd0] sm:$0xff] }
 0x677   :  { %7782 = vst [vmem:[#allocation56_spill] sm:$0xff] %v7225_v46  ;;  %v5461_v58 = vpop.eup %5460  ;;  %v2208_v36 = vadd.f32 1e-08, %v7225_v46 }
 0x678   :  { %v2210_v56 = vmul.f32 %v5461_v58, %v2207_v34  ;;  %vm2215_vm1 = vweird.f32 %v5461_v58  ;;  %v5533_v34 = vld [vmem:[#allocation2 + $0x198] sm:$0xff] }
 0x679   :  { %5462 = vrcp.f32 %v2208_v36  ;;  %vm2216_vm7 = vmor %vm2214_vm6, %vm2215_vm1  ;;  %v2235_v47 = vand.u32 2147483648, %v2208_v36  ;;  %v2233_v26 = vand.u32 2147483647, %v2208_v36  ;;  %vm2229_vm11 = vweird.f32 %v2208_v36 }
 0x67a   :  { %v2211_v14 = vsub.f32 1.0, %v2210_v56  ;;  %v5535_v56 = vld [vmem:[#allocation2 + $0x1a8] sm:$0xff] }
 0x67b   :  { %v2236_v13 = vor.u32 1.1754944e-38, %v2235_v47  ;;  %vm2234_vm13 = vcmp.eq.f32.partialorder %v2233_v26, 8.507059e+37  ;;  %v5543_v26 = vld [vmem:[#allocation2 + $0x1e8] sm:$0xff] }
 0x67c   :  { %v2212_v10 = vmul.f32 %v5461_v58, %v2211_v14  ;;  %v5536_v14 = vld [vmem:[#allocation2 + $0xe0] sm:$0xff] }
 0x67e   :  { %v2213_v38 = vadd.f32 %v5461_v58, %v2212_v10  ;;  %5251 = vmatmul.msk.f32.gmra.mxu0 %vm820_vm4, %v5507_v15 }
 0x67f   :  { %v5463_v30 = vpop.eup %5462 }
 0x680   :  { %v2217_v6 = vsel %vm2216_vm7, %v5461_v58, %v2213_v38  ;;  %v2225_v7 = vmul.f32 %v5463_v30, %v2208_v36  ;;  %vm2230_vm10 = vweird.f32 %v5463_v30  ;;  %v5538_v38 = vld [vmem:[#allocation2 + $0xf0] sm:$0xff] }
 0x681   :  { %v2222_v60 = vsel %vm2219_vm8, %v2221_v33, %v2217_v6  ;;  %vm2231_vm12 = vmor %vm2229_vm11, %vm2230_vm10  ;;  %v5539_v33 = vld [vmem:[#allocation2 + $0x1c8] sm:$0xff]  ;;  %v5540_v6 = vld [vmem:[#allocation2 + $0x100] sm:$0xff] }
 0x682   :  { %v2226_v24 = vsub.f32 1.0, %v2225_v7  ;;  %v2223_v3 = vmul.f32 %v2222_v60, %v7179_v17  ;;  %v5509_v17 = vld [vmem:[#allocation2 + $0xe8] sm:$0xff] }
 0x684   :  { %v2227_v53 = vmul.f32 %v5463_v30, %v2226_v24  ;;  %5184 = vmatmul.msk.f32.vlgmr.msra.gmra.mxu1 %vm2199_vm9, %v2223_v3  ;;  %v5541_v24 = vld [vmem:[#allocation2 + $0x1d8] sm:$0xff]  ;;  %v5542_v3 = vld [vmem:[#allocation2 + $0x110] sm:$0xff] }
 0x686   :  { %v2228_v4 = vadd.f32 %v5463_v30, %v2227_v53  ;;  %5252 = vmatmul.msk.f32.gmra.mxu0 %vm820_vm4, %v5508_v23 }
 0x688   :  { %v2232_v27 = vsel %vm2231_vm12, %v5463_v30, %v2228_v4  ;;  %v5544_v4 = vld [vmem:[#allocation2 + $0x120] sm:$0xff] }
 0x689   :  { %v2237_v39 = vsel %vm2234_vm13, %v2236_v13, %v2232_v27  ;;  %v2920_v27 = vld [vmem:[#allocation10 + $0x18] sm:$0xff] }
 0x68a   :  { %v2238_v31 = vmul.f32 %v2237_v39, %v7188_v16  ;;  %v5516_v16 = vld [vmem:[#allocation2 + $0x30] sm:$0xff]  ;;  %v5545_v39 = vld [vmem:[#allocation2 + $0x1f8] sm:$0xff]  ;;  %2956 = vmatpush.msrb.mxu3 %v2920_v27 }
 0x68b   :  { %v5561_v27 = vld [vmem:[#allocation2 + $0x278] sm:$0xff] }
 0x68c   :  { %5185 = vmatmul.msk.f32.gmra.mxu1 %vm2199_vm9, %v2238_v31  ;;  %v2919_v31 = vld [vmem:[#allocation10 + $0x10] sm:$0xff] }
 0x68d   :  { %2957 = vmatpush.msrb.mxu3 %v2919_v31  ;;  %v5562_v31 = vld [vmem:[#allocation2 + $0x1b0] sm:$0xff] }
 0x68e   :  { %5253 = vmatmul.msk.f32.gmra.mxu0 %vm820_vm4, %v5509_v17  ;;  %v5546_v17 = vld [vmem:[#allocation2 + $0x130] sm:$0xff] }
 0x694   :  { %2521 = vmatmul.f32.vlgmr.msrb.gmra.mxu1 %v5510_v8 }
 0x696   :  { %5254 = vmatmul.msk.f32.gmra.mxu0 %vm820_vm4, %v5511_v29 }
 0x69b   :  { %v7245_v2 = vpop.f32.mrf.mxu0 }
 0x69c   :  { %2524 = vmatmul.f32.gmra.mxu1 %v5512_v63  ;;  %v5547_v63 = vld [vmem:[#allocation2 + $0x208] sm:$0xff] }
 0x69e   :  { %5255 = vmatmul.msk.f32.gmra.mxu0 %vm820_vm4, %v5513_v41  ;;  %v5548_v41 = vld [vmem:[#allocation2 + $0x140] sm:$0xff] }
 0x6a3   :  { %v7248_v44 = vpop.f32.mrf.mxu0 }
 0x6a4   :  { %2527 = vmatmul.f32.gmra.mxu1 %v5514_v62 }
 0x6a6   :  { %5256 = vmatmul.msk.f32.gmra.mxu0 %vm820_vm4, %v5515_v9 }
 0x6ab   :  { %v7251_v36 = vpop.f32.mrf.mxu0 }
 0x6ac   :  { %2530 = vmatmul.f32.gmra.mxu1 %v5516_v16  ;;  %v5549_v16 = vld [vmem:[#allocation2 + $0x218] sm:$0xff] }
 0x6ae   :  { %5257 = vmatmul.msk.f32.gmra.mxu0 %vm820_vm4, %v5517_v51  ;;  %v5550_v51 = vld [vmem:[#allocation2 + $0x150] sm:$0xff] }
 0x6b3   :  { %v7258_v10 = vpop.f32.mrf.mxu0 }
 0x6b4   :  { %2533 = vmatmul.f32.gmra.mxu1 %v5518_v42 }
 0x6b6   :  { %5258 = vmatmul.msk.f32.gmra.mxu0 %vm820_vm4, %v5519_v0 }
 0x6bb   :  { %v7267_v30 = vpop.f32.mrf.mxu0 }
 0x6bc   :  { %2536 = vmatmul.f32.gmra.mxu1 %v5520_v20  ;;  %v5551_v20 = vld [vmem:[#allocation2 + $0x228] sm:$0xff] }
 0x6be   :  { %5259 = vmatmul.msk.f32.gmra.mxu0 %vm820_vm4, %v5521_v28  ;;  %v5552_v28 = vld [vmem:[#allocation2 + $0x160] sm:$0xff] }
 0x6c3   :  { %v7272_v60 = vpop.f32.mrf.mxu0 }
 0x6c4   :  { %2539 = vmatmul.f32.gmra.mxu1 %v5522_v11 }
 0x6c6   :  { %5260 = vmatmul.msk.f32.gmra.mxu0 %vm820_vm4, %v5523_v32 }
 0x6cb   :  { %v7277_v53 = vpop.f32.mrf.mxu0 }
 0x6cc   :  { %2542 = vmatmul.f32.gmra.mxu1 %v5524_v54  ;;  %v5553_v54 = vld [vmem:[#allocation2 + $0x238] sm:$0xff] }
 0x6ce   :  { %5261 = vmatmul.msk.f32.gmra.mxu0 %vm820_vm4, %v5525_v35 }
 0x6d3   :  { %v2749_v13 = vpop.f32.mrf.mxu0 }
 0x6d4   :  { %2545 = vmatmul.f32.gmra.mxu1 %v5526_v22  ;;  %v5554_v22 = vld [vmem:[#allocation2 + $0x170] sm:$0xff] }
 0x6d6   :  { %5262 = vmatmul.msk.f32.gmra.mxu0 %vm820_vm4, %v5527_v55 }
 0x6db   :  { %v2752_v29 = vpop.f32.mrf.mxu0 }
 0x6dc   :  { %2548 = vmatmul.f32.gmra.mxu1 %v5528_v52 }
 0x6de   :  { %5263 = vmatmul.msk.f32.gmra.mxu0 %vm820_vm4, %v5531_v19  ;;  %v5556_v19 = vld [vmem:[#allocation2 + $0x180] sm:$0xff] }
 0x6e3   :  { %v2755_v9 = vpop.f32.mrf.mxu0 }
 0x6e4   :  { %2551 = vmatmul.f32.gmra.mxu1 %v5529_v61  ;;  %v5555_v61 = vld [vmem:[#allocation2 + $0x248] sm:$0xff] }
 0x6e6   :  { %5264 = vmatmul.msk.f32.gmra.mxu0 %vm820_vm4, %v5533_v34 }
 0x6eb   :  { %v2758_v0 = vpop.f32.mrf.mxu0 }
 0x6ec   :  { %2554 = vmatmul.f32.gmra.mxu1 %v5530_v12 }
 0x6ee   :  { %5265 = vmatmul.msk.f32.gmra.mxu0 %vm820_vm4, %v5535_v56  ;;  %v5558_v56 = vld [vmem:[#allocation2 + $0x190] sm:$0xff] }
 0x6f3   :  { %v2761_v32 = vpop.f32.mrf.mxu0 }
 0x6f4   :  { %2557 = vmatmul.f32.gmra.mxu1 %v5532_v49 }
 0x6f6   :  { %5266 = vmatmul.msk.f32.gmra.mxu0 %vm820_vm4, %v5537_v59  ;;  %v5559_v59 = vld [vmem:[#allocation2 + $0x268] sm:$0xff] }
 0x6fb   :  { %v2764_v52 = vpop.f32.mrf.mxu0 }
 0x6fc   :  { %2560 = vmatmul.f32.gmra.mxu1 %v5534_v57  ;;  %v5557_v57 = vld [vmem:[#allocation2 + $0x258] sm:$0xff] }
 0x6fe   :  { %5267 = vmatmul.msk.f32.gmra.mxu0 %vm820_vm4, %v5539_v33  ;;  %v3040_v33 = vld [vmem:[#allocation10 + $0x28] sm:$0xff] }
 0x6ff   :  { %3076 = vmatpush.msra.mxu2 %v3040_v33 }
 0x701   :  { %v2264_v58 = vpop.f32.mrf.mxu1 }
 0x702   :  { %2272 = vst.msk [vmem:[%s7723_s24] sm:$0xff] %vm495_vm2, %v2264_v58 }
 0x703   :  { %v2767_v34 = vpop.f32.mrf.mxu0 }
 0x704   :  { %2563 = vmatmul.f32.gmra.mxu1 %v5536_v14 }
 0x706   :  { %5268 = vmatmul.msk.f32.gmra.mxu0 %vm820_vm4, %v5541_v24  ;;  %v2917_v24 = vld [vmem:[#allocation10] sm:$0xff] }
 0x709   :  { %v2267_v48 = vpop.f32.mrf.mxu1 }
 0x70a   :  { %2274 = vst.msk [vmem:[%s7723_s24 + $0x8] sm:$0x3] %vm2273_vm15, %v2267_v48 }
 0x70b   :  { %v2770_v48 = vpop.f32.mrf.mxu0 }
 0x70c   :  { %2566 = vmatmul.f32.gmra.mxu1 %v5538_v38  ;;  %v2918_v38 = vld [vmem:[#allocation10 + $0x8] sm:$0xff] }
 0x70d   :  { %3015 = vmatpush.msra.mxu3 %v2918_v38 }
 0x70e   :  { %5269 = vmatmul.msk.f32.gmra.mxu0 %vm820_vm4, %v5543_v26  ;;  %v5560_v26 = vld [vmem:[#allocation2 + $0x1a0] sm:$0xff] }
 0x70f   :  { %3016 = vmatpush.msra.mxu3 %v2917_v24 }
 0x711   :  { %v7265_v15 = vpop.f32.mrf.mxu1 }
 0x714   :  { %2569 = vmatmul.f32.gmra.mxu1 %v5540_v6 }
 0x716   :  { %5270 = vmatmul.msk.f32.gmra.mxu0 %vm820_vm4, %v5545_v39 }
 0x719   :  { %v7270_v7 = vpop.f32.mrf.mxu1 }
 0x71c   :  { %2572 = vmatmul.f32.gmra.mxu1 %v5542_v3  ;;  %v3039_v3 = vld [vmem:[#allocation10 + $0x20] sm:$0xff] }
 0x71d   :  { %3077 = vmatpush.msra.mxu2 %v3039_v3  ;;  %v5575_v3 = vld [vmem:[#allocation2 + $0x2e8] sm:$0xff] }
 0x71e   :  { %5271 = vmatmul.msk.f32.gmra.mxu0 %vm820_vm4, %v5547_v63  ;;  %v5563_v63 = vld [vmem:[#allocation2 + $0x288] sm:$0xff] }
 0x721   :  { %v7275_v47 = vpop.f32.mrf.mxu1 }
 0x724   :  { %2575 = vmatmul.f32.gmra.mxu1 %v5544_v4 }
 0x726   :  { %5272 = vmatmul.msk.f32.gmra.mxu0 %vm820_vm4, %v5549_v16 }
 0x729   :  { %v7280_v23 = vpop.f32.mrf.mxu1 }
 0x72a   :  { %v2738_v38 = vadd.f32 %v7258_v10, %v7280_v23  ;;  %v5576_v10 = vld [vmem:[#allocation2 + $0x220] sm:$0xff] }
 0x72c   :  { %2578 = vmatmul.f32.gmra.mxu1 %v5546_v17 }
 0x72e   :  { %5273 = vmatmul.msk.f32.gmra.mxu0 %vm820_vm4, %v5551_v20 }
 0x731   :  { %v7283_v8 = vpop.f32.mrf.mxu1 }
 0x734   :  { %2581 = vmatmul.f32.gmra.mxu1 %v5548_v41 }
 0x736   :  { %5274 = vmatmul.msk.f32.gmra.mxu0 %vm820_vm4, %v5553_v54  ;;  %v5567_v54 = vld [vmem:[#allocation2 + $0x2a8] sm:$0xff] }
 0x739   :  { %v7286_v62 = vpop.f32.mrf.mxu1 }
 0x73c   :  { %2584 = vmatmul.f32.gmra.mxu1 %v5550_v51 }
 0x73e   :  { %5275 = vmatmul.msk.f32.gmra.mxu0 %vm820_vm4, %v5555_v61 }
 0x741   :  { %v7289_v42 = vpop.f32.mrf.mxu1 }
 0x744   :  { %2587 = vmatmul.f32.gmra.mxu1 %v5552_v28  ;;  %v5566_v28 = vld [vmem:[#allocation2 + $0x1d0] sm:$0xff] }
 0x746   :  { %5276 = vmatmul.msk.f32.gmra.mxu0 %vm820_vm4, %v5557_v57  ;;  %v5571_v57 = vld [vmem:[#allocation2 + $0x2c8] sm:$0xff] }
 0x749   :  { %v2543_v11 = vpop.f32.mrf.mxu1 }
 0x74a   :  { %v2750_v35 = vadd.f32 %v2749_v13, %v2543_v11  ;;  %v2773_v13 = vpop.f32.mrf.mxu0 }
 0x74c   :  { %2590 = vmatmul.f32.gmra.mxu1 %v5554_v22  ;;  %5302 = vmatmul.msk.f32.vlgmr.msrb.gmra.mxu3 %vm1431_vm5, %v2750_v35  ;;  %v2729_v35 = vadd.f32 %v7245_v2, %v7265_v15 }
 0x74e   :  { %5277 = vmatmul.msk.f32.gmra.mxu0 %vm820_vm4, %v5559_v59  ;;  %v3108_v59 = vld [vmem:[#allocation10 + $0x38] sm:$0xff] }
 0x74f   :  { %3144 = vmatpush.msrb.mxu3 %v3108_v59 }
 0x751   :  { %v2546_v55 = vpop.f32.mrf.mxu1 }
 0x752   :  { %v2753_v12 = vadd.f32 %v2752_v29, %v2546_v55  ;;  %v2776_v29 = vpop.f32.mrf.mxu0  ;;  %v5568_v55 = vld [vmem:[#allocation2 + $0x1e0] sm:$0xff] }
 0x754   :  { %2593 = vmatmul.f32.gmra.mxu1 %v5556_v19  ;;  %5303 = vmatmul.msk.f32.gmra.mxu3 %vm1431_vm5, %v2753_v12  ;;  %v5569_v12 = vld [vmem:[#allocation2 + $0x2b8] sm:$0xff]  ;;  %v2732_v19 = vadd.f32 %v7248_v44, %v7270_v7 }
 0x756   :  { %5278 = vmatmul.msk.f32.gmra.mxu0 %vm820_vm4, %v5561_v27  ;;  %v5577_v27 = vld [vmem:[#allocation2 + $0x2f8] sm:$0xff] }
 0x759   :  { %v2549_v49 = vpop.f32.mrf.mxu1 }
 0x75a   :  { %v2756_v58 = vadd.f32 %v2755_v9, %v2549_v49  ;;  %v5564_v9 = vld [vmem:[#allocation2 + $0x1c0] sm:$0xff]  ;;  %v2779_v51 = vpop.f32.mrf.mxu0 }
 0x75c   :  { %2596 = vmatmul.f32.gmra.mxu1 %v5558_v56  ;;  %5304 = vmatmul.msk.f32.gmra.mxu3 %vm1431_vm5, %v2756_v58  ;;  %v2735_v58 = vadd.f32 %v7251_v36, %v7275_v47  ;;  %v5574_v36 = vld [vmem:[#allocation2 + $0x210] sm:$0xff] }
 0x75e   :  { %5279 = vmatmul.msk.f32.gmra.mxu0 %vm820_vm4, %v5563_v63  ;;  %v2747_v63 = vadd.f32 %v7277_v53, %v7289_v42  ;;  %v5583_v53 = vld [vmem:[#allocation2 + $0x328] sm:$0xff] }
 0x761   :  { %v2552_v14 = vpop.f32.mrf.mxu1 }
 0x762   :  { %v2759_v6 = vadd.f32 %v2758_v0, %v2552_v14  ;;  %v5565_v0 = vld [vmem:[#allocation2 + $0x298] sm:$0xff]  ;;  %v5572_v14 = vld [vmem:[#allocation2 + $0x200] sm:$0xff] }
 0x764   :  { %2599 = vmatmul.f32.gmra.mxu1 %v5560_v26  ;;  %5305 = vmatmul.msk.f32.gmra.mxu3 %vm1431_vm5, %v2759_v6  ;;  %v3107_v6 = vld [vmem:[#allocation10 + $0x30] sm:$0xff]  ;;  %v2741_v26 = vadd.f32 %v7267_v30, %v7283_v8 }
 0x765   :  { %3145 = vmatpush.msrb.mxu3 %v3107_v6 }
 0x766   :  { %5280 = vmatmul.msk.f32.gmra.mxu0 %vm820_vm4, %v5565_v0  ;;  %v5582_v0 = vld [vmem:[#allocation2 + $0x250] sm:$0xff] }
 0x769   :  { %v2555_v4 = vpop.f32.mrf.mxu1 }
 0x76a   :  { %v2762_v39 = vadd.f32 %v2761_v32, %v2555_v4  ;;  %v2782_v32 = vpop.f32.mrf.mxu0 }
 0x76c   :  { %2602 = vmatmul.f32.gmra.mxu1 %v5562_v31  ;;  %5306 = vmatmul.msk.f32.gmra.mxu3 %vm1431_vm5, %v2762_v39  ;;  %v2744_v39 = vadd.f32 %v7272_v60, %v7286_v62 }
 0x76e   :  { %5281 = vmatmul.msk.f32.gmra.mxu0 %vm820_vm4, %v5567_v54 }
 0x771   :  { %v2558_v17 = vpop.f32.mrf.mxu1 }
 0x772   :  { %v2765_v41 = vadd.f32 %v2764_v52, %v2558_v17  ;;  %v2785_v61 = vpop.f32.mrf.mxu0  ;;  %v5578_v17 = vld [vmem:[#allocation2 + $0x230] sm:$0xff] }
 0x774   :  { %2605 = vmatmul.f32.gmra.mxu1 %v5564_v9  ;;  %5307 = vmatmul.msk.f32.gmra.mxu3 %vm1431_vm5, %v2765_v41  ;;  %v5580_v9 = vld [vmem:[#allocation2 + $0x240] sm:$0xff] }
 0x776   :  { %5282 = vmatmul.msk.f32.gmra.mxu0 %vm820_vm4, %v5569_v12  ;;  %v3176_v12 = vld [vmem:[#allocation10 + $0x48] sm:$0xff] }
 0x777   :  { %3212 = vmatpush.msrb.mxu2 %v3176_v12 }
 0x779   :  { %v2561_v16 = vpop.f32.mrf.mxu1 }
 0x77a   :  { %v2768_v20 = vadd.f32 %v2767_v34, %v2561_v16  ;;  %v5570_v34 = vld [vmem:[#allocation2 + $0x1f0] sm:$0xff]  ;;  %v2788_v15 = vpop.f32.mrf.mxu0  ;;  %v5581_v16 = vld [vmem:[#allocation2 + $0x318] sm:$0xff] }
 0x77c   :  { %2608 = vmatmul.f32.gmra.mxu1 %v5566_v28  ;;  %5308 = vmatmul.msk.f32.gmra.mxu3 %vm1431_vm5, %v2768_v20 }
 0x77e   :  { %5283 = vmatmul.msk.f32.gmra.mxu0 %vm820_vm4, %v5571_v57 }
 0x781   :  { %v2564_v11 = vpop.f32.mrf.mxu1 }
 0x782   :  { %v2771_v22 = vadd.f32 %v2770_v48, %v2564_v11  ;;  %v2791_v7 = vpop.f32.mrf.mxu0  ;;  %v5573_v48 = vld [vmem:[#allocation2 + $0x2d8] sm:$0xff]  ;;  %v5584_v11 = vld [vmem:[#allocation2 + $0x260] sm:$0xff] }
 0x784   :  { %2611 = vmatmul.f32.gmra.mxu1 %v5568_v55  ;;  %5309 = vmatmul.msk.f32.vlgmr.msra.gmra.mxu3 %vm1431_vm5, %v2729_v35  ;;  %v5585_v35 = vld [vmem:[#allocation2 + $0x338] sm:$0xff]  ;;  %v5586_v55 = vld [vmem:[#allocation2 + $0x270] sm:$0xff] }
 0x785   :  { %5316 = vmatmul.msk.f32.vlgmr.msra.gmra.mxu2 %vm1431_vm5, %v2771_v22 }
 0x786   :  { %5284 = vmatmul.msk.f32.gmra.mxu0 %vm820_vm4, %v5573_v48  ;;  %v5591_v48 = vld [vmem:[#allocation2 + $0x368] sm:$0xff] }
 0x789   :  { %v2567_v52 = vpop.f32.mrf.mxu1 }
 0x78a   :  { %v2774_v49 = vadd.f32 %v2773_v13, %v2567_v52  ;;  %v2794_v24 = vpop.f32.mrf.mxu0 }
 0x78c   :  { %2614 = vmatmul.f32.gmra.mxu1 %v5570_v34  ;;  %5310 = vmatmul.msk.f32.gmra.mxu3 %vm1431_vm5, %v2732_v19  ;;  %v5587_v19 = vld [vmem:[#allocation2 + $0x348] sm:$0xff]  ;;  %v3175_v34 = vld [vmem:[#allocation10 + $0x40] sm:$0xff] }
 0x78d   :  { %5317 = vmatmul.msk.f32.gmra.mxu2 %vm1431_vm5, %v2774_v49 }
 0x78e   :  { %5285 = vmatmul.msk.f32.gmra.mxu0 %vm820_vm4, %v5575_v3  ;;  %3213 = vmatpush.msrb.mxu2 %v3175_v34  ;;  %v5608_v34 = vld [vmem:[#allocation2 + $0x320] sm:$0xff] }
 0x791   :  { %v2570_v2 = vpop.f32.mrf.mxu1 }
 0x792   :  { %v2777_v56 = vadd.f32 %v2776_v29, %v2570_v2  ;;  %v2797_v13 = vpop.f32.mrf.mxu0  ;;  %v5579_v29 = vld [vmem:[#allocation2 + $0x308] sm:$0xff]  ;;  %v5588_v2 = vld [vmem:[#allocation2 + $0x280] sm:$0xff] }
 0x794   :  { %2617 = vmatmul.f32.gmra.mxu1 %v5572_v14  ;;  %5311 = vmatmul.msk.f32.gmra.mxu3 %vm1431_vm5, %v2735_v58  ;;  %v5589_v58 = vld [vmem:[#allocation2 + $0x358] sm:$0xff]  ;;  %v5590_v14 = vld [vmem:[#allocation2 + $0x290] sm:$0xff] }
 0x795   :  { %5318 = vmatmul.msk.f32.gmra.mxu2 %vm1431_vm5, %v2777_v56 }
 0x796   :  { %5286 = vmatmul.msk.f32.gmra.mxu0 %vm820_vm4, %v5577_v27 }
 0x799   :  { %v2573_v44 = vpop.f32.mrf.mxu1 }
 0x79a   :  { %v2780_v33 = vadd.f32 %v2779_v51, %v2573_v44  ;;  %v2800_v8 = vpop.f32.mrf.mxu0 }
 0x79c   :  { %2620 = vmatmul.f32.gmra.mxu1 %v5574_v36  ;;  %5312 = vmatmul.msk.f32.gmra.mxu3 %vm1431_vm5, %v2738_v38  ;;  %v5592_v38 = vld [vmem:[#allocation2 + $0x2a0] sm:$0xff]  ;;  %v5593_v36 = vld [vmem:[#allocation2 + $0x378] sm:$0xff] }
 0x79d   :  { %5319 = vmatmul.msk.f32.gmra.mxu2 %vm1431_vm5, %v2780_v33 }
 0x79e   :  { %5287 = vmatmul.msk.f32.gmra.mxu0 %vm820_vm4, %v5579_v29  ;;  %v5599_v29 = vld [vmem:[#allocation2 + $0x3a8] sm:$0xff] }
 0x7a1   :  { %v2576_v47 = vpop.f32.mrf.mxu1 }
 0x7a2   :  { %v2783_v4 = vadd.f32 %v2782_v32, %v2576_v47  ;;  %v2803_v62 = vpop.f32.mrf.mxu0 }
 0x7a4   :  { %2623 = vmatmul.f32.gmra.mxu1 %v5576_v10  ;;  %5313 = vmatmul.msk.f32.gmra.mxu3 %vm1431_vm5, %v2741_v26 }
 0x7a5   :  { %5320 = vmatmul.msk.f32.gmra.mxu2 %vm1431_vm5, %v2783_v4  ;;  %v5595_v4 = vld [vmem:[#allocation2 + $0x388] sm:$0xff] }
 0x7a6   :  { %5288 = vmatmul.msk.f32.gmra.mxu0 %vm820_vm4, %v5581_v16  ;;  %v5601_v16 = vld [vmem:[#allocation2 + $0x3b8] sm:$0xff] }
 0x7a9   :  { %v2579_v23 = vpop.f32.mrf.mxu1 }
 0x7aa   :  { %v2786_v31 = vadd.f32 %v2785_v61, %v2579_v23  ;;  %v2806_v28 = vpop.f32.mrf.mxu0  ;;  %v5596_v23 = vld [vmem:[#allocation2 + $0x2c0] sm:$0xff] }
 0x7ac   :  { %2626 = vmatmul.f32.gmra.mxu1 %v5578_v17  ;;  %5314 = vmatmul.msk.f32.gmra.mxu3 %vm1431_vm5, %v2744_v39  ;;  %v5597_v39 = vld [vmem:[#allocation2 + $0x398] sm:$0xff]  ;;  %v5598_v17 = vld [vmem:[#allocation2 + $0x2d0] sm:$0xff] }
 0x7ad   :  { %5321 = vmatmul.msk.f32.gmra.mxu2 %vm1431_vm5, %v2786_v31 }
 0x7ae   :  { %5289 = vmatmul.msk.f32.gmra.mxu0 %vm820_vm4, %v5583_v53 }
 0x7b1   :  { %v2582_v30 = vpop.f32.mrf.mxu1 }
 0x7b2   :  { %v2789_v41 = vadd.f32 %v2788_v15, %v2582_v30  ;;  %v2809_v54 = vpop.f32.mrf.mxu0 }
 0x7b4   :  { %2629 = vmatmul.f32.gmra.mxu1 %v5580_v9  ;;  %5315 = vmatmul.msk.f32.gmra.mxu3 %vm1431_vm5, %v2747_v63 }
 0x7b5   :  { %5322 = vmatmul.msk.f32.gmra.mxu2 %vm1431_vm5, %v2789_v41  ;;  %v5600_v41 = vld [vmem:[#allocation2 + $0x2e0] sm:$0xff] }
 0x7b6   :  { %5290 = vmatmul.msk.f32.gmra.mxu0 %vm820_vm4, %v5585_v35 }
 0x7b9   :  { %v2585_v60 = vpop.f32.mrf.mxu1 }
 0x7ba   :  { %v2792_v51 = vadd.f32 %v2791_v7, %v2585_v60  ;;  %v2812_v61 = vpop.f32.mrf.mxu0 }
 0x7bc   :  { %2632 = vmatmul.f32.gmra.mxu1 %v5582_v0  ;;  %5323 = vmatmul.msk.f32.vlgmr.msrb.gmra.mxu3 %vm1431_vm5, %v2792_v51  ;;  %v3243_v0 = vld [vmem:[#allocation10 + $0x50] sm:$0xff] }
 0x7be   :  { %5291 = vmatmul.msk.f32.gmra.mxu0 %vm820_vm4, %v5587_v19  ;;  %v5607_v19 = vld [vmem:[#allocation2 + $0x3e8] sm:$0xff] }
 0x7c1   :  { %v2588_v20 = vpop.f32.mrf.mxu1 }
 0x7c2   :  { %v2795_v42 = vadd.f32 %v2794_v24, %v2588_v20  ;;  %v2815_v57 = vpop.f32.mrf.mxu0  ;;  %v5594_v24 = vld [vmem:[#allocation2 + $0x2b0] sm:$0xff] }
 0x7c3   :  { %v5602_v20 = vld [vmem:[#allocation2 + $0x2f0] sm:$0xff] }
 0x7c4   :  { %2635 = vmatmul.f32.gmra.mxu1 %v5584_v11  ;;  %5324 = vmatmul.msk.f32.gmra.mxu3 %vm1431_vm5, %v2795_v42  ;;  %v5603_v42 = vld [vmem:[#allocation2 + $0x3c8] sm:$0xff] }
 0x7c6   :  { %5292 = vmatmul.msk.f32.gmra.mxu0 %vm820_vm4, %v5589_v58  ;;  %v5609_v58 = vld [vmem:[#allocation2 + $0x330] sm:$0xff] }
 0x7c9   :  { %v2591_v32 = vpop.f32.mrf.mxu1 }
 0x7ca   :  { %v2798_v22 = vadd.f32 %v2797_v13, %v2591_v32  ;;  %v2818_v7 = vpop.f32.mrf.mxu0  ;;  %v5604_v32 = vld [vmem:[#allocation2 + $0x300] sm:$0xff] }
 0x7cc   :  { %2638 = vmatmul.f32.gmra.mxu1 %v5586_v55  ;;  %5325 = vmatmul.msk.f32.gmra.mxu3 %vm1431_vm5, %v2798_v22  ;;  %v5605_v22 = vld [vmem:[#allocation2 + $0x3d8] sm:$0xff] }
 0x7ce   :  { %5293 = vmatmul.msk.f32.gmra.mxu0 %vm820_vm4, %v5591_v48  ;;  %v5610_v48 = vld [vmem:[#allocation2 + $0x340] sm:$0xff] }
 0x7d1   :  { %v2594_v52 = vpop.f32.mrf.mxu1 }
 0x7d2   :  { %v2801_v49 = vadd.f32 %v2800_v8, %v2594_v52  ;;  %v2821_v6 = vpop.f32.mrf.mxu0  ;;  %v5606_v52 = vld [vmem:[#allocation2 + $0x310] sm:$0xff] }
 0x7d4   :  { %2641 = vmatmul.f32.gmra.mxu1 %v5588_v2  ;;  %5326 = vmatmul.msk.f32.gmra.mxu3 %vm1431_vm5, %v2801_v49 }
 0x7d6   :  { %5294 = vmatmul.msk.f32.gmra.mxu0 %vm820_vm4, %v5593_v36 }
 0x7d9   :  { %v2597_v15 = vpop.f32.mrf.mxu1 }
 0x7da   :  { %v2804_v56 = vadd.f32 %v2803_v62, %v2597_v15  ;;  %v2824_v26 = vpop.f32.mrf.mxu0  ;;  %v3244_v62 = vld [vmem:[#allocation10 + $0x58] sm:$0xff] }
 0x7db   :  { %3280 = vmatpush.msra.mxu3 %v3244_v62 }
 0x7dc   :  { %2644 = vmatmul.f32.gmra.mxu1 %v5590_v14  ;;  %5327 = vmatmul.msk.f32.gmra.mxu3 %vm1431_vm5, %v2804_v56 }
 0x7dd   :  { %3281 = vmatpush.msra.mxu3 %v3243_v0 }
 0x7de   :  { %5295 = vmatmul.msk.f32.gmra.mxu0 %vm820_vm4, %v5595_v4  ;;  %v3311_v4 = vld [vmem:[#allocation10 + $0x60] sm:$0xff] }
 0x7e1   :  { %v2600_v44 = vpop.f32.mrf.mxu1 }
 0x7e2   :  { %v2807_v59 = vadd.f32 %v2806_v28, %v2600_v44  ;;  %v2827_v27 = vpop.f32.mrf.mxu0 }
 0x7e4   :  { %2647 = vmatmul.f32.gmra.mxu1 %v5592_v38  ;;  %5328 = vmatmul.msk.f32.gmra.mxu3 %vm1431_vm5, %v2807_v59 }
 0x7e6   :  { %5296 = vmatmul.msk.f32.gmra.mxu0 %vm820_vm4, %v5597_v39 }
 0x7e9   :  { %v2603_v33 = vpop.f32.mrf.mxu1 }
 0x7ea   :  { %v2810_v47 = vadd.f32 %v2809_v54, %v2603_v33  ;;  %v2830_v8 = vpop.f32.mrf.mxu0 }
 0x7ec   :  { %2650 = vmatmul.f32.gmra.mxu1 %v5594_v24  ;;  %5329 = vmatmul.msk.f32.gmra.mxu3 %vm1431_vm5, %v2810_v47 }
 0x7ee   :  { %5297 = vmatmul.msk.f32.gmra.mxu0 %vm820_vm4, %v5599_v29 }
 0x7f1   :  { %v2606_v3 = vpop.f32.mrf.mxu1 }
 0x7f2   :  { %v2813_v10 = vadd.f32 %v2812_v61, %v2606_v3  ;;  %v2833_v60 = vpop.f32.mrf.mxu0  ;;  %v3312_v3 = vld [vmem:[#allocation10 + $0x68] sm:$0xff] }
 0x7f3   :  { %3348 = vmatpush.msra.mxu2 %v3312_v3 }
 0x7f4   :  { %2653 = vmatmul.f32.gmra.mxu1 %v5596_v23  ;;  %5330 = vmatmul.msk.f32.vlgmr.msrb.gmra.mxu2 %vm1431_vm5, %v2813_v10  ;;  %v5612_v10 = vld [vmem:[#allocation2 + $0x360] sm:$0xff] }
 0x7f5   :  { %3349 = vmatpush.msra.mxu2 %v3311_v4 }
 0x7f6   :  { %5298 = vmatmul.msk.f32.gmra.mxu0 %vm820_vm4, %v5601_v16  ;;  %v5615_v16 = vld [vmem:[#allocation2 + $0x390] sm:$0xff] }
 0x7f9   :  { %v2609_v13 = vpop.f32.mrf.mxu1 }
 0x7fa   :  { %v2816_v31 = vadd.f32 %v2815_v57, %v2609_v13  ;;  %v2836_v53 = vpop.f32.mrf.mxu0 }
 0x7fc   :  { %2656 = vmatmul.f32.gmra.mxu1 %v5598_v17  ;;  %5331 = vmatmul.msk.f32.gmra.mxu2 %vm1431_vm5, %v2816_v31  ;;  %v5613_v31 = vld [vmem:[#allocation2 + $0x370] sm:$0xff] }
 0x7fe   :  { %5299 = vmatmul.msk.f32.gmra.mxu0 %vm820_vm4, %v5603_v42 }
 0x801   :  { %v2612_v30 = vpop.f32.mrf.mxu1 }
 0x802   :  { %v2819_v63 = vadd.f32 %v2818_v7, %v2612_v30  ;;  %v2839_v35 = vpop.f32.mrf.mxu0  ;;  %v7370_v7 = vpop.f32.mrf.mxu3 }
 0x804   :  { %2659 = vmatmul.f32.gmra.mxu1 %v5600_v41  ;;  %5332 = vmatmul.msk.f32.gmra.mxu2 %vm1431_vm5, %v2819_v63  ;;  %v5614_v63 = vld [vmem:[#allocation2 + $0x380] sm:$0xff] }
 0x806   :  { %5300 = vmatmul.msk.f32.gmra.mxu0 %vm820_vm4, %v5605_v22 }
 0x808   :  { %v7399_v3 = vpop.f32.mrf.mxu2 }
 0x809   :  { %v2615_v9 = vpop.f32.mrf.mxu1 }
 0x80a   :  { %v2822_v51 = vadd.f32 %v2821_v6, %v2615_v9  ;;  %v2842_v12 = vpop.f32.mrf.mxu0  ;;  %v5611_v6 = vld [vmem:[#allocation2 + $0x350] sm:$0xff]  ;;  %v7373_v36 = vpop.f32.mrf.mxu3 }
 0x80c   :  { %2662 = vmatmul.f32.gmra.mxu1 %v5602_v20  ;;  %5333 = vmatmul.msk.f32.gmra.mxu2 %vm1431_vm5, %v2822_v51 }
 0x80e   :  { %5301 = vmatmul.msk.f32.gmra.mxu0 %vm820_vm4, %v5607_v19 }
 0x811   :  { %v2618_v28 = vpop.f32.mrf.mxu1 }
 0x812   :  { %v2825_v11 = vadd.f32 %v2824_v26, %v2618_v28  ;;  %v2845_v15 = vpop.f32.mrf.mxu0  ;;  %v7377_v23 = vpop.f32.mrf.mxu3  ;;  %v5616_v28 = vld [vmem:[#allocation2 + $0x3a0] sm:$0xff] }
 0x814   :  { %2665 = vmatmul.f32.gmra.mxu1 %v5604_v32  ;;  %5334 = vmatmul.msk.f32.gmra.mxu2 %vm1431_vm5, %v2825_v11 }
 0x819   :  { %v2621_v54 = vpop.f32.mrf.mxu1 }
 0x81a   :  { %v2828_v55 = vadd.f32 %v2827_v27, %v2621_v54  ;;  %v2848_v14 = vpop.f32.mrf.mxu0  ;;  %v7380_v17 = vpop.f32.mrf.mxu3  ;;  %v5617_v54 = vld [vmem:[#allocation2 + $0x3b0] sm:$0xff] }
 0x81c   :  { %2668 = vmatmul.f32.gmra.mxu1 %v5606_v52  ;;  %5335 = vmatmul.msk.f32.gmra.mxu2 %vm1431_vm5, %v2828_v55 }
 0x821   :  { %v2624_v61 = vpop.f32.mrf.mxu1 }
 0x822   :  { %v2831_v49 = vadd.f32 %v2830_v8, %v2624_v61  ;;  %v2851_v38 = vpop.f32.mrf.mxu0  ;;  %v7383_v62 = vpop.f32.mrf.mxu3  ;;  %v5618_v61 = vld [vmem:[#allocation2 + $0x3c0] sm:$0xff] }
 0x824   :  { %2671 = vmatmul.f32.gmra.mxu1 %v5608_v34  ;;  %5336 = vmatmul.msk.f32.gmra.mxu2 %vm1431_vm5, %v2831_v49  ;;  %v3380_v49 = vld [vmem:[#allocation10 + $0x78] sm:$0xff] }
 0x825   :  { %3416 = vmatpush.msrb.mxu3 %v3380_v49 }
 0x829   :  { %v2627_v2 = vpop.f32.mrf.mxu1 }
 0x82a   :  { %v2834_v57 = vadd.f32 %v2833_v60, %v2627_v2  ;;  %v2854_v24 = vpop.f32.mrf.mxu0  ;;  %v3379_v2 = vld [vmem:[#allocation10 + $0x70] sm:$0xff] }
 0x82b   :  { %3417 = vmatpush.msrb.mxu3 %v3379_v2 }
 0x82c   :  { %2674 = vmatmul.f32.gmra.mxu1 %v5609_v58  ;;  %5337 = vmatmul.msk.f32.vlgmr.msra.gmra.mxu3 %vm1431_vm5, %v2834_v57  ;;  %v5620_v58 = vld [vmem:[#allocation17 + $0x18] sm:$0xff] }
 0x82d   :  { %3562 = vmatpush.msra.mxu3 %v5620_v58 }
 0x831   :  { %v2630_v56 = vpop.f32.mrf.mxu1 }
 0x832   :  { %v2837_v44 = vadd.f32 %v2836_v53, %v2630_v56  ;;  %v2857_v27 = vpop.f32.mrf.mxu0  ;;  %v7387_v53 = vpop.f32.mrf.mxu3  ;;  %v5621_v56 = vld [vmem:[#allocation17 + $0x10] sm:$0xff] }
 0x833   :  { %3563 = vmatpush.msra.mxu3 %v5621_v56 }
 0x834   :  { %2677 = vmatmul.f32.gmra.mxu1 %v5610_v48  ;;  %5338 = vmatmul.msk.f32.gmra.mxu3 %vm1431_vm5, %v2837_v44  ;;  %v5622_v48 = vld [vmem:[#allocation17 + $0x8] sm:$0xff] }
 0x835   :  { %3564 = vmatpush.msra.mxu3 %v5622_v48 }
 0x839   :  { %v2633_v59 = vpop.f32.mrf.mxu1 }
 0x83a   :  { %v2840_v33 = vadd.f32 %v2839_v35, %v2633_v59  ;;  %v2860_v8 = vpop.f32.mrf.mxu0  ;;  %v7390_v35 = vpop.f32.mrf.mxu3 }
 0x83c   :  { %2680 = vmatmul.f32.gmra.mxu1 %v5611_v6  ;;  %5339 = vmatmul.msk.f32.gmra.mxu3 %vm1431_vm5, %v2840_v33  ;;  %v5624_v33 = vld [vmem:[#allocation17] sm:$0xff] }
 0x83d   :  { %3565 = vmatpush.msra.mxu3 %v5624_v33 }
 0x841   :  { %v2636_v47 = vpop.f32.mrf.mxu1 }
 0x842   :  { %v2843_v26 = vadd.f32 %v2842_v12, %v2636_v47  ;;  %v2863_v9 = vpop.f32.mrf.mxu0  ;;  %v7393_v12 = vpop.f32.mrf.mxu3 }
 0x844   :  { %2683 = vmatmul.f32.gmra.mxu1 %v5612_v10  ;;  %5340 = vmatmul.msk.f32.gmra.mxu3 %vm1431_vm5, %v2843_v26 }
 0x849   :  { %v2639_v13 = vpop.f32.mrf.mxu1 }
 0x84a   :  { %v2846_v39 = vadd.f32 %v2845_v15, %v2639_v13  ;;  %v2866_v0 = vpop.f32.mrf.mxu0  ;;  %v5619_v15 = vld [vmem:[#allocation2 + $0x3d0] sm:$0xff]  ;;  %v7396_v59 = vpop.f32.mrf.mxu3 }
 0x84b   :  { %v3022_v50 = vadd.f32 %v7396_v59, %v7373_v36 }
 0x84c   :  { %2686 = vmatmul.f32.gmra.mxu1 %v5613_v31  ;;  %5341 = vmatmul.msk.f32.gmra.mxu3 %vm1431_vm5, %v2846_v39 }
 0x851   :  { %v2642_v30 = vpop.f32.mrf.mxu1 }
 0x852   :  { %v2849_v29 = vadd.f32 %v2848_v14, %v2642_v30  ;;  %v2869_v11 = vpop.f32.mrf.mxu0  ;;  %v7402_v26 = vpop.f32.mrf.mxu3 }
 0x854   :  { %2689 = vmatmul.f32.gmra.mxu1 %v5614_v63  ;;  %5342 = vmatmul.msk.f32.gmra.mxu3 %vm1431_vm5, %v2849_v29 }
 0x859   :  { %v2645_v41 = vpop.f32.mrf.mxu1 }
 0x85a   :  { %v2852_v60 = vadd.f32 %v2851_v38, %v2645_v41  ;;  %v2872_v52 = vpop.f32.mrf.mxu0  ;;  %v5623_v38 = vld [vmem:[#allocation2 + $0x3e0] sm:$0xff]  ;;  %v7407_v39 = vpop.f32.mrf.mxu3 }
 0x85c   :  { %2692 = vmatmul.f32.gmra.mxu1 %v5615_v16  ;;  %5343 = vmatmul.msk.f32.gmra.mxu3 %vm1431_vm5, %v2852_v60 }
 0x861   :  { %v2648_v51 = vpop.f32.mrf.mxu1 }
 0x862   :  { %v2855_v20 = vadd.f32 %v2854_v24, %v2648_v51  ;;  %v2875_v57 = vpop.f32.mrf.mxu0  ;;  %v7412_v63 = vpop.f32.mrf.mxu3 }
 0x864   :  { %2695 = vmatmul.f32.gmra.mxu1 %v5616_v28  ;;  %5344 = vmatmul.msk.f32.vlgmr.msra.gmra.mxu2 %vm1431_vm5, %v2855_v20 }
 0x869   :  { %v2651_v42 = vpop.f32.mrf.mxu1 }
 0x86a   :  { %v2858_v32 = vadd.f32 %v2857_v27, %v2651_v42  ;;  %v2878_v6 = vpop.f32.mrf.mxu0  ;;  %v7405_v27 = vpop.f32.mrf.mxu2 }
 0x86b   :  { %v7417_v20 = vpop.f32.mrf.mxu3  ;;  %v3101_v21 = vadd.f32 %v7405_v27, %v3022_v50 }
 0x86c   :  { %2698 = vmatmul.f32.gmra.mxu1 %v5617_v54  ;;  %5345 = vmatmul.msk.f32.gmra.mxu2 %vm1431_vm5, %v2858_v32  ;;  %v3447_v54 = vld [vmem:[#allocation10 + $0x80] sm:$0xff] }
 0x871   :  { %v2654_v22 = vpop.f32.mrf.mxu1 }
 0x872   :  { %v2861_v55 = vadd.f32 %v2860_v8, %v2654_v22  ;;  %v2881_v10 = vpop.f32.mrf.mxu0  ;;  %v7410_v29 = vpop.f32.mrf.mxu2 }
 0x874   :  { %2701 = vmatmul.f32.gmra.mxu1 %v5618_v61  ;;  %5346 = vmatmul.msk.f32.gmra.mxu2 %vm1431_vm5, %v2861_v55  ;;  %v7423_v55 = vpop.f32.mrf.mxu3 }
 0x879   :  { %v2657_v19 = vpop.f32.mrf.mxu1 }
 0x87a   :  { %v2864_v34 = vadd.f32 %v2863_v9, %v2657_v19  ;;  %v2884_v8 = vpop.f32.mrf.mxu0  ;;  %v7415_v16 = vpop.f32.mrf.mxu2 }
 0x87c   :  { %2704 = vmatmul.f32.gmra.mxu1 %v5619_v15  ;;  %5347 = vmatmul.msk.f32.gmra.mxu2 %vm1431_vm5, %v2864_v34  ;;  %v7428_v34 = vpop.f32.mrf.mxu3 }
 0x881   :  { %v2660_v14 = vpop.f32.mrf.mxu1 }
 0x882   :  { %v2867_v44 = vadd.f32 %v2866_v0, %v2660_v14  ;;  %v2887_v60 = vpop.f32.mrf.mxu0  ;;  %v7420_v22 = vpop.f32.mrf.mxu2 }
 0x884   :  { %2707 = vmatmul.f32.gmra.mxu1 %v5623_v38  ;;  %5348 = vmatmul.msk.f32.gmra.mxu2 %vm1431_vm5, %v2867_v44  ;;  %v7433_v56 = vpop.f32.mrf.mxu3 }
 0x885   :  { %v3169_v45 = vadd.f32 %v7433_v56, %v3101_v21 }
 0x889   :  { %v2663_v47 = vpop.f32.mrf.mxu1 }
 0x88a   :  { %v2870_v24 = vadd.f32 %v2869_v11, %v2663_v47  ;;  %v2890_v28 = vpop.f32.mrf.mxu0  ;;  %v3448_v11 = vld [vmem:[#allocation10 + $0x88] sm:$0xff]  ;;  %v7426_v49 = vpop.f32.mrf.mxu2 }
 0x88b   :  { %3484 = vmatpush.msrb.mxu2 %v3448_v11 }
 0x88c   :  { %5349 = vmatmul.msk.f32.gmra.mxu2 %vm1431_vm5, %v2870_v24  ;;  %v7436_v47 = vpop.f32.mrf.mxu3 }
 0x88d   :  { %3485 = vmatpush.msrb.mxu2 %v3447_v54 }
 0x891   :  { %v2666_v4 = vpop.f32.mrf.mxu1 }
 0x892   :  { %v2873_v13 = vadd.f32 %v2872_v52, %v2666_v4  ;;  %v2893_v61 = vpop.f32.mrf.mxu0  ;;  %v7431_v58 = vpop.f32.mrf.mxu2 }
 0x894   :  { %5350 = vmatmul.msk.f32.gmra.mxu2 %vm1431_vm5, %v2873_v13 }
 0x899   :  { %v2669_v31 = vpop.f32.mrf.mxu1 }
 0x89a   :  { %v2876_v30 = vadd.f32 %v2875_v57, %v2669_v31  ;;  %v2896_v57 = vpop.f32.mrf.mxu0  ;;  %v3215_v38 = vpop.f32.mrf.mxu2 }
 0x89b   :  { %v7440_v31 = vpop.f32.mrf.mxu3 }
 0x89c   :  { %5351 = vmatmul.msk.f32.vlgmr.msrb.gmra.mxu3 %vm1431_vm5, %v2876_v30 }
 0x8a1   :  { %v2672_v41 = vpop.f32.mrf.mxu1 }
 0x8a2   :  { %v2879_v9 = vadd.f32 %v2878_v6, %v2672_v41  ;;  %v2899_v48 = vpop.f32.mrf.mxu0  ;;  %v3218_v4 = vpop.f32.mrf.mxu2 }
 0x8a4   :  { %5352 = vmatmul.msk.f32.gmra.mxu3 %vm1431_vm5, %v2879_v9 }
 0x8a9   :  { %v2675_v51 = vpop.f32.mrf.mxu1 }
 0x8aa   :  { %v2882_v0 = vadd.f32 %v2881_v10, %v2675_v51  ;;  %v2902_v24 = vpop.f32.mrf.mxu0  ;;  %v7442_v9 = vpop.f32.mrf.mxu2 }
 0x8ac   :  { %5353 = vmatmul.msk.f32.gmra.mxu3 %vm1431_vm5, %v2882_v0 }
 0x8b1   :  { %v2678_v42 = vpop.f32.mrf.mxu1 }
 0x8b2   :  { %v2885_v32 = vadd.f32 %v2884_v8, %v2678_v42  ;;  %v2905_v8 = vpop.f32.mrf.mxu0  ;;  %v7448_v42 = vpop.f32.mrf.mxu2 }
 0x8b4   :  { %5354 = vmatmul.msk.f32.gmra.mxu3 %vm1431_vm5, %v2885_v32 }
 0x8b9   :  { %v2681_v52 = vpop.f32.mrf.mxu1 }
 0x8ba   :  { %v2888_v19 = vadd.f32 %v2887_v60, %v2681_v52  ;;  %v7445_v60 = vpop.f32.mrf.mxu3 }
 0x8bc   :  { %5355 = vmatmul.msk.f32.gmra.mxu3 %vm1431_vm5, %v2888_v19 }
 0x8c1   :  { %v2684_v2 = vpop.f32.mrf.mxu1 }
 0x8c2   :  { %v2891_v15 = vadd.f32 %v2890_v28, %v2684_v2  ;;  %v2908_v28 = vpop.f32.mrf.mxu0  ;;  %v7450_v11 = vpop.f32.mrf.mxu3 }
 0x8c4   :  { %5356 = vmatmul.msk.f32.gmra.mxu3 %vm1431_vm5, %v2891_v15 }
 0x8c9   :  { %v2687_v14 = vpop.f32.mrf.mxu1 }
 0x8ca   :  { %v2894_v44 = vadd.f32 %v2893_v61, %v2687_v14  ;;  %v2911_v52 = vpop.f32.mrf.mxu0  ;;  %v7453_v61 = vpop.f32.mrf.mxu2 }
 0x8cb   :  { %v7455_v15 = vpop.f32.mrf.mxu3 }
 0x8cc   :  { %5357 = vmatmul.msk.f32.gmra.mxu3 %vm1431_vm5, %v2894_v44 }
 0x8d1   :  { %v2690_v33 = vpop.f32.mrf.mxu1 }
 0x8d2   :  { %v2897_v6 = vadd.f32 %v2896_v57, %v2690_v33  ;;  %v2914_v57 = vpop.f32.mrf.mxu0  ;;  %v7458_v14 = vpop.f32.mrf.mxu2 }
 0x8d3   :  { %v3283_v33 = vpop.f32.mrf.mxu3 }
 0x8d4   :  { %5358 = vmatmul.msk.f32.vlgmr.msrb.gmra.mxu2 %vm1431_vm5, %v2897_v6 }
 0x8d9   :  { %v2693_v10 = vpop.f32.mrf.mxu1 }
 0x8da   :  { %v2900_v13 = vadd.f32 %v2899_v48, %v2693_v10  ;;  %v7461_v6 = vpop.f32.mrf.mxu2 }
 0x8dc   :  { %5359 = vmatmul.msk.f32.gmra.mxu2 %vm1431_vm5, %v2900_v13 }
 0x8e1   :  { %v2696_v30 = vpop.f32.mrf.mxu1 }
 0x8e2   :  { %v2903_v41 = vadd.f32 %v2902_v24, %v2696_v30  ;;  %v3286_v24 = vpop.f32.mrf.mxu3 }
 0x8e4   :  { %5360 = vmatmul.msk.f32.gmra.mxu2 %vm1431_vm5, %v2903_v41 }
 0x8e7   :  { %v3351_v10 = vpop.f32.mrf.mxu2 }
 0x8e9   :  { %v2699_v51 = vpop.f32.mrf.mxu1 }
 0x8ea   :  { %v2906_v0 = vadd.f32 %v2905_v8, %v2699_v51  ;;  %v3289_v13 = vpop.f32.mrf.mxu3 }
 0x8ec   :  { %5361 = vmatmul.msk.f32.gmra.mxu2 %vm1431_vm5, %v2906_v0 }
 0x8ef   :  { %v3354_v30 = vpop.f32.mrf.mxu2 }
 0x8f1   :  { %v2702_v32 = vpop.f32.mrf.mxu1 }
 0x8f2   :  { %v2909_v54 = vadd.f32 %v2908_v28, %v2702_v32  ;;  %v3292_v8 = vpop.f32.mrf.mxu3 }
 0x8f4   :  { %5362 = vmatmul.msk.f32.gmra.mxu2 %vm1431_vm5, %v2909_v54 }
 0x8f7   :  { %v3357_v41 = vpop.f32.mrf.mxu2 }
 0x8f9   :  { %v2705_v19 = vpop.f32.mrf.mxu1 }
 0x8fa   :  { %v2912_v2 = vadd.f32 %v2911_v52, %v2705_v19  ;;  %v7463_v51 = vpop.f32.mrf.mxu3 }
 0x8fc   :  { %5363 = vmatmul.msk.f32.gmra.mxu2 %vm1431_vm5, %v2912_v2  ;;  %v3019_v2 = vadd.f32 %v7393_v12, %v7370_v7  ;;  %v3025_v7 = vadd.f32 %v7402_v26, %v7377_v23  ;;  %v3237_v12 = vadd.f32 %v3218_v4, %v3169_v45 }
 0x8ff   :  { %v3360_v0 = vpop.f32.mrf.mxu2 }
 0x901   :  { %v2708_v44 = vpop.f32.mrf.mxu1 }
 0x902   :  { %v2915_v48 = vadd.f32 %v2914_v57, %v2708_v44  ;;  %v7465_v28 = vpop.f32.mrf.mxu3  ;;  %v3100_v57 = vadd.f32 %v7399_v3, %v3019_v2  ;;  %v7485_v2 = vld [vmem:[#allocation11] ss:$0 sm:$0xff] }
 0x904   :  { %5364 = vmatmul.msk.f32.gmra.mxu2 %vm1431_vm5, %v2915_v48  ;;  %v3168_v44 = vadd.f32 %v7428_v34, %v3100_v57  ;;  %v3305_v34 = vadd.f32 %v3286_v24, %v3237_v12 }
 0x906   :  { %v3236_v46 = vadd.f32 %v3215_v38, %v3168_v44  ;;  %v3373_v50 = vadd.f32 %v3354_v30, %v3305_v34 }
 0x907   :  { %v7467_v32 = vpop.f32.mrf.mxu2 }
 0x908   :  { %v3304_v37 = vadd.f32 %v3283_v33, %v3236_v46  ;;  %v3102_v46 = vadd.f32 %v7410_v29, %v3025_v7 }
 0x90a   :  { %v7469_v54 = vpop.f32.mrf.mxu3  ;;  %v3372_v5 = vadd.f32 %v3351_v10, %v3304_v37 }
 0x90f   :  { %v7471_v52 = vpop.f32.mrf.mxu2 }
 0x917   :  { %v7477_v48 = vpop.f32.mrf.mxu2 }
 0x91f   :  { %v3419_v19 = vpop.f32.mrf.mxu3 }
 0x920   :  { %v3440_v25 = vadd.f32 %v3419_v19, %v3372_v5  ;;  %v3170_v5 = vadd.f32 %v7436_v47, %v3102_v46 }
 0x922   :  { %v3238_v45 = vadd.f32 %v7442_v9, %v3170_v5 }
 0x924   :  { %v3306_v26 = vadd.f32 %v3289_v13, %v3238_v45 }
 0x926   :  { %v3374_v56 = vadd.f32 %v3357_v41, %v3306_v26 }
 0x927   :  { %v3422_v43 = vpop.f32.mrf.mxu3 }
 0x928   :  { %v3441_v21 = vadd.f32 %v3422_v43, %v3373_v50 }
 0x92f   :  { %v3425_v59 = vpop.f32.mrf.mxu3 }
 0x930   :  { %v3442_v4 = vadd.f32 %v3425_v59, %v3374_v56 }
 0x937   :  { %v3428_v38 = vpop.f32.mrf.mxu3 }
 0x957   :  { %v3487_v18 = vpop.f32.mrf.mxu2 }
 0x958   :  { %v3508_v3 = vadd.f32 %v3487_v18, %v3440_v25  ;;  %v3028_v25 = vadd.f32 %v7407_v39, %v7380_v17  ;;  %v3031_v39 = vadd.f32 %v7412_v63, %v7383_v62  ;;  %v3431_v62 = vpop.f32.mrf.mxu3 }
 0x95a   :  { %v7488_v36 = vadd.f32 %v7485_v2, %v3508_v3  ;;  %v3103_v29 = vadd.f32 %v7415_v16, %v3028_v25  ;;  %v3104_v10 = vadd.f32 %v7420_v22, %v3031_v39  ;;  %v7784_v39 = vld [vmem:[#allocation53_spill] sm:$0xff] }
 0x95c   :  { %v3522_v37 = vmax.f32 %v7488_v36, 0.0  ;;  %v3171_v47 = vadd.f32 %v7440_v31, %v3103_v29  ;;  %v3172_v30 = vadd.f32 %v7445_v60, %v3104_v10  ;;  %v7786_v10 = vld [vmem:[#allocation51_spill] sm:$0xff] }
 0x95e   :  { %5365 = vmatmul.msk.f32.vlgmr.msra.gmra.mxu3 %vm495_vm2, %v3522_v37  ;;  %v3239_v9 = vadd.f32 %v7448_v42, %v3171_v47  ;;  %v3034_v42 = vadd.f32 %v7417_v20, %v7387_v53  ;;  %v3037_v53 = vadd.f32 %v7423_v55, %v7390_v35 }
 0x95f   :  { %v3490_v18 = vpop.f32.mrf.mxu2 }
 0x960   :  { %v3509_v23 = vadd.f32 %v3490_v18, %v3441_v21  ;;  %v3307_v24 = vadd.f32 %v3292_v8, %v3239_v9  ;;  %v3240_v8 = vadd.f32 %v7453_v61, %v3172_v30  ;;  %v3105_v57 = vadd.f32 %v7426_v49, %v3034_v42  ;;  %v7788_v30 = vld [vmem:[#allocation48_spill] sm:$0xff] }
 0x962   :  { %v7500_v27 = vadd.f32 %v7485_v2, %v3509_v23  ;;  %v3375_v13 = vadd.f32 %v3360_v0, %v3307_v24  ;;  %v3308_v22 = vadd.f32 %v7463_v51, %v3240_v8  ;;  %v3173_v7 = vadd.f32 %v7450_v11, %v3105_v57  ;;  %v3434_v51 = vpop.f32.mrf.mxu3 }
 0x964   :  { %v3523_v43 = vmax.f32 %v7500_v27, 0.0  ;;  %v3443_v41 = vadd.f32 %v3428_v38, %v3375_v13  ;;  %v3376_v60 = vadd.f32 %v7467_v32, %v3308_v22  ;;  %v3241_v20 = vadd.f32 %v7458_v14, %v3173_v7  ;;  %v7787_v13 = vld [vmem:[#allocation50_spill] sm:$0xff] }
 0x965   :  { %v3106_v32 = vadd.f32 %v7431_v58, %v3037_v53 }
 0x966   :  { %5366 = vmatmul.msk.f32.gmra.mxu3 %vm495_vm2, %v3523_v43  ;;  %v3444_v12 = vadd.f32 %v3431_v62, %v3376_v60  ;;  %v3309_v34 = vadd.f32 %v7465_v28, %v3241_v20 }
 0x967   :  { %v3493_v17 = vpop.f32.mrf.mxu2  ;;  %v3174_v46 = vadd.f32 %v7455_v15, %v3106_v32 }
 0x968   :  { %v3510_v33 = vadd.f32 %v3493_v17, %v3442_v4  ;;  %v3377_v59 = vadd.f32 %v7471_v52, %v3309_v34  ;;  %v7783_v17 = vld [vmem:[#allocation54_spill] sm:$0xff] }
 0x969   :  { %v3242_v35 = vadd.f32 %v7461_v6, %v3174_v46 }
 0x96a   :  { %v7512_v16 = vadd.f32 %v7485_v2, %v3510_v33  ;;  %v3445_v50 = vadd.f32 %v3434_v51, %v3377_v59  ;;  %v3437_v21 = vpop.f32.mrf.mxu3  ;;  %v7785_v33 = vld [vmem:[#allocation52_spill] sm:$0xff] }
 0x96b   :  { %v3310_v14 = vadd.f32 %v7469_v54, %v3242_v35 }
 0x96c   :  { %v3524_v31 = vmax.f32 %v7512_v16, 0.0 }
 0x96d   :  { %v3378_v18 = vadd.f32 %v7477_v48, %v3310_v14 }
 0x96e   :  { %5367 = vmatmul.msk.f32.gmra.mxu3 %vm495_vm2, %v3524_v31 }
 0x96f   :  { %v3496_v63 = vpop.f32.mrf.mxu2  ;;  %v3446_v25 = vadd.f32 %v3437_v21, %v3378_v18 }
 0x970   :  { %v3511_v19 = vadd.f32 %v3496_v63, %v3443_v41  ;;  %v7789_v41 = vld [vmem:[#allocation49_spill] sm:$0xff] }
 0x972   :  { %v3518_v0 = vadd.f32 %v7485_v2, %v3511_v19 }
 0x974   :  { %v3525_v44 = vmax.f32 %v3518_v0, 0.0 }
 0x976   :  { %5368 = vmatmul.msk.f32.gmra.mxu3 %vm495_vm2, %v3525_v44 }
 0x977   :  { %v3499_v3 = vpop.f32.mrf.mxu2 }
 0x978   :  { %v3512_v61 = vadd.f32 %v3499_v3, %v3444_v12 }
 0x97a   :  { %v3519_v49 = vadd.f32 %v7485_v2, %v3512_v61 }
 0x97c   :  { %v3526_v11 = vmax.f32 %v3519_v49, 0.0 }
 0x97e   :  { %5369 = vmatmul.msk.f32.gmra.mxu3 %vm495_vm2, %v3526_v11 }
 0x97f   :  { %v3502_v5 = vpop.f32.mrf.mxu2 }
 0x980   :  { %v3513_v55 = vadd.f32 %v3502_v5, %v3445_v50 }
 0x982   :  { %v3520_v28 = vadd.f32 %v7485_v2, %v3513_v55  ;;  %v2275_v55 = vlaneseq }
 0x984   :  { %v3527_v58 = vmax.f32 %v3520_v28, 0.0  ;;  %v2276_v14 = vand.u32 127, %v2275_v55  ;;  %v6205_v28 = vmov 0.0  }
 0x986   :  { %5370 = vmatmul.msk.f32.gmra.mxu3 %vm495_vm2, %v3527_v58  ;;  %vm3747_vm12 = vcmp.eq.s32.totalorder %v2276_v14, 1  ;;  %vm2277_vm13 = vcmp.eq.s32.totalorder %v2276_v14, 0 }
 0x987   :  { %v3505_v52 = vpop.f32.mrf.mxu2  ;;  %v5390_v21 = vsel %vm3747_vm12, 1.0, %v6205_v28  ;;  %v5186_v18 = vsel %vm2277_vm13, 1.0, %v6205_v28  ;;  %vm3804_vm13 = vcmask 1041408  }
 0x988   :  { %v3514_v15 = vadd.f32 %v3505_v52, %v3446_v25  ;;  %v7790_v25 = vld [vmem:[#allocation56_spill] sm:$0xff] }
 0x989   :  { %v2281_v52 = vmul.f32 %v5186_v18, %v7790_v25  ;;  %v4067_v25 = vld [vmem:[#allocation29 + $0x2d8] sm:$0xff] }
 0x98a   :  { %v3521_v45 = vadd.f32 %v7485_v2, %v3514_v15 }
 0x98c   :  { %v3528_v23 = vmax.f32 %v3521_v45, 0.0 }
 0x98e   :  { %5371 = vmatmul.msk.f32.gmra.mxu3 %vm495_vm2, %v3528_v23 }
 0x9e1   :  { %v3567_v6 = vpop.f32.mrf.mxu3 }
 0x9e9   :  { %v3570_v26 = vpop.f32.mrf.mxu3 }
 0x9f1   :  { %v3573_v29 = vpop.f32.mrf.mxu3 }
 0x9f2   :  { %v3574_v24 = vadd.f32 %v3573_v29, %v7785_v33 }
 0x9f9   :  { %v3576_v54 = vpop.f32.mrf.mxu3 }
 0x9fa   :  { %v3577_v9 = vadd.f32 %v3576_v54, %v7784_v39 }
 0xa01   :  { %v3579_v56 = vpop.f32.mrf.mxu3 }
 0xa02   :  { %v3580_v2 = vadd.f32 %v3579_v56, %v7783_v17  ;;  %v7791_v56 = vld [vmem:[#allocation55_spill] sm:$0xff] }
 0xa09   :  { %v3582_v38 = vpop.f32.mrf.mxu3 }
 0xa0a   :  { %v3583_v4 = vadd.f32 %v3582_v38, %v7053_v40  ;;  %v3568_v40 = vadd.f32 %v3567_v6, %v7787_v13  ;;  %v3755_v6 = vshrl.u32 %v2275_v55, 7  ;;  %v2280_v38 = vmul.f32 %v5186_v18, %v7791_v56  ;;  %v4084_v55 = vld [vmem:[#allocation29 + $0x360] sm:$0xff]  ;;  %v4074_v18 = vld [vmem:[#allocation29 + $0x310] sm:$0xff] }
 0xa0b   :  { %4585 = vmatpush.msrb.mxu0 %v4084_v55  ;;  %v4056_v56 = vld [vmem:[#allocation29 + $0x280] sm:$0xff]  ;;  %v3865_v55 = vld [vmem:[#allocation26 + $0x18] sm:$0xff] }
 0xa11   :  { %v3585_v47 = vpop.f32.mrf.mxu3 }
 0xa12   :  { %v3586_v48 = vadd.f32 %v3585_v47, %v7046_v1  ;;  %v3571_v1 = vadd.f32 %v3570_v26, %v7786_v10 }
 0xa14   :  { %5372 = vmatpush.xpose.msk.msra.mxu2 %vm495_vm2, %v3586_v48 }
 0xa18   :  { %5373 = vmatpush.xpose.msk.msra.mxu2 %vm495_vm2, %v3583_v4 }
 0xa1c   :  { %5374 = vmatpush.xpose.msk.msra.mxu2 %vm495_vm2, %v3580_v2 }
 0xa20   :  { %5375 = vmatpush.xpose.msk.msra.mxu2 %vm495_vm2, %v3577_v9 }
 0xa24   :  { %5376 = vmatpush.xpose.msk.msra.mxu2 %vm495_vm2, %v3574_v24 }
 0xa28   :  { %5377 = vmatpush.xpose.msk.msra.mxu2 %vm495_vm2, %v3571_v1 }
 0xa2c   :  { %5378 = vmatpush.xpose.msk.msra.mxu2 %vm495_vm2, %v3568_v40 }
 0xa2f   :  { %5379 = vmatmul.msk.f32.vlgmr.msra.gmra.mxu2 %vm495_vm2, %v7788_v30 }
 0xa30   :  { %5383 = vmatpush.msk.msrb.mxu2 %vm699_vm0, %v3528_v23 }
 0xa32   :  { %3728 = vmatpush.msrb.mxu2 %v3527_v58 }
 0xa34   :  { %3729 = vmatpush.msrb.mxu2 %v3526_v11 }
 0xa36   :  { %3730 = vmatpush.msrb.mxu2 %v3525_v44 }
 0xa37   :  { %5380 = vmatmul.msk.f32.gmra.mxu2 %vm495_vm2, %v7789_v41 }
 0xa38   :  { %3731 = vmatpush.msrb.mxu2 %v3524_v31 }
 0xa3a   :  { %3732 = vmatpush.msrb.mxu2 %v3523_v43 }
 0xa3c   :  { %3733 = vmatpush.msrb.mxu2 %v3522_v37 }
 0xab2   :  { %v3626_v62 = vpop.f32.mrf.mxu2 }
 0xab3   :  { %v5381_v63 = vmul.f32 -0.17677669, %v3626_v62 }
 0xab5   :  { %v3636_v42 = vmul.f32 1.442695, %v5381_v63 }
 0xab7   :  { %5464 = vpow2.f32 %v3636_v42 }
 0xaba   :  { %v3629_v8 = vpop.f32.mrf.mxu2 }
 0xabb   :  { %v5382_v19 = vmul.f32 -0.17677669, %v3629_v8 }
 0xabd   :  { %v5465_v22 = vpop.eup %5464  ;;  %v3638_v0 = vmul.f32 1.442695, %v5382_v19 }
 0xabe   :  { %v3640_v57 = vadd.f32 1.0, %v5465_v22 }
 0xabf   :  { %5466 = vpow2.f32 %v3638_v0 }
 0xac0   :  { %5468 = vrcp.f32 %v3640_v57  ;;  %v3653_v43 = vand.u32 2147483648, %v3640_v57  ;;  %v3651_v37 = vand.u32 2147483647, %v3640_v57  ;;  %vm3647_vm4 = vweird.f32 %v3640_v57 }
 0xac2   :  { %v3654_v3 = vor.u32 1.1754944e-38, %v3653_v43  ;;  %vm3652_vm6 = vcmp.eq.f32.partialorder %v3651_v37, 8.507059e+37 }
 0xac5   :  { %v5467_v16 = vpop.eup %5466 }
 0xac6   :  { %v5469_v31 = vpop.eup %5468  ;;  %v3641_v60 = vadd.f32 1.0, %v5467_v16 }
 0xac7   :  { %v3643_v44 = vmul.f32 %v5469_v31, %v3640_v57  ;;  %vm3648_vm0 = vweird.f32 %v5469_v31 }
 0xac8   :  { %5470 = vrcp.f32 %v3641_v60  ;;  %vm3649_vm1 = vmor %vm3647_vm4, %vm3648_vm0  ;;  %v3668_v34 = vand.u32 2147483648, %v3641_v60  ;;  %v3666_v32 = vand.u32 2147483647, %v3641_v60  ;;  %vm3662_vm8 = vweird.f32 %v3641_v60 }
 0xac9   :  { %v3644_v27 = vsub.f32 1.0, %v3643_v44  ;;  %vm3759_vm0 = vcmask 15360   ;;  %v3866_v44 = vld [vmem:[#allocation26 + $0x20] sm:$0x3] }
 0xaca   :  { %v3669_v11 = vor.u32 1.1754944e-38, %v3668_v34  ;;  %vm3667_vm11 = vcmp.eq.f32.partialorder %v3666_v32, 8.507059e+37  ;;  %v4291_v34 = vld [vmem:[#allocation29 + $0x9d8] sm:$0xff]  ;;  %v4277_v32 = vld [vmem:[#allocation29 + $0x968] sm:$0xff] }
 0xacb   :  { %v3645_v36 = vmul.f32 %v5469_v31, %v3644_v27  ;;  %v3862_v27 = vld [vmem:[#allocation26] sm:$0xff] }
 0xacd   :  { %v3646_v7 = vadd.f32 %v5469_v31, %v3645_v36  ;;  %v3868_v36 = vld [vmem:[#allocation26 + $0x30] sm:$0x3] }
 0xace   :  { %v5471_v12 = vpop.eup %5470 }
 0xacf   :  { %v3658_v53 = vmul.f32 %v5471_v12, %v3641_v60  ;;  %v3650_v20 = vsel %vm3649_vm1, %v5469_v31, %v3646_v7  ;;  %vm3663_vm7 = vweird.f32 %v5471_v12  ;;  %v3795_v31 = vld [vmem:[#allocation20 + $0x8] sm:$0x3]  ;;  %v3794_v60 = vld [vmem:[#allocation20] sm:$0xff]  ;;  %v3864_v7 = vld [vmem:[#allocation26 + $0x10] sm:$0xff] }
 0xad0   :  { %v7570_v61 = vsel %vm3652_vm6, %v3654_v3, %v3650_v20  ;;  %vm3664_vm10 = vmor %vm3662_vm8, %vm3663_vm7 }
 0xad1   :  { %v3659_v51 = vsub.f32 1.0, %v3658_v53  ;;  %5386 = vst.msk [vmem:[%s7722_s23 + $0x10] sm:$0xff] %vm2199_vm9, %v7570_v61  ;;  %v3672_v35 = vsel %vm2199_vm9, %v7570_v61, 0.0 }
 0xad3   :  { %v3660_v49 = vmul.f32 %v5471_v12, %v3659_v51  ;;  %v4298_v51 = vld [vmem:[#allocation29 + $0xa10] sm:$0xff] }
 0xad5   :  { %v3661_v59 = vadd.f32 %v5471_v12, %v3660_v49  ;;  %v4284_v49 = vld [vmem:[#allocation29 + $0x9a0] sm:$0xff] }
 0xad7   :  { %v3665_v46 = vsel %vm3664_vm10, %v5471_v12, %v3661_v59  ;;  %v4270_v59 = vld [vmem:[#allocation29 + $0x930] sm:$0xff] }
 0xad8   :  { %v7577_v50 = vsel %vm3667_vm11, %v3669_v11, %v3665_v46  ;;  %v4263_v11 = vld [vmem:[#allocation29 + $0x8f8] sm:$0xff]  ;;  %v4256_v46 = vld [vmem:[#allocation29 + $0x8c0] sm:$0xff] }
 0xad9   :  { %v3675_v5 = vsel %vm2203_vm14, %v7577_v50, 0.0  ;;  %5387 = vst.msk [vmem:[%s7722_s23 + $0x18] sm:$0x3] %vm2203_vm14, %v7577_v50  ;;  %vm3756_vm14 = vcmp.eq.s32.totalorder %v3755_v6, %v2276_v14  ;;  %v4081_v14 = vld [vmem:[#allocation29 + $0x348] sm:$0xff]  ;;  %v4063_v6 = vld [vmem:[#allocation29 + $0x2b8] sm:$0xff] }
 0xada   :  { %3676 = vadd.xlane.f32.xlu1 %v3675_v5  ;;  %v5391_v4 = vsel %vm3756_vm14, 1.0, %v6205_v28  ;;  %v4242_v5 = vld [vmem:[#allocation29 + $0x850] sm:$0xff]  ;;  %v4228_v28 = vld [vmem:[#allocation29 + $0x7e0] sm:$0xff]  ;;  %vm4935_vm14 = vcmask 128004  }
 0xae2   :  { %3673 = vadd.xlane.f32.xlu1 %v3672_v35  ;;  %v4235_v35 = vld [vmem:[#allocation29 + $0x818] sm:$0xff] }
 0xb4d   :  { %v3677_v58 = vpop.xlane.xlu1 %3676 }
 0xb4e   :  { %v3679_v15 = vadd.f32 1e-08, %v3677_v58  ;;  %v3751_v45 = vmul.f32 %v5390_v21, %v3677_v58  ;;  %v4221_v58 = vld [vmem:[#allocation29 + $0x7a8] sm:$0xff] }
 0xb50   :  { %v3753_v23 = vadd.f32 %v3751_v45, %v2281_v52  ;;  %5472 = vrcp.f32 %v3679_v15  ;;  %v3706_v42 = vand.u32 2147483648, %v3679_v15  ;;  %vm3700_vm10 = vweird.f32 %v3679_v15  ;;  %v4070_v52 = vld [vmem:[#allocation29 + $0x2f0] sm:$0xff]  ;;  %v4060_v45 = vld [vmem:[#allocation29 + $0x2a0] sm:$0xff] }
 0xb51   :  { %v3704_v19 = vand.u32 2147483647, %v3679_v15 }
 0xb52   :  { %5392 = vmatpush.xpose.msk.msrb.mxu3 %vm3759_vm0, %v3753_v23  ;;  %v3707_v0 = vor.u32 1.1754944e-38, %v3706_v42  ;;  %v4207_v23 = vld [vmem:[#allocation29 + $0x738] sm:$0xff]  ;;  %v3829_v42 = vld [vmem:[#allocation23] sm:$0xff] }
 0xb53   :  { %vm3705_vm12 = vcmp.eq.f32.partialorder %v3704_v19, 8.507059e+37  ;;  %v4014_v19 = vld [vmem:[#allocation29 + $0x130] sm:$0xff] }
 0xb55   :  { %v3674_v26 = vpop.xlane.xlu1 %3673 }
 0xb56   :  { %v3678_v29 = vadd.f32 1e-08, %v3674_v26  ;;  %v3750_v54 = vmul.f32 %v5390_v21, %v3674_v26  ;;  %v5473_v47 = vpop.eup %5472  ;;  %v4077_v21 = vld [vmem:[#allocation29 + $0x328] sm:$0xff] }
 0xb57   :  { %v3696_v17 = vmul.f32 %v5473_v47, %v3679_v15  ;;  %vm3701_vm8 = vweird.f32 %v5473_v47  ;;  %4586 = vmatpush.msrb.mxu0 %v4077_v21  ;;  %v4214_v15 = vld [vmem:[#allocation29 + $0x770] sm:$0xff]  ;;  %v4053_v26 = vld [vmem:[#allocation29 + $0x268] sm:$0xff] }
 0xb58   :  { %5474 = vrcp.f32 %v3678_v29  ;;  %v3752_v48 = vadd.f32 %v3750_v54, %v2280_v38  ;;  %v3691_v24 = vand.u32 2147483648, %v3678_v29  ;;  %v3689_v13 = vand.u32 2147483647, %v3678_v29  ;;  %vm3702_vm11 = vmor %vm3700_vm10, %vm3701_vm8  ;;  %v4306_v54 = vld [vmem:[#allocation29 + $0xa50] sm:$0xff] }
 0xb59   :  { %v3697_v39 = vsub.f32 1.0, %v3696_v17  ;;  %vm3685_vm1 = vweird.f32 %v3678_v29  ;;  %4587 = vmatpush.msrb.mxu0 %v4070_v52  ;;  %v4046_v38 = vld [vmem:[#allocation29 + $0x230] sm:$0xff]  ;;  %v4292_v17 = vld [vmem:[#allocation29 + $0x9e0] sm:$0xff] }
 0xb5a   :  { %5393 = vmatpush.xpose.msk.msrb.mxu3 %vm3759_vm0, %v3752_v48  ;;  %v3692_v30 = vor.u32 1.1754944e-38, %v3691_v24  ;;  %vm3690_vm7 = vcmp.eq.f32.partialorder %v3689_v13, 8.507059e+37  ;;  %v4039_v48 = vld [vmem:[#allocation29 + $0x1f8] sm:$0xff]  ;;  %v4028_v13 = vld [vmem:[#allocation29 + $0x1a0] sm:$0xff]  ;;  %v4186_v52 = vld [vmem:[#allocation29 + $0x690] sm:$0xff] }
 0xb5b   :  { %v3698_v10 = vmul.f32 %v5473_v47, %v3697_v39  ;;  %4588 = vmatpush.msrb.mxu0 %v4063_v6  ;;  %v4042_v39 = vld [vmem:[#allocation29 + $0x210] sm:$0xff]  ;;  %v4035_v24 = vld [vmem:[#allocation29 + $0x1d8] sm:$0xff] }
 0xb5c   :  { %v4194_v6 = vld [vmem:[#allocation29 + $0x6d0] sm:$0xff] }
 0xb5d   :  { %5394 = vmatmul.msk.f32.vlgmr.msrb.gmra.mxu3 %vm3759_vm0, %v5391_v4  ;;  %v3699_v62 = vadd.f32 %v5473_v47, %v3698_v10  ;;  %vm3800_vm0 = vcmask 80896   ;;  %4589 = vmatpush.msrb.mxu0 %v4056_v56  ;;  %v4049_v4 = vld [vmem:[#allocation29 + $0x248] sm:$0xff]  ;;  %v4278_v10 = vld [vmem:[#allocation29 + $0x970] sm:$0xff] }
 0xb5e   :  { %v5475_v2 = vpop.eup %5474  ;;  %5396 = vmatpush.msk.msra.mxu3 %vm3804_vm13, %v3795_v31  ;;  %v4250_v31 = vld [vmem:[#allocation29 + $0x890] sm:$0xff] }
 0xb5f   :  { %v3681_v9 = vmul.f32 %v5475_v2, %v3678_v29  ;;  %vm3686_vm4 = vweird.f32 %v5475_v2  ;;  %v3703_v22 = vsel %vm3702_vm11, %v5473_v47, %v3699_v62  ;;  %v4200_v29 = vld [vmem:[#allocation29 + $0x700] sm:$0xff]  ;;  %v4299_v47 = vld [vmem:[#allocation29 + $0xa18] sm:$0xff]  ;;  %4590 = vmatpush.msrb.mxu0 %v4049_v4  ;;  %v4021_v62 = vld [vmem:[#allocation29 + $0x168] sm:$0xff] }
 0xb60   :  { %vm3687_vm6 = vmor %vm3685_vm1, %vm3686_vm4  ;;  %v3708_v57 = vsel %vm3705_vm12, %v3707_v0, %v3703_v22  ;;  %3823 = vmatpush.msra.mxu3 %v3794_v60  ;;  %v4257_v22 = vld [vmem:[#allocation29 + $0x8c8] sm:$0xff]  ;;  %v3867_v0 = vld [vmem:[#allocation26 + $0x28] sm:$0x3] }
 0xb61   :  { %v3682_v33 = vsub.f32 1.0, %v3681_v9  ;;  %v3709_v16 = vmul.f32 %v3708_v57, %v7577_v50  ;;  %v4249_v50 = vld [vmem:[#allocation29 + $0x888] sm:$0xff]  ;;  %4591 = vmatpush.msrb.mxu0 %v4042_v39  ;;  %v4007_v60 = vld [vmem:[#allocation29 + $0xf8] sm:$0xff]  ;;  %v4300_v39 = vld [vmem:[#allocation29 + $0xa20] sm:$0xff] }
 0xb62   :  { %5400 = vmatpush.msk.msrb.mxu3 %vm3804_vm13, %v3866_v44  ;;  %v4285_v9 = vld [vmem:[#allocation29 + $0x9a8] sm:$0xff]  ;;  %v3990_v44 = vld [vmem:[#allocation29 + $0x70] sm:$0xff]  ;;  %v4307_v4 = vld [vmem:[#allocation29 + $0xa58] sm:$0xff] }
 0xb63   :  { %v3683_v1 = vmul.f32 %v5475_v2, %v3682_v33  ;;  %v4025_v33 = vld [vmem:[#allocation29 + $0x188] sm:$0xff]  ;;  %4592 = vmatpush.msrb.mxu0 %v4035_v24 }
 0xb64   :  { %3907 = vmatpush.msrb.mxu3 %v3862_v27  ;;  %v3863_v57 = vld [vmem:[#allocation26 + $0x8] sm:$0xff]  ;;  %v4243_v27 = vld [vmem:[#allocation29 + $0x858] sm:$0xff] }
 0xb65   :  { %v3684_v40 = vadd.f32 %v5475_v2, %v3683_v1  ;;  %v4018_v1 = vld [vmem:[#allocation29 + $0x150] sm:$0xff]  ;;  %4593 = vmatpush.msrb.mxu0 %v4028_v13  ;;  %v4293_v24 = vld [vmem:[#allocation29 + $0x9e8] sm:$0xff] }
 0xb66   :  { %v4137_v13 = vld [vmem:[#allocation29 + $0x508] sm:$0xff] }
 0xb67   :  { %v3688_v41 = vsel %vm3687_vm6, %v5475_v2, %v3684_v40  ;;  %v4032_v2 = vld [vmem:[#allocation29 + $0x1c0] sm:$0xff]  ;;  %v4271_v40 = vld [vmem:[#allocation29 + $0x938] sm:$0xff]  ;;  %4594 = vmatpush.msrb.mxu0 %v4021_v62  ;;  %v4265_v62 = vld [vmem:[#allocation29 + $0x908] sm:$0xff] }
 0xb68   :  { %v3693_v63 = vsel %vm3690_vm7, %v3692_v30, %v3688_v41  ;;  %v3830_v30 = vld [vmem:[#allocation23 + $0x8] sm:$0x3]  ;;  %v4011_v41 = vld [vmem:[#allocation29 + $0x118] sm:$0xff] }
 0xb69   :  { %v3694_v8 = vmul.f32 %v3693_v63, %v7570_v61  ;;  %v4305_v61 = vld [vmem:[#allocation29 + $0xa48] sm:$0xff]  ;;  %5398 = vmatpush.msk.msra.mxu2 %vm3804_vm13, %v3830_v30  ;;  %v4264_v63 = vld [vmem:[#allocation29 + $0x900] sm:$0xff]  ;;  %4595 = vmatpush.msrb.mxu0 %v4014_v19  ;;  %v4251_v19 = vld [vmem:[#allocation29 + $0x898] sm:$0xff] }
 0xb6a   :  { %4385 = vmatpush.msra.mxu1 %v4305_v61  ;;  %v4222_v61 = vld [vmem:[#allocation29 + $0x7b0] sm:$0xff]  ;;  %v4272_v30 = vld [vmem:[#allocation29 + $0x940] sm:$0xff] }
 0xb6b   :  { %5384 = vmatmul.msk.f32.vlgmr.msrb.gmra.mxu2 %vm2199_vm9, %v3694_v8  ;;  %v4004_v8 = vld [vmem:[#allocation29 + $0xe0] sm:$0xff]  ;;  %4596 = vmatpush.msrb.mxu0 %v4007_v60  ;;  %v4082_v60 = vld [vmem:[#allocation29 + $0x350] sm:$0xff] }
 0xb6c   :  { %4386 = vmatpush.msra.mxu1 %v4298_v51  ;;  %3856 = vmatpush.msra.mxu2 %v3829_v42  ;;  %v3979_v51 = vld [vmem:[#allocation29 + $0x18] sm:$0xff]  ;;  %v4258_v42 = vld [vmem:[#allocation29 + $0x8d0] sm:$0xff] }
 0xb6e   :  { %4387 = vmatpush.msra.mxu1 %v4291_v34  ;;  %5402 = vmatpush.msk.msrb.mxu2 %vm3804_vm13, %v3867_v0  ;;  %v4215_v34 = vld [vmem:[#allocation29 + $0x778] sm:$0xff]  ;;  %v4244_v0 = vld [vmem:[#allocation29 + $0x860] sm:$0xff] }
 0xb70   :  { %4388 = vmatpush.msra.mxu1 %v4284_v49  ;;  %3927 = vmatpush.msrb.mxu2 %v3863_v57  ;;  %v4208_v49 = vld [vmem:[#allocation29 + $0x740] sm:$0xff]  ;;  %v4095_v57 = vld [vmem:[#allocation29 + $0x3b8] sm:$0xff] }
 0xb72   :  { %4389 = vmatpush.msra.mxu1 %v4277_v32  ;;  %v4201_v32 = vld [vmem:[#allocation29 + $0x708] sm:$0xff] }
 0xb73   :  { %5385 = vmatmul.msk.f32.gmra.mxu2 %vm2199_vm9, %v3709_v16  ;;  %vm3792_vm9 = vcmask 74752   ;;  %v3997_v16 = vld [vmem:[#allocation29 + $0xa8] sm:$0xff] }
 0xb74   :  { %4390 = vmatpush.msra.mxu1 %v4270_v59  ;;  %v5450_v59 = vld [vmem:[#allocation22] ss:$0 sm:$0xff] }
 0xb76   :  { %4391 = vmatpush.msra.mxu1 %v4263_v11 }
 0xb78   :  { %4392 = vmatpush.msra.mxu1 %v4256_v46 }
 0xb7a   :  { %4393 = vmatpush.msra.mxu1 %v4249_v50  ;;  %v7620_v50 = vld [vmem:[#allocation28] sm:$0xf] }
 0xb7c   :  { %4394 = vmatpush.msra.mxu1 %v4242_v5 }
 0xb7e   :  { %4395 = vmatpush.msra.mxu1 %v4235_v35  ;;  %v3869_v35 = vld [vmem:[#allocation26 + $0x38] sm:$0x3] }
 0xb80   :  { %4396 = vmatpush.msra.mxu1 %v4228_v28 }
 0xb82   :  { %4397 = vmatpush.msra.mxu1 %v4221_v58 }
 0xb84   :  { %4398 = vmatpush.msra.mxu1 %v4214_v15  ;;  %v4312_v15 = vld [vmem:[#allocation29 + $0xa80] sm:$0xff] }
 0xb86   :  { %4399 = vmatpush.msra.mxu1 %v4207_v23  ;;  %v4179_v23 = vld [vmem:[#allocation29 + $0x658] sm:$0xff] }
 0xb88   :  { %4400 = vmatpush.msra.mxu1 %v4200_v29  ;;  %v4172_v29 = vld [vmem:[#allocation29 + $0x620] sm:$0xff] }
 0xb8a   :  { %4465 = vmatpush.msrb.mxu1 %v4306_v54  ;;  %v4187_v54 = vld [vmem:[#allocation29 + $0x698] sm:$0xff] }
 0xb8c   :  { %4466 = vmatpush.msrb.mxu1 %v4299_v47  ;;  %v4180_v47 = vld [vmem:[#allocation29 + $0x660] sm:$0xff] }
 0xb8e   :  { %4467 = vmatpush.msrb.mxu1 %v4292_v17  ;;  %v4158_v17 = vld [vmem:[#allocation29 + $0x5b0] sm:$0xff] }
 0xb90   :  { %4468 = vmatpush.msrb.mxu1 %v4285_v9  ;;  %v4151_v9 = vld [vmem:[#allocation29 + $0x578] sm:$0xff] }
 0xb92   :  { %4469 = vmatpush.msrb.mxu1 %v4278_v10  ;;  %v4144_v10 = vld [vmem:[#allocation29 + $0x540] sm:$0xff] }
 0xb94   :  { %4470 = vmatpush.msrb.mxu1 %v4271_v40  ;;  %v4130_v40 = vld [vmem:[#allocation29 + $0x4d0] sm:$0xff] }
 0xb96   :  { %4471 = vmatpush.msrb.mxu1 %v4264_v63  ;;  %v4116_v63 = vld [vmem:[#allocation29 + $0x460] sm:$0xff] }
 0xb98   :  { %4472 = vmatpush.msrb.mxu1 %v4257_v22  ;;  %v4102_v22 = vld [vmem:[#allocation29 + $0x3f0] sm:$0xff] }
 0xb9a   :  { %4473 = vmatpush.msrb.mxu1 %v4250_v31  ;;  %v4088_v31 = vld [vmem:[#allocation29 + $0x380] sm:$0xff] }
 0xb9c   :  { %4474 = vmatpush.msrb.mxu1 %v4243_v27  ;;  %v4075_v27 = vld [vmem:[#allocation29 + $0x318] sm:$0xff] }
 0xbe0   :  { %v3786_v43 = vpop.f32.mrf.mxu3 }
 0xbe1   :  { %5476 = vtanh.f32 %v3786_v43  ;;  %v4000_v43 = vld [vmem:[#allocation29 + $0xc0] sm:$0xff] }
 0xbe2   :  { %4597 = vmatpush.msrb.mxu0 %v4000_v43  ;;  %v4223_v43 = vld [vmem:[#allocation29 + $0x7b8] sm:$0xff] }
 0xbe7   :  { %v7599_v37 = vpop.eup %5476 }
 0xbe8   :  { %5397 = vmatmul.msk.f32.vlgmr.msra.gmra.mxu3 %vm3800_vm0, %v7599_v37  ;;  %v5395_v12 = vadd.f32 -0.5, %v7599_v37 }
 0xbe9   :  { %5404 = vmatpush.msk.msra.mxu3 %vm3804_vm13, %v3868_v36  ;;  %v3983_v36 = vld [vmem:[#allocation29 + $0x38] sm:$0xff] }
 0xbea   :  { %v3791_v3 = vmul.f32 2.0, %v5395_v12  ;;  %v3993_v12 = vld [vmem:[#allocation29 + $0x88] sm:$0xff] }
 0xbeb   :  { %3947 = vmatpush.msra.mxu3 %v3864_v7  ;;  %v4236_v7 = vld [vmem:[#allocation29 + $0x820] sm:$0xff]  ;;  %4598 = vmatpush.msrb.mxu0 %v3993_v12  ;;  %v4061_v12 = vld [vmem:[#allocation29 + $0x2a8] sm:$0xff] }
 0xbec   :  { %3793 = vst.msk [vmem:[#allocation32] sm:$0x3] %vm3792_vm9, %v3791_v3  ;;  %v3976_v3 = vld [vmem:[#allocation29] sm:$0xff]  ;;  %4475 = vmatpush.msrb.mxu1 %v4236_v7 }
 0xbed   :  { %v4216_v7 = vld [vmem:[#allocation29 + $0x780] sm:$0xff]  ;;  %4948 = dma.vmem_to_hbm [thread:$0]  %s4944_s1, 32, %s4946_s11, [#allocation4]  }
 0xbee   :  { %v3735_v53 = vpop.f32.mrf.mxu2 }
 0xbef   :  { %5388 = vst.msk [vmem:[%s7723_s24 + $0x10] sm:$0xff] %vm495_vm2, %v3735_v53  ;;  %v4229_v53 = vld [vmem:[#allocation29 + $0x7e8] sm:$0xff]  ;;  %vm4925_vm2 = vcmask 1045508  }
 0xbf0   :  { %5401 = vmatmul.msk.f32.vlgmr.msrb.gmra.mxu3 %vm3800_vm0, %v7599_v37  ;;  %4476 = vmatpush.msrb.mxu1 %v4229_v53  ;;  %v4054_v53 = vld [vmem:[#allocation29 + $0x270] sm:$0xff] }
 0xbf1   :  { %4345 = vmatpush.msrb.mxu3 %v4081_v14  ;;  %v3872_v14 = vperm.slane %v7620_v50, 0 }
 0xbf2   :  { %4477 = vmatpush.msrb.mxu1 %v4222_v61  ;;  %v4085_v61 = vld [vmem:[#allocation29 + $0x368] sm:$0xff] }
 0xbf3   :  { %4346 = vmatpush.msrb.mxu3 %v4074_v18  ;;  %v4193_v18 = vld [vmem:[#allocation29 + $0x6c8] sm:$0xff] }
 0xbf4   :  { %4478 = vmatpush.msrb.mxu1 %v4215_v34  ;;  %v4078_v34 = vld [vmem:[#allocation29 + $0x330] sm:$0xff] }
 0xbf5   :  { %4347 = vmatpush.msrb.mxu3 %v4067_v25  ;;  %v4319_v25 = vld [vmem:[#allocation29 + $0xab8] sm:$0xff] }
 0xbf6   :  { %v3738_v20 = vpop.f32.mrf.mxu2  ;;  %4479 = vmatpush.msrb.mxu1 %v4208_v49  ;;  %v4071_v49 = vld [vmem:[#allocation29 + $0x2f8] sm:$0xff] }
 0xbf7   :  { %5389 = vst.msk [vmem:[%s7723_s24 + $0x18] sm:$0x3] %vm2273_vm15, %v3738_v20  ;;  %4348 = vmatpush.msrb.mxu3 %v4060_v45  ;;  %v3986_v20 = vld [vmem:[#allocation29 + $0x50] sm:$0xff]  ;;  %v3874_v45 = vperm.slane %v7620_v50, 2 }
 0xbf8   :  { %5405 = vmatmul.msk.f32.vlgmr.msra.gmra.mxu3 %vm3800_vm0, %v7599_v37  ;;  %4599 = vmatpush.msrb.mxu0 %v3986_v20  ;;  %v4202_v20 = vld [vmem:[#allocation29 + $0x710] sm:$0xff] }
 0xbf9   :  { %4349 = vmatpush.msrb.mxu3 %v4053_v26  ;;  %4480 = vmatpush.msrb.mxu1 %v4201_v32  ;;  %v4064_v32 = vld [vmem:[#allocation29 + $0x2c0] sm:$0xff] }
 0xbfa   :  { %4600 = vmatpush.msrb.mxu0 %v3979_v51  ;;  %v4047_v51 = vld [vmem:[#allocation29 + $0x238] sm:$0xff] }
 0xbfb   :  { %4350 = vmatpush.msrb.mxu3 %v4046_v38  ;;  %v4165_v38 = vld [vmem:[#allocation29 + $0x5e8] sm:$0xff] }
 0xbfd   :  { %4351 = vmatpush.msrb.mxu3 %v4039_v48 }
 0xbff   :  { %4352 = vmatpush.msrb.mxu3 %v4032_v2  ;;  %v4173_v2 = vld [vmem:[#allocation29 + $0x628] sm:$0xff] }
 0xc01   :  { %4353 = vmatpush.msrb.mxu3 %v4025_v33  ;;  %v4166_v33 = vld [vmem:[#allocation29 + $0x5f0] sm:$0xff] }
 0xc03   :  { %4354 = vmatpush.msrb.mxu3 %v4018_v1  ;;  %v4286_v1 = vld [vmem:[#allocation29 + $0x9b0] sm:$0xff] }
 0xc05   :  { %4355 = vmatpush.msrb.mxu3 %v4011_v41  ;;  %v4123_v41 = vld [vmem:[#allocation29 + $0x498] sm:$0xff] }
 0xc07   :  { %4356 = vmatpush.msrb.mxu3 %v4004_v8  ;;  %v4109_v8 = vld [vmem:[#allocation29 + $0x428] sm:$0xff] }
 0xc09   :  { %4357 = vmatpush.msrb.mxu3 %v3997_v16  ;;  %v4237_v16 = vld [vmem:[#allocation29 + $0x828] sm:$0xff] }
 0xc0b   :  { %4358 = vmatpush.msrb.mxu3 %v3990_v44  ;;  %v4230_v44 = vld [vmem:[#allocation29 + $0x7f0] sm:$0xff] }
 0xc0d   :  { %4359 = vmatpush.msrb.mxu3 %v3983_v36  ;;  %v4068_v36 = vld [vmem:[#allocation29 + $0x2e0] sm:$0xff] }
 0xc0f   :  { %4360 = vmatpush.msrb.mxu3 %v3976_v3  ;;  %v4209_v3 = vld [vmem:[#allocation29 + $0x748] sm:$0xff] }
 0xc11   :  { %4419 = vmatpush.msra.mxu3 %v4319_v25  ;;  %v3987_v25 = vld [vmem:[#allocation29 + $0x58] sm:$0xff] }
 0xc13   :  { %4420 = vmatpush.msra.mxu3 %v4312_v15  ;;  %v4198_v15 = vld [vmem:[#allocation29 + $0x6f0] sm:$0xff] }
 0xc6b   :  { %v3825_v11 = vpop.f32.mrf.mxu3 }
 0xc6c   :  { %v3826_v46 = vadd.f32 %v5450_v59, %v3825_v11  ;;  %v4057_v59 = vld [vmem:[#allocation29 + $0x288] sm:$0xff]  ;;  %v4050_v11 = vld [vmem:[#allocation29 + $0x250] sm:$0xff] }
 0xc6e   :  { %v3828_v5 = vmax.f32 %v3826_v46, 0.0  ;;  %v4043_v46 = vld [vmem:[#allocation29 + $0x218] sm:$0xff] }
 0xc70   :  { %5399 = vmatmul.msk.f32.vlgmr.msra.gmra.mxu2 %vm3800_vm0, %v3828_v5  ;;  %v4036_v5 = vld [vmem:[#allocation29 + $0x1e0] sm:$0xff] }
 0xc71   :  { %5406 = vmatpush.msk.msra.mxu2 %vm3804_vm13, %v3869_v35  ;;  %v4029_v35 = vld [vmem:[#allocation29 + $0x1a8] sm:$0xff] }
 0xc73   :  { %3967 = vmatpush.msra.mxu2 %v3865_v55  ;;  %v3909_v28 = vpop.f32.mrf.mxu3  ;;  %v4022_v55 = vld [vmem:[#allocation29 + $0x170] sm:$0xff] }
 0xc74   :  { %v3910_v21 = vadd.f32 %v3909_v28, %v3872_v14  ;;  %v4015_v14 = vld [vmem:[#allocation29 + $0x138] sm:$0xff]  ;;  %v4008_v28 = vld [vmem:[#allocation29 + $0x100] sm:$0xff] }
 0xc76   :  { %v7625_v58 = vmax.f32 %v3910_v21, 0.0  ;;  %v4001_v21 = vld [vmem:[#allocation29 + $0xc8] sm:$0xff] }
 0xc78   :  { %5403 = vmatmul.msk.f32.vlgmr.msrb.gmra.mxu2 %vm3800_vm0, %v7599_v37  ;;  %4361 = vmatmul.f32.vlgmr.msrb.gmra.mxu3 %v7625_v58 }
 0xc79   :  { %4365 = vmatpush.msrb.mxu2 %v4193_v18  ;;  %4601 = vmatmul.f32.vlgmr.msrb.gmra.mxu0 %v7625_v58  ;;  %v3994_v18 = vld [vmem:[#allocation29 + $0x90] sm:$0xff] }
 0xc7a   :  { %4445 = vmatpush.msrb.mxu3 %v4194_v6  ;;  %v4177_v6 = vld [vmem:[#allocation29 + $0x648] sm:$0xff] }
 0xc7b   :  { %4366 = vmatpush.msrb.mxu2 %v4186_v52  ;;  %v3949_v26 = vpop.f32.mrf.mxu3  ;;  %v3980_v52 = vld [vmem:[#allocation29 + $0x20] sm:$0xff] }
 0xc7c   :  { %v3950_v56 = vadd.f32 %v3949_v26, %v3874_v45  ;;  %4446 = vmatpush.msrb.mxu3 %v4187_v54  ;;  %v4191_v45 = vld [vmem:[#allocation29 + $0x6b8] sm:$0xff]  ;;  %v4170_v26 = vld [vmem:[#allocation29 + $0x610] sm:$0xff] }
 0xc7d   :  { %4367 = vmatpush.msrb.mxu2 %v4179_v23  ;;  %v4184_v23 = vld [vmem:[#allocation29 + $0x680] sm:$0xff]  ;;  %v4322_v54 = vld [vmem:[#allocation29 + $0xad0] sm:$0xff] }
 0xc7e   :  { %v7632_v48 = vmax.f32 %v3950_v56, 0.0  ;;  %4447 = vmatpush.msrb.mxu3 %v4180_v47  ;;  %4659 = vmatpush.msra.mxu0 %v4322_v54  ;;  %v4156_v56 = vld [vmem:[#allocation29 + $0x5a0] sm:$0xff]  ;;  %v4197_v47 = vld [vmem:[#allocation29 + $0x6e8] sm:$0xff] }
 0xc7f   :  { %4368 = vmatpush.msrb.mxu2 %v4172_v29  ;;  %v4163_v29 = vld [vmem:[#allocation29 + $0x5d8] sm:$0xff]  ;;  %v4241_v54 = vld [vmem:[#allocation29 + $0x848] sm:$0xff] }
 0xc80   :  { %5407 = vmatmul.msk.f32.vlgmr.msra.gmra.mxu2 %vm3800_vm0, %v7599_v37  ;;  %4401 = vmatmul.f32.vlgmr.msra.gmra.mxu1 %v7632_v48  ;;  %v4279_v37 = vld [vmem:[#allocation29 + $0x978] sm:$0xff] }
 0xc81   :  { %4369 = vmatpush.msrb.mxu2 %v4165_v38  ;;  %4448 = vmatpush.msrb.mxu3 %v4173_v2  ;;  %v4315_v38 = vld [vmem:[#allocation29 + $0xa98] sm:$0xff]  ;;  %v4142_v2 = vld [vmem:[#allocation29 + $0x530] sm:$0xff] }
 0xc82   :  { %4545 = vmatpush.msra.mxu1 %v4307_v4  ;;  %4660 = vmatpush.msra.mxu0 %v4315_v38  ;;  %v4149_v4 = vld [vmem:[#allocation29 + $0x568] sm:$0xff]  ;;  %v4234_v38 = vld [vmem:[#allocation29 + $0x810] sm:$0xff] }
 0xc83   :  { %4370 = vmatpush.msrb.mxu2 %v4158_v17  ;;  %4449 = vmatpush.msrb.mxu3 %v4166_v33  ;;  %v4190_v17 = vld [vmem:[#allocation29 + $0x6b0] sm:$0xff]  ;;  %v4176_v33 = vld [vmem:[#allocation29 + $0x640] sm:$0xff] }
 0xc84   :  { %4546 = vmatpush.msra.mxu1 %v4300_v39  ;;  %4685 = vmatpush.msrb.mxu0 %v4197_v47  ;;  %v4183_v39 = vld [vmem:[#allocation29 + $0x678] sm:$0xff] }
 0xc85   :  { %4371 = vmatpush.msrb.mxu2 %v4151_v9  ;;  %v4135_v9 = vld [vmem:[#allocation29 + $0x4f8] sm:$0xff] }
 0xc86   :  { %4547 = vmatpush.msra.mxu1 %v4293_v24  ;;  %4686 = vmatpush.msrb.mxu0 %v4190_v17  ;;  %v4040_v24 = vld [vmem:[#allocation29 + $0x200] sm:$0xff]  ;;  %v4227_v47 = vld [vmem:[#allocation29 + $0x7d8] sm:$0xff] }
 0xc87   :  { %4372 = vmatpush.msrb.mxu2 %v4144_v10  ;;  %v4128_v10 = vld [vmem:[#allocation29 + $0x4c0] sm:$0xff] }
 0xc88   :  { %4548 = vmatpush.msra.mxu1 %v4286_v1  ;;  %4687 = vmatpush.msrb.mxu0 %v4183_v39  ;;  %v4159_v1 = vld [vmem:[#allocation29 + $0x5b8] sm:$0xff]  ;;  %v4220_v17 = vld [vmem:[#allocation29 + $0x7a0] sm:$0xff]  ;;  %v4213_v39 = vld [vmem:[#allocation29 + $0x768] sm:$0xff] }
 0xc89   :  { %4373 = vmatpush.msrb.mxu2 %v4137_v13  ;;  %4481 = vmatmul.f32.vlgmr.msrb.gmra.mxu1 %v7632_v48  ;;  %v4169_v13 = vld [vmem:[#allocation29 + $0x608] sm:$0xff] }
 0xc8a   :  { %4549 = vmatpush.msra.mxu1 %v4279_v37  ;;  %4688 = vmatpush.msrb.mxu0 %v4176_v33  ;;  %v4033_v37 = vld [vmem:[#allocation29 + $0x1c8] sm:$0xff] }
 0xc8b   :  { %4374 = vmatpush.msrb.mxu2 %v4130_v40  ;;  %4450 = vmatpush.msrb.mxu3 %v4159_v1  ;;  %v4152_v40 = vld [vmem:[#allocation29 + $0x580] sm:$0xff]  ;;  %v3875_v1 = vperm.slane %v7620_v50, 3 }
 0xc8c   :  { %4550 = vmatpush.msra.mxu1 %v4272_v30  ;;  %v4026_v30 = vld [vmem:[#allocation29 + $0x190] sm:$0xff]  ;;  %4689 = vmatpush.msrb.mxu0 %v4169_v13  ;;  %v4313_v13 = vld [vmem:[#allocation29 + $0xa88] sm:$0xff] }
 0xc8d   :  { %4375 = vmatpush.msrb.mxu2 %v4123_v41  ;;  %v4145_v41 = vld [vmem:[#allocation29 + $0x548] sm:$0xff]  ;;  %4451 = vmatpush.msrb.mxu3 %v4152_v40 }
 0xc8e   :  { %4551 = vmatpush.msra.mxu1 %v4265_v62  ;;  %v4121_v62 = vld [vmem:[#allocation29 + $0x488] sm:$0xff] }
 0xc8f   :  { %4376 = vmatpush.msrb.mxu2 %v4116_v63  ;;  %v4019_v63 = vld [vmem:[#allocation29 + $0x158] sm:$0xff]  ;;  %4452 = vmatpush.msrb.mxu3 %v4145_v41 }
 0xc90   :  { %4552 = vmatpush.msra.mxu1 %v4258_v42  ;;  %v4162_v42 = vld [vmem:[#allocation29 + $0x5d0] sm:$0xff]  ;;  %v4083_v41 = vld [vmem:[#allocation29 + $0x358] sm:$0xff] }
 0xc91   :  { %4377 = vmatpush.msrb.mxu2 %v4109_v8  ;;  %v4138_v8 = vld [vmem:[#allocation29 + $0x510] sm:$0xff]  ;;  %4690 = vmatpush.msrb.mxu0 %v4162_v42  ;;  %v4188_v42 = vld [vmem:[#allocation29 + $0x6a0] sm:$0xff] }
 0xc92   :  { %4553 = vmatpush.msra.mxu1 %v4251_v19  ;;  %v4155_v19 = vld [vmem:[#allocation29 + $0x598] sm:$0xff]  ;;  %4453 = vmatpush.msrb.mxu3 %v4138_v8  ;;  %v4069_v8 = vld [vmem:[#allocation29 + $0x2e8] sm:$0xff] }
 0xc93   :  { %4378 = vmatpush.msrb.mxu2 %v4102_v22  ;;  %v4114_v22 = vld [vmem:[#allocation29 + $0x450] sm:$0xff]  ;;  %4691 = vmatpush.msrb.mxu0 %v4155_v19  ;;  %v4181_v19 = vld [vmem:[#allocation29 + $0x668] sm:$0xff] }
 0xc94   :  { %4554 = vmatpush.msra.mxu1 %v4244_v0  ;;  %v4148_v0 = vld [vmem:[#allocation29 + $0x560] sm:$0xff] }
 0xc95   :  { %4379 = vmatpush.msrb.mxu2 %v4095_v57  ;;  %v4107_v57 = vld [vmem:[#allocation29 + $0x418] sm:$0xff]  ;;  %4692 = vmatpush.msrb.mxu0 %v4148_v0  ;;  %v4062_v0 = vld [vmem:[#allocation29 + $0x2b0] sm:$0xff] }
 0xc96   :  { %4555 = vmatpush.msra.mxu1 %v4237_v16  ;;  %v4012_v16 = vld [vmem:[#allocation29 + $0x120] sm:$0xff] }
 0xc97   :  { %4380 = vmatpush.msrb.mxu2 %v4088_v31  ;;  %v4131_v31 = vld [vmem:[#allocation29 + $0x4d8] sm:$0xff] }
 0xc98   :  { %4556 = vmatpush.msra.mxu1 %v4230_v44  ;;  %v4100_v44 = vld [vmem:[#allocation29 + $0x3e0] sm:$0xff]  ;;  %4454 = vmatpush.msrb.mxu3 %v4131_v31  ;;  %v4167_v31 = vld [vmem:[#allocation29 + $0x5f8] sm:$0xff] }
 0xc99   :  { %4425 = vmatpush.msra.mxu2 %v4082_v60  ;;  %v4141_v60 = vld [vmem:[#allocation29 + $0x528] sm:$0xff] }
 0xc9a   :  { %4557 = vmatpush.msra.mxu1 %v4223_v43  ;;  %v4124_v43 = vld [vmem:[#allocation29 + $0x4a0] sm:$0xff]  ;;  %4693 = vmatpush.msrb.mxu0 %v4141_v60 }
 0xc9b   :  { %4426 = vmatpush.msra.mxu2 %v4075_v27  ;;  %v4005_v27 = vld [vmem:[#allocation29 + $0xe8] sm:$0xff]  ;;  %4455 = vmatpush.msrb.mxu3 %v4124_v43  ;;  %v4296_v60 = vld [vmem:[#allocation29 + $0xa00] sm:$0xff] }
 0xc9c   :  { %4558 = vmatpush.msra.mxu1 %v4216_v7  ;;  %v4093_v7 = vld [vmem:[#allocation29 + $0x3a8] sm:$0xff] }
 0xc9d   :  { %4427 = vmatpush.msra.mxu2 %v4068_v36  ;;  %v4134_v36 = vld [vmem:[#allocation29 + $0x4f0] sm:$0xff]  ;;  %v4289_v43 = vld [vmem:[#allocation29 + $0x9c8] sm:$0xff] }
 0xc9e   :  { %4559 = vmatpush.msra.mxu1 %v4209_v3  ;;  %v4117_v3 = vld [vmem:[#allocation29 + $0x468] sm:$0xff]  ;;  %4694 = vmatpush.msrb.mxu0 %v4134_v36 }
 0xc9f   :  { %4428 = vmatpush.msra.mxu2 %v4061_v12  ;;  %v3998_v12 = vld [vmem:[#allocation29 + $0xb0] sm:$0xff]  ;;  %4456 = vmatpush.msrb.mxu3 %v4117_v3  ;;  %v4041_v36 = vld [vmem:[#allocation29 + $0x208] sm:$0xff] }
 0xca0   :  { %4560 = vmatpush.msra.mxu1 %v4202_v20  ;;  %v4311_v20 = vld [vmem:[#allocation29 + $0xa78] sm:$0xff]  ;;  %v4034_v3 = vld [vmem:[#allocation29 + $0x1d0] sm:$0xff] }
 0xca1   :  { %4429 = vmatpush.msra.mxu2 %v4054_v53  ;;  %4561 = vmatmul.f32.vlgmr.msra.gmra.mxu1 %v7632_v48  ;;  %v4127_v53 = vld [vmem:[#allocation29 + $0x4b8] sm:$0xff] }
 0xca2   :  { %4665 = vmatpush.msrb.mxu1 %v4085_v61  ;;  %v3991_v61 = vld [vmem:[#allocation29 + $0x78] sm:$0xff]  ;;  %4695 = vmatpush.msrb.mxu0 %v4127_v53  ;;  %v4146_v53 = vld [vmem:[#allocation29 + $0x550] sm:$0xff] }
 0xca3   :  { %4430 = vmatpush.msra.mxu2 %v4047_v51  ;;  %v4110_v51 = vld [vmem:[#allocation29 + $0x430] sm:$0xff] }
 0xca4   :  { %4666 = vmatpush.msrb.mxu1 %v4078_v34  ;;  %v4120_v34 = vld [vmem:[#allocation29 + $0x480] sm:$0xff]  ;;  %4457 = vmatpush.msrb.mxu3 %v4110_v51  ;;  %v4139_v51 = vld [vmem:[#allocation29 + $0x518] sm:$0xff] }
 0xca5   :  { %4431 = vmatpush.msra.mxu2 %v4040_v24  ;;  %4696 = vmatpush.msrb.mxu0 %v4120_v34  ;;  %v4320_v24 = vld [vmem:[#allocation29 + $0xac0] sm:$0xff] }
 0xca6   :  { %4667 = vmatpush.msrb.mxu1 %v4071_v49  ;;  %v4304_v49 = vld [vmem:[#allocation29 + $0xa40] sm:$0xff] }
 0xca7   :  { %4432 = vmatpush.msra.mxu2 %v4033_v37  ;;  %v4268_v34 = vld [vmem:[#allocation29 + $0x920] sm:$0xff] }
 0xca8   :  { %4668 = vmatpush.msrb.mxu1 %v4064_v32  ;;  %v3984_v32 = vld [vmem:[#allocation29 + $0x40] sm:$0xff] }
 0xca9   :  { %4433 = vmatpush.msra.mxu2 %v4026_v30 }
 0xcaa   :  { %4669 = vmatpush.msrb.mxu1 %v4057_v59  ;;  %v4103_v59 = vld [vmem:[#allocation29 + $0x3f8] sm:$0xff] }
 0xcab   :  { %4434 = vmatpush.msra.mxu2 %v4019_v63  ;;  %4458 = vmatpush.msrb.mxu3 %v4103_v59  ;;  %v4076_v63 = vld [vmem:[#allocation29 + $0x320] sm:$0xff]  ;;  %v4261_v59 = vld [vmem:[#allocation29 + $0x8e8] sm:$0xff] }
 0xcac   :  { %4670 = vmatpush.msrb.mxu1 %v4050_v11  ;;  %v4113_v11 = vld [vmem:[#allocation29 + $0x448] sm:$0xff] }
 0xcad   :  { %4435 = vmatpush.msra.mxu2 %v4012_v16  ;;  %4697 = vmatpush.msrb.mxu0 %v4113_v11  ;;  %v4055_v16 = vld [vmem:[#allocation29 + $0x278] sm:$0xff]  ;;  %v4013_v11 = vld [vmem:[#allocation29 + $0x128] sm:$0xff] }
 0xcae   :  { %4671 = vmatpush.msrb.mxu1 %v4043_v46  ;;  %v4297_v46 = vld [vmem:[#allocation29 + $0xa08] sm:$0xff] }
 0xcaf   :  { %4436 = vmatpush.msra.mxu2 %v4005_v27  ;;  %v4160_v27 = vld [vmem:[#allocation29 + $0x5c0] sm:$0xff] }
 0xcb0   :  { %4672 = vmatpush.msrb.mxu1 %v4036_v5  ;;  %v3977_v5 = vld [vmem:[#allocation29 + $0x8] sm:$0xff] }
 0xcb1   :  { %4437 = vmatpush.msra.mxu2 %v3998_v12  ;;  %v4282_v12 = vld [vmem:[#allocation29 + $0x990] sm:$0xff] }
 0xcb2   :  { %4673 = vmatpush.msrb.mxu1 %v4029_v35  ;;  %v4096_v35 = vld [vmem:[#allocation29 + $0x3c0] sm:$0xff] }
 0xcb3   :  { %4438 = vmatpush.msra.mxu2 %v3991_v61  ;;  %4459 = vmatpush.msrb.mxu3 %v4096_v35  ;;  %v4027_v61 = vld [vmem:[#allocation29 + $0x198] sm:$0xff]  ;;  %v4006_v35 = vld [vmem:[#allocation29 + $0xf0] sm:$0xff] }
 0xcb4   :  { %4674 = vmatpush.msrb.mxu1 %v4022_v55  ;;  %v4106_v55 = vld [vmem:[#allocation29 + $0x410] sm:$0xff] }
 0xcb5   :  { %4439 = vmatpush.msra.mxu2 %v3984_v32  ;;  %4698 = vmatpush.msrb.mxu0 %v4106_v55  ;;  %v4132_v32 = vld [vmem:[#allocation29 + $0x4e0] sm:$0xff]  ;;  %v4118_v55 = vld [vmem:[#allocation29 + $0x470] sm:$0xff] }
 0xcb6   :  { %4675 = vmatpush.msrb.mxu1 %v4015_v14  ;;  %v4290_v14 = vld [vmem:[#allocation29 + $0x9d0] sm:$0xff] }
 0xcb7   :  { %4440 = vmatpush.msra.mxu2 %v3977_v5  ;;  %v4254_v5 = vld [vmem:[#allocation29 + $0x8b0] sm:$0xff] }
 0xcb8   :  { %4676 = vmatpush.msrb.mxu1 %v4008_v28  ;;  %v4089_v28 = vld [vmem:[#allocation29 + $0x388] sm:$0xff] }
 0xcb9   :  { %4460 = vmatpush.msrb.mxu3 %v4089_v28  ;;  %v3999_v28 = vld [vmem:[#allocation29 + $0xb8] sm:$0xff] }
 0xcba   :  { %4677 = vmatpush.msrb.mxu1 %v4001_v21  ;;  %v4099_v21 = vld [vmem:[#allocation29 + $0x3d8] sm:$0xff] }
 0xcbb   :  { %4699 = vmatpush.msrb.mxu0 %v4099_v21  ;;  %v4111_v21 = vld [vmem:[#allocation29 + $0x438] sm:$0xff] }
 0xcbc   :  { %4678 = vmatpush.msrb.mxu1 %v3994_v18  ;;  %v4283_v18 = vld [vmem:[#allocation29 + $0x998] sm:$0xff] }
 0xcbe   :  { %4679 = vmatpush.msrb.mxu1 %v3987_v25  ;;  %v4092_v25 = vld [vmem:[#allocation29 + $0x3a0] sm:$0xff] }
 0xcbf   :  { %4700 = vmatpush.msrb.mxu0 %v4092_v25  ;;  %v3992_v25 = vld [vmem:[#allocation29 + $0x80] sm:$0xff] }
 0xcc0   :  { %4680 = vmatpush.msrb.mxu1 %v3980_v52  ;;  %v4276_v52 = vld [vmem:[#allocation29 + $0x960] sm:$0xff] }
 0xcc1   :  { %4681 = vmatmul.f32.vlgmr.msrb.gmra.mxu1 %v7625_v58 }
 0xcc2   :  { %4765 = vmatpush.msra.mxu1 %v4198_v15  ;;  %v4269_v15 = vld [vmem:[#allocation29 + $0x928] sm:$0xff] }
 0xcc4   :  { %4766 = vmatpush.msra.mxu1 %v4191_v45  ;;  %v4262_v45 = vld [vmem:[#allocation29 + $0x8f0] sm:$0xff] }
 0xcc6   :  { %4767 = vmatpush.msra.mxu1 %v4184_v23  ;;  %v4255_v23 = vld [vmem:[#allocation29 + $0x8b8] sm:$0xff] }
 0xcc8   :  { %4768 = vmatpush.msra.mxu1 %v4177_v6  ;;  %v5451_v6 = vld [vmem:[#allocation25] ss:$0 sm:$0xff] }
 0xcca   :  { %4769 = vmatpush.msra.mxu1 %v4170_v26  ;;  %v4248_v26 = vld [vmem:[#allocation29 + $0x880] sm:$0xff] }
 0xccc   :  { %4770 = vmatpush.msra.mxu1 %v4163_v29 }
 0xcce   :  { %4771 = vmatpush.msra.mxu1 %v4156_v56 }
 0xcd0   :  { %4772 = vmatpush.msra.mxu1 %v4149_v4  ;;  %v3873_v4 = vperm.slane %v7620_v50, 1  ;;  %v4310_v50 = vld [vmem:[#allocation29 + $0xa70] sm:$0xff] }
 0xcd2   :  { %4773 = vmatpush.msra.mxu1 %v4142_v2 }
 0xcd4   :  { %4774 = vmatpush.msra.mxu1 %v4135_v9 }
 0xcd6   :  { %4775 = vmatpush.msra.mxu1 %v4128_v10  ;;  %v4206_v10 = vld [vmem:[#allocation29 + $0x730] sm:$0xff] }
 0xcd8   :  { %4776 = vmatpush.msra.mxu1 %v4121_v62  ;;  %v4195_v62 = vld [vmem:[#allocation29 + $0x6d8] sm:$0xff] }
 0xcda   :  { %4777 = vmatpush.msra.mxu1 %v4114_v22  ;;  %v4303_v22 = vld [vmem:[#allocation29 + $0xa38] sm:$0xff] }
 0xcdc   :  { %4778 = vmatpush.msra.mxu1 %v4107_v57  ;;  %v4174_v57 = vld [vmem:[#allocation29 + $0x630] sm:$0xff] }
 0xcde   :  { %4779 = vmatpush.msra.mxu1 %v4100_v44  ;;  %v4048_v44 = vld [vmem:[#allocation29 + $0x240] sm:$0xff] }
 0xce0   :  { %4780 = vmatpush.msra.mxu1 %v4093_v7  ;;  %v4153_v7 = vld [vmem:[#allocation29 + $0x588] sm:$0xff] }
 0xce2   :  { %4865 = vmatpush.msrb.mxu1 %v4311_v20  ;;  %v4275_v20 = vld [vmem:[#allocation29 + $0x958] sm:$0xff] }
 0xce4   :  { %4866 = vmatpush.msrb.mxu1 %v4304_v49  ;;  %v4020_v49 = vld [vmem:[#allocation29 + $0x160] sm:$0xff] }
 0xce6   :  { %4867 = vmatpush.msrb.mxu1 %v4297_v46  ;;  %v4125_v46 = vld [vmem:[#allocation29 + $0x4a8] sm:$0xff] }
 0xce8   :  { %4868 = vmatpush.msrb.mxu1 %v4290_v14  ;;  %v4247_v14 = vld [vmem:[#allocation29 + $0x878] sm:$0xff] }
 0xcea   :  { %4869 = vmatpush.msrb.mxu1 %v4283_v18  ;;  %v4240_v18 = vld [vmem:[#allocation29 + $0x840] sm:$0xff] }
 0xcec   :  { %4870 = vmatpush.msrb.mxu1 %v4276_v52  ;;  %v4104_v52 = vld [vmem:[#allocation29 + $0x400] sm:$0xff] }
 0xcee   :  { %4871 = vmatpush.msrb.mxu1 %v4269_v15  ;;  %v4233_v15 = vld [vmem:[#allocation29 + $0x808] sm:$0xff] }
 0xcf0   :  { %4872 = vmatpush.msrb.mxu1 %v4262_v45  ;;  %v3985_v45 = vld [vmem:[#allocation29 + $0x48] sm:$0xff] }
 0xcf2   :  { %4873 = vmatpush.msrb.mxu1 %v4255_v23  ;;  %v4097_v23 = vld [vmem:[#allocation29 + $0x3c8] sm:$0xff] }
 0xcf3   :  { %v3858_v29 = vpop.f32.mrf.mxu2 }
 0xcf4   :  { %v3859_v56 = vadd.f32 %v5451_v6, %v3858_v29  ;;  %4874 = vmatpush.msrb.mxu1 %v4248_v26  ;;  %v3978_v6 = vld [vmem:[#allocation29 + $0x10] sm:$0xff]  ;;  %v4321_v29 = vld [vmem:[#allocation29 + $0xac8] sm:$0xff] }
 0xcf5   :  { %v4090_v26 = vld [vmem:[#allocation29 + $0x390] sm:$0xff] }
 0xcf6   :  { %4875 = vmatpush.msrb.mxu1 %v4241_v54  ;;  %3861 = vst.msk [vmem:[#allocation33] sm:$0x3] %vm3792_vm9, %v3859_v56  ;;  %v4196_v54 = vld [vmem:[#allocation29 + $0x6e0] sm:$0xff]  ;;  %v4314_v56 = vld [vmem:[#allocation29 + $0xa90] sm:$0xff] }
 0xcf7   :  { %4959 = dma.vmem_to_hbm [thread:$0]  %s4955_s10, 32, %s4957_s9, [#allocation34]  }
 0xcf8   :  { %4876 = vmatpush.msrb.mxu1 %v4234_v38  ;;  %v4189_v38 = vld [vmem:[#allocation29 + $0x6a8] sm:$0xff] }
 0xcfa   :  { %4877 = vmatpush.msrb.mxu1 %v4227_v47  ;;  %v4308_v47 = vld [vmem:[#allocation29 + $0xa60] sm:$0xff] }
 0xcfb   :  { %v3929_v2 = vpop.f32.mrf.mxu2 }
 0xcfc   :  { %v3930_v9 = vadd.f32 %v3929_v2, %v3873_v4  ;;  %4878 = vmatpush.msrb.mxu1 %v4220_v17  ;;  %v4226_v4 = vld [vmem:[#allocation29 + $0x7d0] sm:$0xff]  ;;  %v4301_v2 = vld [vmem:[#allocation29 + $0xa28] sm:$0xff] }
 0xcfd   :  { %v4182_v17 = vld [vmem:[#allocation29 + $0x670] sm:$0xff] }
 0xcfe   :  { %v7642_v33 = vmax.f32 %v3930_v9, 0.0  ;;  %4879 = vmatpush.msrb.mxu1 %v4213_v39  ;;  %v4219_v39 = vld [vmem:[#allocation29 + $0x798] sm:$0xff] }
 0xcff   :  { %v4175_v9 = vld [vmem:[#allocation29 + $0x638] sm:$0xff] }
 0xd00   :  { %4381 = vmatmul.f32.vlgmr.msrb.gmra.mxu2 %v7642_v33  ;;  %4781 = vmatmul.f32.vlgmr.msra.gmra.mxu1 %v7642_v33 }
 0xd01   :  { %4499 = vmatpush.msrb.mxu2 %v4320_v24  ;;  %4880 = vmatpush.msrb.mxu1 %v4206_v10  ;;  %v4294_v24 = vld [vmem:[#allocation29 + $0x9f0] sm:$0xff]  ;;  %v4212_v10 = vld [vmem:[#allocation29 + $0x760] sm:$0xff] }
 0xd03   :  { %v3969_v37 = vpop.f32.mrf.mxu2  ;;  %4500 = vmatpush.msrb.mxu2 %v4313_v13  ;;  %v4287_v13 = vld [vmem:[#allocation29 + $0x9b8] sm:$0xff] }
 0xd04   :  { %v3970_v40 = vadd.f32 %v3969_v37, %v3875_v1  ;;  %v4168_v1 = vld [vmem:[#allocation29 + $0x600] sm:$0xff]  ;;  %v4205_v37 = vld [vmem:[#allocation29 + $0x728] sm:$0xff] }
 0xd06   :  { %v7647_v30 = vmax.f32 %v3970_v40, 0.0  ;;  %v4161_v40 = vld [vmem:[#allocation29 + $0x5c8] sm:$0xff] }
 0xd08   :  { %5408 = vmatmul.msk.f32.vlgmr.msra.gmra.mxu3 %vm1431_vm5, %v7647_v30  ;;  %4441 = vmatmul.f32.vlgmr.msra.gmra.mxu2 %v7625_v58 }
 0xd09   :  { %4505 = vmatpush.msra.mxu3 %v4083_v41  ;;  %4525 = vmatpush.msra.mxu2 %v4195_v62  ;;  %v4280_v41 = vld [vmem:[#allocation29 + $0x980] sm:$0xff]  ;;  %v4154_v62 = vld [vmem:[#allocation29 + $0x590] sm:$0xff] }
 0xd0a   :  { %5411 = vmatmul.msk.f32.vlgmr.msra.gmra.mxu0 %vm1431_vm5, %v7647_v30  ;;  %4881 = vmatmul.f32.vlgmr.msrb.gmra.mxu1 %v7632_v48 }
 0xd0b   :  { %4506 = vmatpush.msra.mxu3 %v4076_v63  ;;  %4526 = vmatpush.msra.mxu2 %v4188_v42  ;;  %v4325_v63 = vld [vmem:[#allocation29 + $0xae8] sm:$0xff] }
 0xd0c   :  { %4785 = vmatpush.msra.mxu0 %v4310_v50  ;;  %v4273_v42 = vld [vmem:[#allocation29 + $0x948] sm:$0xff]  ;;  %v4147_v50 = vld [vmem:[#allocation29 + $0x558] sm:$0xff] }
 0xd0d   :  { %4507 = vmatpush.msra.mxu3 %v4069_v8  ;;  %4527 = vmatpush.msra.mxu2 %v4181_v19  ;;  %v4318_v8 = vld [vmem:[#allocation29 + $0xab0] sm:$0xff] }
 0xd0e   :  { %4786 = vmatpush.msra.mxu0 %v4303_v22  ;;  %v4266_v19 = vld [vmem:[#allocation29 + $0x910] sm:$0xff]  ;;  %v4140_v22 = vld [vmem:[#allocation29 + $0x520] sm:$0xff] }
 0xd0f   :  { %4508 = vmatpush.msra.mxu3 %v4062_v0  ;;  %4528 = vmatpush.msra.mxu2 %v4174_v57  ;;  %v4259_v0 = vld [vmem:[#allocation29 + $0x8d8] sm:$0xff]  ;;  %v4133_v57 = vld [vmem:[#allocation29 + $0x4e8] sm:$0xff] }
 0xd10   :  { %4461 = vmatmul.f32.vlgmr.msrb.gmra.mxu3 %v7642_v33  ;;  %5409 = vmatmul.msk.f32.vlgmr.msrb.gmra.mxu2 %vm1431_vm5, %v7647_v30 }
 0xd11   :  { %4509 = vmatpush.msra.mxu3 %v4055_v16  ;;  %4529 = vmatpush.msra.mxu2 %v4167_v31  ;;  %v4252_v16 = vld [vmem:[#allocation29 + $0x8a0] sm:$0xff]  ;;  %v4126_v31 = vld [vmem:[#allocation29 + $0x4b0] sm:$0xff] }
 0xd12   :  { %4787 = vmatpush.msra.mxu0 %v4296_v60  ;;  %v4245_v60 = vld [vmem:[#allocation29 + $0x868] sm:$0xff] }
 0xd13   :  { %4510 = vmatpush.msra.mxu3 %v4048_v44  ;;  %4530 = vmatpush.msra.mxu2 %v4160_v27  ;;  %v4119_v44 = vld [vmem:[#allocation29 + $0x478] sm:$0xff]  ;;  %v4238_v27 = vld [vmem:[#allocation29 + $0x830] sm:$0xff] }
 0xd14   :  { %4788 = vmatpush.msra.mxu0 %v4289_v43  ;;  %v4112_v43 = vld [vmem:[#allocation29 + $0x440] sm:$0xff] }
 0xd15   :  { %4511 = vmatpush.msra.mxu3 %v4041_v36  ;;  %4531 = vmatpush.msra.mxu2 %v4153_v7  ;;  %v4231_v36 = vld [vmem:[#allocation29 + $0x7f8] sm:$0xff]  ;;  %v4105_v7 = vld [vmem:[#allocation29 + $0x408] sm:$0xff] }
 0xd16   :  { %4789 = vmatpush.msra.mxu0 %v4282_v12  ;;  %v4224_v12 = vld [vmem:[#allocation29 + $0x7c0] sm:$0xff] }
 0xd17   :  { %4512 = vmatpush.msra.mxu3 %v4034_v3  ;;  %4532 = vmatpush.msra.mxu2 %v4146_v53  ;;  %v4098_v3 = vld [vmem:[#allocation29 + $0x3d0] sm:$0xff]  ;;  %v4217_v53 = vld [vmem:[#allocation29 + $0x788] sm:$0xff] }
 0xd18   :  { %4790 = vmatpush.msra.mxu0 %v4275_v20  ;;  %v4091_v20 = vld [vmem:[#allocation29 + $0x398] sm:$0xff] }
 0xd19   :  { %4513 = vmatpush.msra.mxu3 %v4027_v61  ;;  %4533 = vmatpush.msra.mxu2 %v4139_v51  ;;  %v4210_v61 = vld [vmem:[#allocation29 + $0x750] sm:$0xff]  ;;  %v4309_v51 = vld [vmem:[#allocation29 + $0xa68] sm:$0xff] }
 0xd1a   :  { %4791 = vmatpush.msra.mxu0 %v4268_v34  ;;  %v4203_v34 = vld [vmem:[#allocation29 + $0x718] sm:$0xff] }
 0xd1b   :  { %4514 = vmatpush.msra.mxu3 %v4020_v49  ;;  %4534 = vmatpush.msra.mxu2 %v4132_v32  ;;  %v4302_v49 = vld [vmem:[#allocation29 + $0xa30] sm:$0xff]  ;;  %v4323_v32 = vld [vmem:[#allocation29 + $0xad8] sm:$0xff] }
 0xd1c   :  { %4792 = vmatpush.msra.mxu0 %v4261_v59  ;;  %v4295_v59 = vld [vmem:[#allocation29 + $0x9f8] sm:$0xff] }
 0xd1d   :  { %4515 = vmatpush.msra.mxu3 %v4013_v11  ;;  %4535 = vmatpush.msra.mxu2 %v4125_v46  ;;  %v4316_v11 = vld [vmem:[#allocation29 + $0xaa0] sm:$0xff]  ;;  %v4086_v46 = vld [vmem:[#allocation29 + $0x370] sm:$0xff] }
 0xd1e   :  { %4793 = vmatpush.msra.mxu0 %v4254_v5  ;;  %v4288_v5 = vld [vmem:[#allocation29 + $0x9c0] sm:$0xff] }
 0xd1f   :  { %4516 = vmatpush.msra.mxu3 %v4006_v35  ;;  %4536 = vmatpush.msra.mxu2 %v4118_v55  ;;  %v4079_v35 = vld [vmem:[#allocation29 + $0x338] sm:$0xff]  ;;  %v4281_v55 = vld [vmem:[#allocation29 + $0x988] sm:$0xff] }
 0xd20   :  { %4794 = vmatpush.msra.mxu0 %v4247_v14  ;;  %v4072_v14 = vld [vmem:[#allocation29 + $0x300] sm:$0xff] }
 0xd21   :  { %4517 = vmatpush.msra.mxu3 %v3999_v28  ;;  %4537 = vmatpush.msra.mxu2 %v4111_v21  ;;  %v4274_v28 = vld [vmem:[#allocation29 + $0x950] sm:$0xff]  ;;  %v4065_v21 = vld [vmem:[#allocation29 + $0x2c8] sm:$0xff] }
 0xd22   :  { %4795 = vmatpush.msra.mxu0 %v4240_v18  ;;  %v4267_v18 = vld [vmem:[#allocation29 + $0x918] sm:$0xff] }
 0xd23   :  { %4518 = vmatpush.msra.mxu3 %v3992_v25  ;;  %4538 = vmatpush.msra.mxu2 %v4104_v52  ;;  %v4058_v25 = vld [vmem:[#allocation29 + $0x290] sm:$0xff]  ;;  %v4260_v52 = vld [vmem:[#allocation29 + $0x8e0] sm:$0xff] }
 0xd24   :  { %4796 = vmatpush.msra.mxu0 %v4233_v15  ;;  %v4051_v15 = vld [vmem:[#allocation29 + $0x258] sm:$0xff] }
 0xd25   :  { %4519 = vmatpush.msra.mxu3 %v3985_v45  ;;  %4539 = vmatpush.msra.mxu2 %v4097_v23  ;;  %v4253_v45 = vld [vmem:[#allocation29 + $0x8a8] sm:$0xff]  ;;  %v4044_v23 = vld [vmem:[#allocation29 + $0x220] sm:$0xff] }
 0xd26   :  { %4701 = vmatmul.f32.vlgmr.msrb.gmra.mxu0 %v7642_v33 }
 0xd27   :  { %4520 = vmatpush.msra.mxu3 %v3978_v6  ;;  %4540 = vmatpush.msra.mxu2 %v4090_v26  ;;  %v4246_v6 = vld [vmem:[#allocation29 + $0x870] sm:$0xff]  ;;  %v4037_v26 = vld [vmem:[#allocation29 + $0x1e8] sm:$0xff] }
 0xd28   :  { %4521 = vmatmul.f32.vlgmr.msra.gmra.mxu3 %v7625_v58  ;;  %4541 = vmatmul.f32.vlgmr.msra.gmra.mxu2 %v7642_v33 }
 0xd29   :  { %4579 = vmatpush.msrb.mxu3 %v4321_v29  ;;  %4605 = vmatpush.msrb.mxu2 %v4196_v54  ;;  %v4239_v29 = vld [vmem:[#allocation29 + $0x838] sm:$0xff]  ;;  %v4030_v54 = vld [vmem:[#allocation29 + $0x1b0] sm:$0xff] }
 0xd2a   :  { %4797 = vmatpush.msra.mxu0 %v4226_v4  ;;  %v4016_v4 = vld [vmem:[#allocation29 + $0x140] sm:$0xff] }
 0xd2b   :  { %4580 = vmatpush.msrb.mxu3 %v4314_v56  ;;  %4606 = vmatpush.msrb.mxu2 %v4189_v38  ;;  %v4232_v56 = vld [vmem:[#allocation29 + $0x800] sm:$0xff]  ;;  %v4023_v38 = vld [vmem:[#allocation29 + $0x178] sm:$0xff] }
 0xd2c   :  { %4798 = vmatpush.msra.mxu0 %v4219_v39  ;;  %v4211_v39 = vld [vmem:[#allocation29 + $0x758] sm:$0xff] }
 0xd2d   :  { %4625 = vmatpush.msra.mxu3 %v4308_v47  ;;  %4607 = vmatpush.msrb.mxu2 %v4182_v17  ;;  %v4225_v47 = vld [vmem:[#allocation29 + $0x7c8] sm:$0xff]  ;;  %v4218_v17 = vld [vmem:[#allocation29 + $0x790] sm:$0xff] }
 0xd2e   :  { %4799 = vmatpush.msra.mxu0 %v4212_v10  ;;  %v4324_v10 = vld [vmem:[#allocation29 + $0xae0] sm:$0xff] }
 0xd2f   :  { %4626 = vmatpush.msra.mxu3 %v4301_v2  ;;  %4608 = vmatpush.msrb.mxu2 %v4175_v9  ;;  %v4009_v2 = vld [vmem:[#allocation29 + $0x108] sm:$0xff]  ;;  %v4002_v9 = vld [vmem:[#allocation29 + $0xd0] sm:$0xff] }
 0xd30   :  { %4800 = vmatpush.msra.mxu0 %v4205_v37  ;;  %5410 = vmatmul.msk.f32.vlgmr.msrb.gmra.mxu3 %vm1431_vm5, %v7647_v30  ;;  %v3988_v37 = vld [vmem:[#allocation29 + $0x60] sm:$0xff] }
 0xd31   :  { %4627 = vmatpush.msra.mxu3 %v4294_v24  ;;  %4609 = vmatpush.msrb.mxu2 %v4168_v1  ;;  %v4204_v24 = vld [vmem:[#allocation29 + $0x720] sm:$0xff]  ;;  %v3995_v1 = vld [vmem:[#allocation29 + $0x98] sm:$0xff] }
 0xd32   :  { %4801 = vmatmul.f32.vlgmr.msra.gmra.mxu0 %v7632_v48 }
 0xd33   :  { %4628 = vmatpush.msra.mxu3 %v4287_v13  ;;  %4610 = vmatpush.msrb.mxu2 %v4161_v40  ;;  %v4317_v13 = vld [vmem:[#allocation29 + $0xaa8] sm:$0xff]  ;;  %v4087_v40 = vld [vmem:[#allocation29 + $0x378] sm:$0xff] }
 0xd34   :  { %4899 = vmatpush.msrb.mxu0 %v4325_v63  ;;  %v4199_v63 = vld [vmem:[#allocation29 + $0x6f8] sm:$0xff] }
 0xd35   :  { %4629 = vmatpush.msra.mxu3 %v4280_v41  ;;  %4611 = vmatpush.msrb.mxu2 %v4154_v62  ;;  %v3981_v41 = vld [vmem:[#allocation29 + $0x28] sm:$0xff]  ;;  %v4080_v62 = vld [vmem:[#allocation29 + $0x340] sm:$0xff] }
 0xd36   :  { %4900 = vmatpush.msrb.mxu0 %v4318_v8  ;;  %v4066_v8 = vld [vmem:[#allocation29 + $0x2d0] sm:$0xff] }
 0xd37   :  { %4630 = vmatpush.msra.mxu3 %v4273_v42  ;;  %4612 = vmatpush.msrb.mxu2 %v4147_v50  ;;  %v4073_v42 = vld [vmem:[#allocation29 + $0x308] sm:$0xff]  ;;  %v4192_v50 = vld [vmem:[#allocation29 + $0x6c0] sm:$0xff] }
 0xd39   :  { %4631 = vmatpush.msra.mxu3 %v4266_v19  ;;  %4613 = vmatpush.msrb.mxu2 %v4140_v22  ;;  %v4185_v19 = vld [vmem:[#allocation29 + $0x688] sm:$0xff]  ;;  %v4059_v22 = vld [vmem:[#allocation29 + $0x298] sm:$0xff] }
 0xd3a   :  { %5414 = vmatmul.msk.f32.vlgmr.msrb.gmra.mxu0 %vm1431_vm5, %v7647_v30 }
 0xd3b   :  { %4632 = vmatpush.msra.mxu3 %v4259_v0  ;;  %4614 = vmatpush.msrb.mxu2 %v4133_v57  ;;  %v4052_v0 = vld [vmem:[#allocation29 + $0x260] sm:$0xff]  ;;  %v4171_v57 = vld [vmem:[#allocation29 + $0x618] sm:$0xff] }
 0xd3d   :  { %4633 = vmatpush.msra.mxu3 %v4252_v16  ;;  %4615 = vmatpush.msrb.mxu2 %v4126_v31  ;;  %v4045_v16 = vld [vmem:[#allocation29 + $0x228] sm:$0xff]  ;;  %v4164_v31 = vld [vmem:[#allocation29 + $0x5e0] sm:$0xff] }
 0xd3f   :  { %4634 = vmatpush.msra.mxu3 %v4245_v60  ;;  %4616 = vmatpush.msrb.mxu2 %v4119_v44  ;;  %v4038_v60 = vld [vmem:[#allocation29 + $0x1f0] sm:$0xff]  ;;  %v4157_v44 = vld [vmem:[#allocation29 + $0x5a8] sm:$0xff] }
 0xd41   :  { %4635 = vmatpush.msra.mxu3 %v4238_v27  ;;  %4617 = vmatpush.msrb.mxu2 %v4112_v43  ;;  %v4031_v27 = vld [vmem:[#allocation29 + $0x1b8] sm:$0xff]  ;;  %v4150_v43 = vld [vmem:[#allocation29 + $0x570] sm:$0xff] }
 0xd43   :  { %4636 = vmatpush.msra.mxu3 %v4231_v36  ;;  %4618 = vmatpush.msrb.mxu2 %v4105_v7  ;;  %v4024_v36 = vld [vmem:[#allocation29 + $0x180] sm:$0xff]  ;;  %v4143_v7 = vld [vmem:[#allocation29 + $0x538] sm:$0xff] }
 0xd45   :  { %4637 = vmatpush.msra.mxu3 %v4224_v12  ;;  %4619 = vmatpush.msrb.mxu2 %v4098_v3  ;;  %v4136_v12 = vld [vmem:[#allocation29 + $0x500] sm:$0xff]  ;;  %v4010_v3 = vld [vmem:[#allocation29 + $0x110] sm:$0xff] }
 0xd47   :  { %4638 = vmatpush.msra.mxu3 %v4217_v53  ;;  %4620 = vmatpush.msrb.mxu2 %v4091_v20  ;;  %v4129_v53 = vld [vmem:[#allocation29 + $0x4c8] sm:$0xff]  ;;  %v4003_v20 = vld [vmem:[#allocation29 + $0xd8] sm:$0xff] }
 0xd48   :  { %4621 = vmatmul.f32.vlgmr.msrb.gmra.mxu2 %v7642_v33 }
 0xd49   :  { %4639 = vmatpush.msra.mxu3 %v4210_v61  ;;  %4705 = vmatpush.msra.mxu2 %v4309_v51  ;;  %v4122_v61 = vld [vmem:[#allocation29 + $0x490] sm:$0xff]  ;;  %v3996_v51 = vld [vmem:[#allocation29 + $0xa0] sm:$0xff] }
 0xd4b   :  { %4640 = vmatpush.msra.mxu3 %v4203_v34  ;;  %4706 = vmatpush.msra.mxu2 %v4302_v49  ;;  %v4115_v34 = vld [vmem:[#allocation29 + $0x458] sm:$0xff]  ;;  %v3989_v49 = vld [vmem:[#allocation29 + $0x68] sm:$0xff] }
 0xd4c   :  { %4641 = vmatmul.f32.vlgmr.msra.gmra.mxu3 %v7632_v48 }
 0xd4d   :  { %4739 = vmatpush.msrb.mxu3 %v4323_v32  ;;  %4707 = vmatpush.msra.mxu2 %v4295_v59  ;;  %v4108_v32 = vld [vmem:[#allocation29 + $0x420] sm:$0xff]  ;;  %v3982_v59 = vld [vmem:[#allocation29 + $0x30] sm:$0xff] }
 0xd4f   :  { %4740 = vmatpush.msrb.mxu3 %v4316_v11  ;;  %4708 = vmatpush.msra.mxu2 %v4288_v5  ;;  %v4101_v11 = vld [vmem:[#allocation29 + $0x3e8] sm:$0xff]  ;;  %v4362_v5 = vpop.f32.mrf.mxu3 }
 0xd51   :  { %4745 = vmatpush.msra.mxu3 %v4086_v46  ;;  %4709 = vmatpush.msra.mxu2 %v4281_v55  ;;  %v4094_v46 = vld [vmem:[#allocation29 + $0x3b0] sm:$0xff] }
 0xd53   :  { %4746 = vmatpush.msra.mxu3 %v4079_v35  ;;  %4710 = vmatpush.msra.mxu2 %v4274_v28 }
 0xd54   :  { %5412 = vmatmul.msk.f32.vlgmr.msrb.gmra.mxu3 %vm1431_vm5, %v7647_v30 }
 0xd55   :  { %4747 = vmatpush.msra.mxu3 %v4072_v14  ;;  %4711 = vmatpush.msra.mxu2 %v4267_v18  ;;  %v4402_v14 = vpop.f32.mrf.mxu1 }
 0xd57   :  { %4748 = vmatpush.msra.mxu3 %v4065_v21  ;;  %4712 = vmatpush.msra.mxu2 %v4260_v52  ;;  %v7682_v21 = vld [vmem:[#allocation31] sm:$0x7f] }
 0xd58   :  { %v4330_v52 = vperm.slane %v7682_v21, 2 }
 0xd59   :  { %4749 = vmatpush.msra.mxu3 %v4058_v25  ;;  %4713 = vmatpush.msra.mxu2 %v4253_v45  ;;  %v4329_v25 = vperm.slane %v7682_v21, 1 }
 0xd5b   :  { %4750 = vmatpush.msra.mxu3 %v4051_v15  ;;  %4714 = vmatpush.msra.mxu2 %v4246_v6 }
 0xd5d   :  { %4751 = vmatpush.msra.mxu3 %v4044_v23  ;;  %4715 = vmatpush.msra.mxu2 %v4239_v29  ;;  %v4482_v45 = vpop.f32.mrf.mxu1  ;;  %v4328_v29 = vperm.slane %v7682_v21, 0 }
 0xd5f   :  { %4752 = vmatpush.msra.mxu3 %v4037_v26  ;;  %4716 = vmatpush.msra.mxu2 %v4232_v56  ;;  %v4331_v56 = vperm.slane %v7682_v21, 3 }
 0xd61   :  { %4753 = vmatpush.msra.mxu3 %v4030_v54  ;;  %4717 = vmatpush.msra.mxu2 %v4225_v47 }
 0xd63   :  { %4754 = vmatpush.msra.mxu3 %v4023_v38  ;;  %4718 = vmatpush.msra.mxu2 %v4218_v17  ;;  %v4363_v17 = vadd.f32 %v4362_v5, %v4328_v29 }
 0xd65   :  { %4755 = vmatpush.msra.mxu3 %v4016_v4  ;;  %4719 = vmatpush.msra.mxu2 %v4211_v39  ;;  %v4602_v4 = vpop.f32.mrf.mxu0  ;;  %v4562_v39 = vpop.f32.mrf.mxu1 }
 0xd67   :  { %4756 = vmatpush.msra.mxu3 %v4009_v2  ;;  %4720 = vmatpush.msra.mxu2 %v4204_v24  ;;  %v4603_v2 = vadd.f32 %v4602_v4, %v4331_v56 }
 0xd68   :  { %4721 = vmatmul.f32.vlgmr.msra.gmra.mxu2 %v7632_v48  ;;  %v4178_v48 = vld [vmem:[#allocation29 + $0x650] sm:$0xff] }
 0xd69   :  { %4757 = vmatpush.msra.mxu3 %v4002_v9  ;;  %4819 = vmatpush.msrb.mxu2 %v4324_v10 }
 0xd6b   :  { %4758 = vmatpush.msra.mxu3 %v3995_v1  ;;  %4820 = vmatpush.msrb.mxu2 %v4317_v13 }
 0xd6d   :  { %4759 = vmatpush.msra.mxu3 %v3988_v37  ;;  %4825 = vmatpush.msra.mxu2 %v4087_v40 }
 0xd6f   :  { %4760 = vmatpush.msra.mxu3 %v3981_v41  ;;  %4826 = vmatpush.msra.mxu2 %v4080_v62 }
 0xd70   :  { %4761 = vmatmul.f32.vlgmr.msra.gmra.mxu3 %v7625_v58  ;;  %5413 = vmatmul.msk.f32.vlgmr.msrb.gmra.mxu2 %vm1431_vm5, %v7647_v30  ;;  %v4017_v30 = vld [vmem:[#allocation29 + $0x148] sm:$0xff]  ;;  %vm4933_vm5 = vcmask 1043458  }
 0xd71   :  { %4845 = vmatpush.msrb.mxu3 %v4199_v63  ;;  %4827 = vmatpush.msra.mxu2 %v4073_v42  ;;  %vm4934_vm15 = vmor %vm4933_vm5, %vm3804_vm13 }
 0xd72   :  { %vm4936_vm4 = vmor %vm4935_vm14, %vm4934_vm15 }
 0xd73   :  { %4846 = vmatpush.msrb.mxu3 %v4192_v50  ;;  %4828 = vmatpush.msra.mxu2 %v4066_v8 }
 0xd75   :  { %4847 = vmatpush.msrb.mxu3 %v4185_v19  ;;  %4829 = vmatpush.msra.mxu2 %v4059_v22 }
 0xd77   :  { %4848 = vmatpush.msrb.mxu3 %v4178_v48  ;;  %4830 = vmatpush.msra.mxu2 %v4052_v0 }
 0xd79   :  { %4849 = vmatpush.msrb.mxu3 %v4171_v57  ;;  %4831 = vmatpush.msra.mxu2 %v4045_v16 }
 0xd7b   :  { %4850 = vmatpush.msrb.mxu3 %v4164_v31  ;;  %4832 = vmatpush.msra.mxu2 %v4038_v60 }
 0xd7d   :  { %4851 = vmatpush.msrb.mxu3 %v4157_v44  ;;  %4833 = vmatpush.msra.mxu2 %v4031_v27 }
 0xd7f   :  { %4852 = vmatpush.msrb.mxu3 %v4150_v43  ;;  %4834 = vmatpush.msra.mxu2 %v4024_v36  ;;  %v4682_v36 = vpop.f32.mrf.mxu1 }
 0xd81   :  { %4853 = vmatpush.msrb.mxu3 %v4143_v7  ;;  %4835 = vmatpush.msra.mxu2 %v4017_v30  ;;  %v4333_v7 = vperm.slane %v7682_v21, 5 }
 0xd83   :  { %4854 = vmatpush.msrb.mxu3 %v4136_v12  ;;  %4836 = vmatpush.msra.mxu2 %v4010_v3 }
 0xd85   :  { %4855 = vmatpush.msrb.mxu3 %v4129_v53  ;;  %4837 = vmatpush.msra.mxu2 %v4003_v20 }
 0xd87   :  { %4856 = vmatpush.msrb.mxu3 %v4122_v61  ;;  %4838 = vmatpush.msra.mxu2 %v3996_v51  ;;  %v4662_v63 = vpop.f32.mrf.mxu0  ;;  %v4782_v20 = vpop.f32.mrf.mxu1  ;;  %v4332_v51 = vperm.slane %v7682_v21, 4 }
 0xd89   :  { %4857 = vmatpush.msrb.mxu3 %v4115_v34  ;;  %4839 = vmatpush.msra.mxu2 %v3989_v49 }
 0xd8b   :  { %4858 = vmatpush.msrb.mxu3 %v4108_v32  ;;  %4840 = vmatpush.msra.mxu2 %v3982_v59  ;;  %v4334_v32 = vperm.slane %v7682_v21, 6  ;;  %v4683_v59 = vadd.f32 %v4682_v36, %v4332_v51 }
 0xd8c   :  { %4841 = vmatmul.f32.vlgmr.msra.gmra.mxu2 %v7625_v58  ;;  %v4382_v58 = vpop.f32.mrf.mxu2 }
 0xd8d   :  { %4859 = vmatpush.msrb.mxu3 %v4101_v11  ;;  %v4383_v9 = vadd.f32 %v4382_v58, %v4363_v17 }
 0xd8f   :  { %4860 = vmatpush.msrb.mxu3 %v4094_v46  ;;  %v4403_v41 = vadd.f32 %v4402_v14, %v4383_v9  ;;  %v4882_v14 = vpop.f32.mrf.mxu1 }
 0xd90   :  { %4861 = vmatmul.f32.vlgmr.msrb.gmra.mxu3 %v7642_v33  ;;  %v4422_v33 = vpop.f32.mrf.mxu3 }
 0xd91   :  { %v4423_v42 = vadd.f32 %v4422_v33, %v4403_v41 }
 0xd94   :  { %v4442_v35 = vpop.f32.mrf.mxu2 }
 0xd95   :  { %v4443_v15 = vadd.f32 %v4442_v35, %v4329_v25 }
 0xd98   :  { %v4462_v55 = vpop.f32.mrf.mxu3 }
 0xd99   :  { %v4463_v23 = vadd.f32 %v4462_v55, %v4443_v15 }
 0xd9b   :  { %v4483_v47 = vadd.f32 %v4482_v45, %v4463_v23 }
 0xd9c   :  { %v4502_v28 = vpop.f32.mrf.mxu2 }
 0xd9d   :  { %v4503_v24 = vadd.f32 %v4502_v28, %v4483_v47 }
 0xd9f   :  { %5478 = vtanh.f32 %v4503_v24 }
 0xda3   :  { %v4702_v12 = vpop.f32.mrf.mxu0 }
 0xda4   :  { %v4703_v46 = vadd.f32 %v4702_v12, %v4683_v59 }
 0xda5   :  { %v5479_v8 = vpop.eup %5478 }
 0xda6   :  { %v4919_v22 = vrot.slane %v5479_v8, 6 }
 0xdab   :  { %v4522_v18 = vpop.f32.mrf.mxu3  ;;  %v4542_v26 = vpop.f32.mrf.mxu2 }
 0xdac   :  { %v4523_v6 = vadd.f32 %v4522_v18, %v4330_v52 }
 0xdae   :  { %v4543_v38 = vadd.f32 %v4542_v26, %v4523_v6 }
 0xdaf   :  { %v4802_v34 = vpop.f32.mrf.mxu0 }
 0xdb0   :  { %v4563_v1 = vadd.f32 %v4562_v39, %v4543_v38 }
 0xdb3   :  { %v4582_v54 = vpop.f32.mrf.mxu3 }
 0xdb4   :  { %v4583_v37 = vadd.f32 %v4582_v54, %v4563_v1 }
 0xdb6   :  { %5480 = vtanh.f32 %v4583_v37 }
 0xdb7   :  { %v4902_v25 = vpop.f32.mrf.mxu0 }
 0xdbc   :  { %v5481_v19 = vpop.eup %5480 }
 0xdbd   :  { %v4920_v0 = vrot.slane %v5481_v19, 4 }
 0xdcb   :  { %v4622_v10 = vpop.f32.mrf.mxu2 }
 0xdcc   :  { %v4623_v13 = vadd.f32 %v4622_v10, %v4603_v2 }
 0xdcf   :  { %v4642_v40 = vpop.f32.mrf.mxu3 }
 0xdd0   :  { %v4643_v62 = vadd.f32 %v4642_v40, %v4623_v13 }
 0xdd2   :  { %v4663_v50 = vadd.f32 %v4662_v63, %v4643_v62 }
 0xdd4   :  { %5482 = vtanh.f32 %v4663_v50 }
 0xdd5   :  { %5484 = vtanh.f32 %v4423_v42 }
 0xdd7   :  { %v4742_v27 = vpop.f32.mrf.mxu3 }
 0xdda   :  { %v5483_v48 = vpop.eup %5482 }
 0xddb   :  { %v4921_v57 = vrot.slane %v5483_v48, 2  ;;  %v5485_v16 = vpop.eup %5484 }
 0xddc   :  { %v4924_v31 = vsel %vm3804_vm13, %v5485_v16, %v4919_v22 }
 0xddd   :  { %v4926_v60 = vsel %vm4925_vm2, %v4920_v0, %v4921_v57 }
 0xdde   :  { %v4927_v44 = vsel %vm1010_vm3, %v4924_v31, %v4926_v60 }
 0xddf   :  { %4932 = vst [vmem:[#allocation35] sm:$0xff] %v4927_v44 }
 0xdeb   :  { %v4722_v43 = vpop.f32.mrf.mxu2 }
 0xdec   :  { %v4723_v33 = vadd.f32 %v4722_v43, %v4703_v46 }
 0xdee   :  { %v4743_v18 = vadd.f32 %v4742_v27, %v4723_v33 }
 0xdf3   :  { %v4762_v30 = vpop.f32.mrf.mxu3  ;;  %v4822_v53 = vpop.f32.mrf.mxu2 }
 0xdf4   :  { %v4763_v3 = vadd.f32 %v4762_v30, %v4333_v7 }
 0xdf6   :  { %v4783_v61 = vadd.f32 %v4782_v20, %v4763_v3 }
 0xdf8   :  { %v4803_v49 = vadd.f32 %v4802_v34, %v4783_v61 }
 0xdfa   :  { %v4823_v5 = vadd.f32 %v4822_v53, %v4803_v49 }
 0xdfc   :  { %5486 = vtanh.f32 %v4823_v5 }
 0xe02   :  { %v5487_v15 = vpop.eup %5486 }
 0xe03   :  { %v4922_v45 = vrot.slane %v5487_v15, 6 }
 0xe0f   :  { %v4842_v11 = vpop.f32.mrf.mxu2 }
 0xe10   :  { %v4843_v58 = vadd.f32 %v4842_v11, %v4334_v32 }
 0xe13   :  { %v4862_v35 = vpop.f32.mrf.mxu3 }
 0xe14   :  { %v4863_v55 = vadd.f32 %v4862_v35, %v4843_v58 }
 0xe16   :  { %v4883_v28 = vadd.f32 %v4882_v14, %v4863_v55 }
 0xe18   :  { %v4903_v52 = vadd.f32 %v4902_v25, %v4883_v28 }
 0xe1a   :  { %5488 = vtanh.f32 %v4903_v52 }
 0xe1b   :  { %5490 = vtanh.f32 %v4743_v18 }
 0xe20   :  { %v5489_v21 = vpop.eup %5488 }
 0xe21   :  { %v5491_v23 = vpop.eup %5490  ;;  %v4923_v6 = vrot.slane %v5489_v21, 4 }
 0xe22   :  { %v4928_v26 = vsel %vm3804_vm13, %v5491_v23, %v4922_v45 }
 0xe23   :  { %v4929_v29 = vsel %vm1010_vm3, %v4928_v26, %v4923_v6 }
 0xe24   :  { %4937 = vst.msk [vmem:[#allocation35 + $0x8] sm:$0x3f] %vm4936_vm4, %v4929_v29 }
 0xe25   :  { %4970 = dma.vmem_to_hbm [thread:$0]  %s4966_s27, 224, %s4968_s13, [#allocation34]  }
 0xe26   :  { %6174 = dma.done.wait [#allocation4], 32  }
 0xe27   :  { %6175 = vsyncadd [#allocation4], 4294967264 }
 0xe28   :  { %6176 = dma.done.wait [#allocation34], 256  }
 0xe29   :  { %6177 = vsyncadd [#allocation34], 4294967040 }
 0xe2a   :  { %4991 = vsyncpa [#allocation3], 1 }
 0xe2b   :  { %4992 = vsyncpa [#allocation6], 1 }
 0xe2c   :  { %4993 = vsyncpa [#allocation9], 1 }
 0xe2d   :  { %4994 = vsyncpa [#allocation12], 1 }
 0xe2e   :  { %4995 = vsyncpa [#allocation15], 1 }
 0xe2f   :  { %4996 = vsyncpa [#allocation18], 1 }
 0xe30   :  { %4997 = vsyncpa [#allocation21], 1 }
 0xe31   :  { %4998 = vsyncpa [#allocation24], 1 }
 0xe32   :  { %4999 = vsyncpa [#allocation27], 1 }
 0xe33   :  { %5000 = vsyncpa [#allocation30], 1 }
 0xe34   :  { %5001 = vsyncpa [#allocation4], 1 }
 0xe35   :  { %5002 = vsyncpa [#allocation34], 1 }

</bundles_post_ra>
